<compile_context>
chip_gen: v5e
topology: v5e:2x2
jax: 0.10.0
libtpu: 0.0.40
codegen_flags: <defaults>
</compile_context>

<pallas_src>
from functools import partial

import numpy as np
import jax
import jax.numpy as jnp
from jax import lax
from jax.experimental import pallas as pl
from jax.experimental.pallas import tpu as pltpu

# ----- small configuration consistent with the module -----
NUM_IMAGES = 2
NUM_POINTS = 5
D_LIST = (8, 8)          # per-image depth (batch['D']) -- static, as in PyTorch (.cpu().tolist())
H = W = 16               # in-plane size of each slice
CROP_SIZE = 8            # even (reference default 80)
DEPTH_SIZE = 4           # even (reference default 6)
XY_MAX = 16
IN_CHANS = 3
HEAD_IN_DIM = 32         # stand-in for efficientnet_b0 classifier.in_features (1280)
NUM_GRADES = 3
VOXELS = DEPTH_SIZE * CROP_SIZE * CROP_SIZE   # 256 -> lane axis (multiple of 128)


# ============ single fused Pallas kernel: backbone + head + softmax + loss ============
def _fused_kernel(crop_ref, conv_ref, head_ref, scal_ref, truth_ref,
                  grade_ref, loss_ref):
    n = crop_ref.shape[0]

    x3 = crop_ref[...]                        # (N, 1, V)  single-channel crops
    cp = conv_ref[...]                        # (F, 2): col0 = sum_c w_stem[:,c], col1 = b_stem
    w3 = cp[:, 0:1][None, :, :]               # (1, F, 1)
    b3 = cp[:, 1:2][None, :, :]               # (1, F, 1)

    # pointwise 3D conv (1x1x1, replicated channels collapsed) + bias + ReLU  -- pure VPU
    h = jnp.maximum(w3 * x3 + b3, 0.0)        # (N, F, V)
    feat = jnp.max(h, axis=2)                 # global max pool -> (N, F), F on lanes

    hp = head_ref[...]                        # (3, F): rows = ln_gamma, ln_beta, w_head
    ln_g, ln_b, w_head = hp[0:1, :], hp[1:2, :], hp[2:3, :]

    # classifier = LayerNorm(head_in_dim)  (+ Dropout(0) == identity)
    mu = jnp.mean(feat, axis=1, keepdims=True)
    var = jnp.mean((feat - mu) ** 2, axis=1, keepdims=True)
    feat_n = (feat - mu) * lax.rsqrt(var + 1e-5) * ln_g + ln_b          # (N, F)

    # head = Linear(F, 1) -> LogisticCumulativeLink(3)
    y = jnp.sum(feat_n * w_head, axis=1, keepdims=True) + scal_ref[0]   # (N, 1)
    s0 = jax.nn.sigmoid(scal_ref[1] - y)
    s1 = jax.nn.sigmoid(scal_ref[2] - y)
    cls = lax.broadcasted_iota(jnp.int32, (n, NUM_GRADES), 1)
    link = jnp.where(cls == 0, s0, jnp.where(cls == 1, s1 - s0, 1.0 - s1))   # (N, 3)

    # softmax over the 3 cumulative-link probabilities
    # (this matches the PyTorch forward: grade_probs = F.softmax(self.head(features), -1))
    m = jnp.max(link, axis=1, keepdims=True)
    e = jnp.exp(link - m)
    grade = e / jnp.sum(e, axis=1, keepdims=True)
    grade_ref[...] = grade                                               # one dense store

    # F_grade_loss: NLL with class weights [1,2,4], ignore_index=-1, clamp(eps)+log
    eps = 1e-5
    logp = jnp.log(jnp.clip(grade, eps, 1.0 - eps))
    cls3 = lax.broadcasted_iota(jnp.int32, (1, NUM_GRADES), 1)
    num = jnp.float32(0.0)
    den = jnp.float32(0.0)
    for i in range(n):                        # N is small & static -> unrolled scalar loop
        t = truth_ref[i]                      # int32 label read straight from SMEM
        valid = t != -1
        w_t = jnp.where(t == 0, 1.0, jnp.where(t == 1, 2.0, 4.0)).astype(jnp.float32)
        picked = jnp.sum(jnp.where(cls3 == t, logp[i:i + 1, :], 0.0))
        num = num + jnp.where(valid, w_t * (-picked), 0.0)
        den = den + jnp.where(valid, w_t, 0.0)
    loss_ref[0] = num / den


def fused_backbone_head_loss(crops_flat, truth_flat, params):
    n, v = crops_flat.shape
    f = params['w_stem'].shape[0]
    # channels are exact replicas (crop.repeat(in_chans, ...)), so the pointwise conv over
    # channels collapses exactly to sum_c w_stem[:, c] applied to the single-channel crop.
    w_sum = jnp.sum(params['w_stem'], axis=1)
    conv_pack = jnp.stack([w_sum, params['b_stem']], axis=1)                     # (F, 2)
    head_pack = jnp.stack([params['ln_g'], params['ln_b'], params['w_head']])    # (3, F)
    scalars = jnp.stack([jnp.asarray(params['b_head'], jnp.float32),
                         jnp.asarray(params['cut0'], jnp.float32),
                         jnp.asarray(params['cut1'], jnp.float32)])
    crops3 = crops_flat.reshape(n, 1, v)

    grade, loss = pl.pallas_call(
        _fused_kernel,
        out_shape=(jax.ShapeDtypeStruct((n, NUM_GRADES), jnp.float32),
                   jax.ShapeDtypeStruct((1,), jnp.float32)),
        grid=(1,),
        in_specs=[
            pl.BlockSpec((n, 1, v), lambda i: (0, 0, 0)),        # crops, V lane-dense
            pl.BlockSpec((f, 2), lambda i: (0, 0)),              # packed conv params
            pl.BlockSpec((3, f), lambda i: (0, 0)),              # packed head params
            pl.BlockSpec(memory_space=pltpu.MemorySpace.SMEM),   # 3 head scalars
            pl.BlockSpec(memory_space=pltpu.MemorySpace.SMEM),   # grade labels
        ],
        out_specs=(pl.BlockSpec((n, NUM_GRADES), lambda i: (0, 0)),
                   pl.BlockSpec(memory_space=pltpu.MemorySpace.SMEM)),
        compiler_params=pltpu.CompilerParams(dimension_semantics=("arbitrary",)),
    )(crops3, conv_pack, head_pack, scalars, truth_flat.astype(jnp.int32))
    return grade, loss


# ========================== on-device plain-JAX glue (jittable) ==========================
def synthetic_zxy_predictor(images, d_list, params):
    d_cumsum = [0] + list(np.cumsum(d_list))
    zs, xys = [], []
    for i, d_i in enumerate(d_list):
        m = jnp.mean(images[int(d_cumsum[i]):int(d_cumsum[i + 1])])
        zs.append(jax.nn.sigmoid(m * params['wz'] + params['bz']) * (d_i - 1))
        xys.append(jax.nn.sigmoid(m * params['wxy'] + params['bxy']) * XY_MAX)
    return jnp.stack(zs), jnp.stack(xys)          # (B, P), (B, P, 2)


def extract_crops_on_device(images, d_list, z_pred, xy_pred):
    # mirrors SecondStageModelV2.extract_crop_3d entirely on device (no host sync):
    # zero-pad each slab by (half_depth, half_size, half_size) so clamp + crop + zero-pad
    # becomes a single always-in-bounds dynamic_slice of the padded volume.
    hd, hs = DEPTH_SIZE // 2, CROP_SIZE // 2
    d_cumsum = [0] + list(np.cumsum(d_list))
    crops = []
    for i, d_i in enumerate(d_list):
        slab = images[int(d_cumsum[i]):int(d_cumsum[i + 1])]          # (D_i, H, W)
        padded = jnp.pad(slab, ((hd, hd), (hs, hs), (hs, hs)))
        for p in range(NUM_POINTS):
            z = jnp.clip(jnp.round(z_pred[i, p]).astype(jnp.int32), 0, d_i - 1)
            x = jnp.clip(jnp.round(W * xy_pred[i, p, 0] / XY_MAX).astype(jnp.int32), 0, W - 1)
            y = jnp.clip(jnp.round(H * xy_pred[i, p, 1] / XY_MAX).astype(jnp.int32), 0, H - 1)
            crop = lax.dynamic_slice(padded, (z, y, x), (DEPTH_SIZE, CROP_SIZE, CROP_SIZE))
            # F.interpolate(trilinear) to (depth_size, crop_size, crop_size) is the identity
            # here; the channel repeat to in_chans is folded into w_stem.sum(1) in the kernel.
            crops.append(crop.reshape(-1))
    return jnp.stack(crops)                        # (B*P, V) single-channel flattened crops


@partial(jax.jit, static_argnames=('d_list', 'output_type'))
def second_stage_forward(images, grade, params, d_list, output_type=('loss', 'infer')):
    z_pred, xy_pred = synthetic_zxy_predictor(images, d_list, params)
    crops_flat = extract_crops_on_device(images, d_list, z_pred, xy_pred)   # (N, V)
    truth = grade.reshape(-1).astype(jnp.int32)
    # TODO(synk): torch's `assert torch.any(truth != -1)` is dropped to keep the forward
    # jittable (it forced a host sync); with all labels == -1 the loss is NaN as in torch.
    grade_probs, loss = fused_backbone_head_loss(crops_flat, truth, params)
    out = {}
    if 'loss' in output_type:
        out['grade_loss'] = loss[0]
    if 'infer' in output_type:
        out['grade'] = grade_probs.reshape(len(d_list), NUM_POINTS, NUM_GRADES)
    return out, crops_flat


def init_params(key):
    ks = jax.random.split(key, 9)
    f, c, p = HEAD_IN_DIM, IN_CHANS, NUM_POINTS
    return {
        'w_stem': jax.random.normal(ks[0], (f, c), jnp.float32) * (c ** -0.5),
        'b_stem': jax.random.normal(ks[1], (f,), jnp.float32) * 0.05,
        'ln_g': 1.0 + 0.1 * jax.random.normal(ks[7], (f,), jnp.float32),
        'ln_b': 0.1 * jax.random.normal(ks[8], (f,), jnp.float32),
        'w_head': jax.random.normal(ks[2], (f,), jnp.float32) * (f ** -0.5),
        'b_head': 0.0,
        'cut0': -0.5,          # LogisticCumulativeLink(3) cutpoints
        'cut1': 0.5,
        'wz': jax.random.normal(ks[3], (p,), jnp.float32),
        'bz': jax.random.normal(ks[4], (p,), jnp.float32),
        'wxy': jax.random.normal(ks[5], (p, 2), jnp.float32),
        'bxy': jax.random.normal(ks[6], (p, 2), jnp.float32),
    }


# ============================== numpy reference check ==============================
def _reference(crops_flat, truth, params):
    x = np.asarray(crops_flat)                                   # (N, V) single-channel
    ws = np.asarray(params['w_stem'])                            # (F, C)
    n, v = x.shape
    xc = np.broadcast_to(x[:, None, :], (n, ws.shape[1], v))     # replicated channels
    bs = np.asarray(params['b_stem'])
    g = np.asarray(params['ln_g']); b = np.asarray(params['ln_b'])
    wh = np.asarray(params['w_head'])
    h = np.maximum(np.einsum('fc,ncv->nfv', ws, xc) + bs[None, :, None], 0.0)
    feat = h.max(-1)
    mu = feat.mean(-1, keepdims=True); var = ((feat - mu) ** 2).mean(-1, keepdims=True)
    fn = (feat - mu) / np.sqrt(var + 1e-5) * g + b
    y = fn @ wh + params['b_head']
    s0 = 1.0 / (1.0 + np.exp(-(params['cut0'] - y)))
    s1 = 1.0 / (1.0 + np.exp(-(params['cut1'] - y)))
    link = np.stack([s0, s1 - s0, 1.0 - s1], -1)
    e = np.exp(link - link.max(-1, keepdims=True))
    grade = e / e.sum(-1, keepdims=True)
    logp = np.log(np.clip(grade, 1e-5, 1 - 1e-5))
    t = np.asarray(truth).reshape(-1)
    w_cls = np.array([1.0, 2.0, 4.0])
    num = den = 0.0
    for i, ti in enumerate(t):
        if ti == -1:
            continue
        num += w_cls[ti] * (-logp[i, ti]); den += w_cls[ti]
    return grade, num / den


if __name__ == "__main__":
    key = jax.random.PRNGKey(0)
    k_img, k_par = jax.random.split(key)
    params = init_params(k_par)
    images = jax.random.uniform(k_img, (sum(D_LIST), H, W), jnp.float32)
    grade = jnp.array([[0, 1, 2, -1, 1],
                       [2, 0, 1, 2, 0]], jnp.int32)

    out, crops_flat = second_stage_forward(images, grade, params, d_list=D_LIST)
    jax.block_until_ready(out['grade'])
    jax.block_until_ready(out['grade_loss'])

    ref_grade, ref_loss = _reference(crops_flat, grade, params)
    np.testing.assert_allclose(np.asarray(out['grade']).reshape(-1, NUM_GRADES),
                               ref_grade, rtol=2e-3, atol=2e-3)
    np.testing.assert_allclose(float(out['grade_loss']), ref_loss, rtol=2e-3, atol=2e-3)
    print("KERNEL_OK")
</pallas_src>

<mosaic_0001>
module attributes {stable_mosaic.version = 11 : i64} {
  func.func @_fused_kernel(%arg0: i32, %arg1: memref<10x1x256xf32, #tpu.memory_space<vmem>>, %arg2: memref<32x2xf32, #tpu.memory_space<vmem>>, %arg3: memref<3x32xf32, #tpu.memory_space<vmem>>, %arg4: memref<3xf32, #tpu.memory_space<smem>>, %arg5: memref<10xi32, #tpu.memory_space<smem>>, %arg6: memref<10x3xf32, #tpu.memory_space<vmem>>, %arg7: memref<1xf32, #tpu.memory_space<smem>>) attributes {dimension_semantics = [#tpu.dimension_semantics<arbitrary>], iteration_bounds = array<i64: 1>, scalar_prefetch = 0 : i64, scratch_operands = 0 : i64, tpu.core_type = #tpu.core_type<tc>, window_params = [{pipeline_mode = #tpu.pipeline_mode<synchronous>, transform_indices = @transform_0, window_bounds = array<i64: 10, 1, 256>}, {pipeline_mode = #tpu.pipeline_mode<synchronous>, transform_indices = @transform_1, window_bounds = array<i64: 32, 2>}, {pipeline_mode = #tpu.pipeline_mode<synchronous>, transform_indices = @transform_2, window_bounds = array<i64: 3, 32>}, {transform_indices = @transform_3, window_bounds = array<i64: 3>}, {transform_indices = @transform_4, window_bounds = array<i64: 10>}, {pipeline_mode = #tpu.pipeline_mode<synchronous>, transform_indices = @transform_5, window_bounds = array<i64: 10, 3>}, {transform_indices = @transform_6, window_bounds = array<i64: 1>}]} {
    %c0 = arith.constant 0 : index
    %c0_0 = arith.constant 0 : index
    %c0_1 = arith.constant 0 : index
    %0 = vector.load %arg1[%c0, %c0_0, %c0_1] : memref<10x1x256xf32, #tpu.memory_space<vmem>>, vector<10x1x256xf32>
    %c0_2 = arith.constant 0 : index
    %c0_3 = arith.constant 0 : index
    %1 = vector.load %arg2[%c0_2, %c0_3] : memref<32x2xf32, #tpu.memory_space<vmem>>, vector<32x2xf32>
    %2 = vector.extract_strided_slice %1 {offsets = [0, 0], sizes = [32, 1], strides = [1, 1]} : vector<32x2xf32> to vector<32x1xf32>
    %3 = vector.shape_cast %2 : vector<32x1xf32> to vector<1x32x1xf32>
    %4 = vector.extract_strided_slice %1 {offsets = [0, 1], sizes = [32, 1], strides = [1, 1]} : vector<32x2xf32> to vector<32x1xf32>
    %5 = vector.shape_cast %4 : vector<32x1xf32> to vector<1x32x1xf32>
    %6 = vector.broadcast %3 : vector<1x32x1xf32> to vector<10x32x256xf32>
    %7 = vector.broadcast %0 : vector<10x1x256xf32> to vector<10x32x256xf32>
    %8 = arith.mulf %6, %7 : vector<10x32x256xf32>
    %9 = vector.broadcast %5 : vector<1x32x1xf32> to vector<10x32x256xf32>
    %10 = arith.addf %8, %9 : vector<10x32x256xf32>
    %cst = arith.constant 0.000000e+00 : f32
    %11 = vector.broadcast %cst : f32 to vector<10x32x256xf32>
    %12 = arith.maximumf %10, %11 : vector<10x32x256xf32>
    %cst_4 = arith.constant dense<0xFF800000> : vector<10x32xf32>
    %13 = vector.multi_reduction <maximumf>, %12, %cst_4 [2] : vector<10x32x256xf32> to vector<10x32xf32>
    %c0_5 = arith.constant 0 : index
    %c0_6 = arith.constant 0 : index
    %14 = vector.load %arg3[%c0_5, %c0_6] : memref<3x32xf32, #tpu.memory_space<vmem>>, vector<3x32xf32>
    %15 = vector.extract_strided_slice %14 {offsets = [0, 0], sizes = [1, 32], strides = [1, 1]} : vector<3x32xf32> to vector<1x32xf32>
    %16 = vector.extract_strided_slice %14 {offsets = [1, 0], sizes = [1, 32], strides = [1, 1]} : vector<3x32xf32> to vector<1x32xf32>
    %17 = vector.extract_strided_slice %14 {offsets = [2, 0], sizes = [1, 32], strides = [1, 1]} : vector<3x32xf32> to vector<1x32xf32>
    %cst_7 = arith.constant dense<0.000000e+00> : vector<10xf32>
    %18 = vector.multi_reduction <add>, %13, %cst_7 [1] : vector<10x32xf32> to vector<10xf32>
    %19 = vector.shape_cast %18 : vector<10xf32> to vector<10x1xf32>
    %cst_8 = arith.constant 3.200000e+01 : f32
    %20 = vector.broadcast %cst_8 : f32 to vector<10x1xf32>
    %21 = arith.divf %19, %20 : vector<10x1xf32>
    %22 = vector.broadcast %21 : vector<10x1xf32> to vector<10x32xf32>
    %23 = arith.subf %13, %22 : vector<10x32xf32>
    %24 = arith.mulf %23, %23 : vector<10x32xf32>
    %cst_9 = arith.constant dense<0.000000e+00> : vector<10xf32>
    %25 = vector.multi_reduction <add>, %24, %cst_9 [1] : vector<10x32xf32> to vector<10xf32>
    %26 = vector.shape_cast %25 : vector<10xf32> to vector<10x1xf32>
    %cst_10 = arith.constant 3.200000e+01 : f32
    %27 = vector.broadcast %cst_10 : f32 to vector<10x1xf32>
    %28 = arith.divf %26, %27 : vector<10x1xf32>
    %29 = vector.broadcast %21 : vector<10x1xf32> to vector<10x32xf32>
    %30 = arith.subf %13, %29 : vector<10x32xf32>
    %cst_11 = arith.constant 9.99999974E-6 : f32
    %31 = vector.broadcast %cst_11 : f32 to vector<10x1xf32>
    %32 = arith.addf %28, %31 : vector<10x1xf32>
    %33 = math.rsqrt %32 : vector<10x1xf32>
    %34 = vector.broadcast %33 : vector<10x1xf32> to vector<10x32xf32>
    %35 = arith.mulf %30, %34 : vector<10x32xf32>
    %36 = vector.broadcast %15 : vector<1x32xf32> to vector<10x32xf32>
    %37 = arith.mulf %35, %36 : vector<10x32xf32>
    %38 = vector.broadcast %16 : vector<1x32xf32> to vector<10x32xf32>
    %39 = arith.addf %37, %38 : vector<10x32xf32>
    %40 = vector.broadcast %17 : vector<1x32xf32> to vector<10x32xf32>
    %41 = arith.mulf %39, %40 : vector<10x32xf32>
    %cst_12 = arith.constant dense<0.000000e+00> : vector<10xf32>
    %42 = vector.multi_reduction <add>, %41, %cst_12 [1] : vector<10x32xf32> to vector<10xf32>
    %43 = vector.shape_cast %42 : vector<10xf32> to vector<10x1xf32>
    %c0_13 = arith.constant 0 : index
    %44 = memref.load %arg4[%c0_13] : memref<3xf32, #tpu.memory_space<smem>>
    %45 = vector.broadcast %44 : f32 to vector<10x1xf32>
    %46 = arith.addf %43, %45 : vector<10x1xf32>
    %c1 = arith.constant 1 : index
    %47 = memref.load %arg4[%c1] : memref<3xf32, #tpu.memory_space<smem>>
    %48 = vector.broadcast %47 : f32 to vector<10x1xf32>
    %49 = arith.subf %48, %46 : vector<10x1xf32>
    %50 = arith.negf %49 : vector<10x1xf32>
    %51 = math.exp %50 : vector<10x1xf32>
    %cst_14 = arith.constant 1.000000e+00 : f32
    %52 = vector.broadcast %cst_14 : f32 to vector<10x1xf32>
    %53 = arith.addf %52, %51 : vector<10x1xf32>
    %54 = arith.divf %52, %53 : vector<10x1xf32>
    %c2 = arith.constant 2 : index
    %55 = memref.load %arg4[%c2] : memref<3xf32, #tpu.memory_space<smem>>
    %56 = vector.broadcast %55 : f32 to vector<10x1xf32>
    %57 = arith.subf %56, %46 : vector<10x1xf32>
    %58 = arith.negf %57 : vector<10x1xf32>
    %59 = math.exp %58 : vector<10x1xf32>
    %cst_15 = arith.constant 1.000000e+00 : f32
    %60 = vector.broadcast %cst_15 : f32 to vector<10x1xf32>
    %61 = arith.addf %60, %59 : vector<10x1xf32>
    %62 = arith.divf %60, %61 : vector<10x1xf32>
    %63 = tpu.iota {dimensions = array<i32: 1>} : vector<10x3xi32>
    %c0_i32 = arith.constant 0 : i32
    %64 = vector.broadcast %c0_i32 : i32 to vector<10x3xi32>
    %65 = arith.cmpi eq, %63, %64 : vector<10x3xi32>
    %c1_i32 = arith.constant 1 : i32
    %66 = vector.broadcast %c1_i32 : i32 to vector<10x3xi32>
    %67 = arith.cmpi eq, %63, %66 : vector<10x3xi32>
    %68 = arith.subf %62, %54 : vector<10x1xf32>
    %cst_16 = arith.constant 1.000000e+00 : f32
    %69 = vector.broadcast %cst_16 : f32 to vector<10x1xf32>
    %70 = arith.subf %69, %62 : vector<10x1xf32>
    %71 = vector.shape_cast %68 : vector<10x1xf32> to vector<10x1xf32>
    %72 = vector.broadcast %71 : vector<10x1xf32> to vector<10x3xf32>
    %73 = vector.shape_cast %70 : vector<10x1xf32> to vector<10x1xf32>
    %74 = vector.broadcast %73 : vector<10x1xf32> to vector<10x3xf32>
    %75 = arith.select %67, %72, %74 : vector<10x3xi1>, vector<10x3xf32>
    %76 = vector.shape_cast %54 : vector<10x1xf32> to vector<10x1xf32>
    %77 = vector.broadcast %76 : vector<10x1xf32> to vector<10x3xf32>
    %78 = arith.select %65, %77, %75 : vector<10x3xi1>, vector<10x3xf32>
    %cst_17 = arith.constant dense<0xFF800000> : vector<10xf32>
    %79 = vector.multi_reduction <maximumf>, %78, %cst_17 [1] : vector<10x3xf32> to vector<10xf32>
    %80 = vector.shape_cast %79 : vector<10xf32> to vector<10x1xf32>
    %81 = vector.broadcast %80 : vector<10x1xf32> to vector<10x3xf32>
    %82 = arith.subf %78, %81 : vector<10x3xf32>
    %83 = math.exp %82 : vector<10x3xf32>
    %cst_18 = arith.constant dense<0.000000e+00> : vector<10xf32>
    %84 = vector.multi_reduction <add>, %83, %cst_18 [1] : vector<10x3xf32> to vector<10xf32>
    %85 = vector.shape_cast %84 : vector<10xf32> to vector<10x1xf32>
    %86 = vector.broadcast %85 : vector<10x1xf32> to vector<10x3xf32>
    %87 = arith.divf %83, %86 : vector<10x3xf32>
    %c0_19 = arith.constant 0 : index
    %c0_20 = arith.constant 0 : index
    %88 = vector.load %arg6[%c0_19, %c0_20] : memref<10x3xf32, #tpu.memory_space<vmem>>, vector<10x3xf32>
    tpu.vector_store %arg6[%c0_19, %c0_20], %87 {strides = array<i32>} : memref<10x3xf32, #tpu.memory_space<vmem>>, vector<10x3xf32>,
    %cst_21 = arith.constant 9.99999974E-6 : f32
    %cst_22 = arith.constant 0.999989986 : f32
    %89 = vector.broadcast %cst_21 : f32 to vector<10x3xf32>
    %90 = arith.maximumf %89, %87 : vector<10x3xf32>
    %91 = vector.broadcast %cst_22 : f32 to vector<10x3xf32>
    %92 = arith.minimumf %91, %90 : vector<10x3xf32>
    %93 = math.log %92 : vector<10x3xf32>
    %94 = tpu.iota {dimensions = array<i32: 1>} : vector<1x3xi32>
    %c0_23 = arith.constant 0 : index
    %95 = memref.load %arg5[%c0_23] : memref<10xi32, #tpu.memory_space<smem>>
    %c-1_i32 = arith.constant -1 : i32
    %96 = arith.cmpi ne, %95, %c-1_i32 : i32
    %c0_i32_24 = arith.constant 0 : i32
    %97 = arith.cmpi eq, %95, %c0_i32_24 : i32
    %c1_i32_25 = arith.constant 1 : i32
    %98 = arith.cmpi eq, %95, %c1_i32_25 : i32
    %cst_26 = arith.constant 2.000000e+00 : f32
    %cst_27 = arith.constant 4.000000e+00 : f32
    %99 = arith.select %98, %cst_26, %cst_27 : f32
    %cst_28 = arith.constant 1.000000e+00 : f32
    %100 = arith.select %97, %cst_28, %99 : f32
    %101 = vector.broadcast %95 : i32 to vector<1x3xi32>
    %102 = arith.cmpi eq, %94, %101 : vector<1x3xi32>
    %103 = vector.extract_strided_slice %93 {offsets = [0, 0], sizes = [1, 3], strides = [1, 1]} : vector<10x3xf32> to vector<1x3xf32>
    %cst_29 = arith.constant 0.000000e+00 : f32
    %104 = vector.broadcast %cst_29 : f32 to vector<1x3xf32>
    %105 = arith.select %102, %103, %104 : vector<1x3xi1>, vector<1x3xf32>
    %106 = vector.shape_cast %105 : vector<1x3xf32> to vector<1x1x3xf32>
    %cst_30 = arith.constant dense<0.000000e+00> : vector<1xf32>
    %107 = vector.multi_reduction <add>, %106, %cst_30 [1, 2] : vector<1x1x3xf32> to vector<1xf32>
    %108 = vector.shape_cast %107 : vector<1xf32> to vector<1x1x1xf32>
    %109 = vector.extract %108[0, 0, 0] : f32 from vector<1x1x1xf32>
    %cst_31 = arith.constant 0.000000e+00 : f32
    %110 = arith.subf %cst_31, %109 : f32
    %111 = arith.mulf %100, %110 : f32
    %cst_32 = arith.constant 0.000000e+00 : f32
    %112 = arith.select %96, %111, %cst_32 : f32
    %cst_33 = arith.constant 0.000000e+00 : f32
    %113 = arith.addf %cst_33, %112 : f32
    %cst_34 = arith.constant 0.000000e+00 : f32
    %114 = arith.select %96, %100, %cst_34 : f32
    %cst_35 = arith.constant 0.000000e+00 : f32
    %115 = arith.addf %cst_35, %114 : f32
    %c1_36 = arith.constant 1 : index
    %116 = memref.load %arg5[%c1_36] : memref<10xi32, #tpu.memory_space<smem>>
    %c-1_i32_37 = arith.constant -1 : i32
    %117 = arith.cmpi ne, %116, %c-1_i32_37 : i32
    %c0_i32_38 = arith.constant 0 : i32
    %118 = arith.cmpi eq, %116, %c0_i32_38 : i32
    %c1_i32_39 = arith.constant 1 : i32
    %119 = arith.cmpi eq, %116, %c1_i32_39 : i32
    %cst_40 = arith.constant 2.000000e+00 : f32
    %cst_41 = arith.constant 4.000000e+00 : f32
    %120 = arith.select %119, %cst_40, %cst_41 : f32
    %cst_42 = arith.constant 1.000000e+00 : f32
    %121 = arith.select %118, %cst_42, %120 : f32
    %122 = vector.broadcast %116 : i32 to vector<1x3xi32>
    %123 = arith.cmpi eq, %94, %122 : vector<1x3xi32>
    %124 = vector.extract_strided_slice %93 {offsets = [1, 0], sizes = [1, 3], strides = [1, 1]} : vector<10x3xf32> to vector<1x3xf32>
    %cst_43 = arith.constant 0.000000e+00 : f32
    %125 = vector.broadcast %cst_43 : f32 to vector<1x3xf32>
    %126 = arith.select %123, %124, %125 : vector<1x3xi1>, vector<1x3xf32>
    %127 = vector.shape_cast %126 : vector<1x3xf32> to vector<1x1x3xf32>
    %cst_44 = arith.constant dense<0.000000e+00> : vector<1xf32>
    %128 = vector.multi_reduction <add>, %127, %cst_44 [1, 2] : vector<1x1x3xf32> to vector<1xf32>
    %129 = vector.shape_cast %128 : vector<1xf32> to vector<1x1x1xf32>
    %130 = vector.extract %129[0, 0, 0] : f32 from vector<1x1x1xf32>
    %cst_45 = arith.constant 0.000000e+00 : f32
    %131 = arith.subf %cst_45, %130 : f32
    %132 = arith.mulf %121, %131 : f32
    %cst_46 = arith.constant 0.000000e+00 : f32
    %133 = arith.select %117, %132, %cst_46 : f32
    %134 = arith.addf %113, %133 : f32
    %cst_47 = arith.constant 0.000000e+00 : f32
    %135 = arith.select %117, %121, %cst_47 : f32
    %136 = arith.addf %115, %135 : f32
    %c2_48 = arith.constant 2 : index
    %137 = memref.load %arg5[%c2_48] : memref<10xi32, #tpu.memory_space<smem>>
    %c-1_i32_49 = arith.constant -1 : i32
    %138 = arith.cmpi ne, %137, %c-1_i32_49 : i32
    %c0_i32_50 = arith.constant 0 : i32
    %139 = arith.cmpi eq, %137, %c0_i32_50 : i32
    %c1_i32_51 = arith.constant 1 : i32
    %140 = arith.cmpi eq, %137, %c1_i32_51 : i32
    %cst_52 = arith.constant 2.000000e+00 : f32
    %cst_53 = arith.constant 4.000000e+00 : f32
    %141 = arith.select %140, %cst_52, %cst_53 : f32
    %cst_54 = arith.constant 1.000000e+00 : f32
    %142 = arith.select %139, %cst_54, %141 : f32
    %143 = vector.broadcast %137 : i32 to vector<1x3xi32>
    %144 = arith.cmpi eq, %94, %143 : vector<1x3xi32>
    %145 = vector.extract_strided_slice %93 {offsets = [2, 0], sizes = [1, 3], strides = [1, 1]} : vector<10x3xf32> to vector<1x3xf32>
    %cst_55 = arith.constant 0.000000e+00 : f32
    %146 = vector.broadcast %cst_55 : f32 to vector<1x3xf32>
    %147 = arith.select %144, %145, %146 : vector<1x3xi1>, vector<1x3xf32>
    %148 = vector.shape_cast %147 : vector<1x3xf32> to vector<1x1x3xf32>
    %cst_56 = arith.constant dense<0.000000e+00> : vector<1xf32>
    %149 = vector.multi_reduction <add>, %148, %cst_56 [1, 2] : vector<1x1x3xf32> to vector<1xf32>
    %150 = vector.shape_cast %149 : vector<1xf32> to vector<1x1x1xf32>
    %151 = vector.extract %150[0, 0, 0] : f32 from vector<1x1x1xf32>
    %cst_57 = arith.constant 0.000000e+00 : f32
    %152 = arith.subf %cst_57, %151 : f32
    %153 = arith.mulf %142, %152 : f32
    %cst_58 = arith.constant 0.000000e+00 : f32
    %154 = arith.select %138, %153, %cst_58 : f32
    %155 = arith.addf %134, %154 : f32
    %cst_59 = arith.constant 0.000000e+00 : f32
    %156 = arith.select %138, %142, %cst_59 : f32
    %157 = arith.addf %136, %156 : f32
    %c3 = arith.constant 3 : index
    %158 = memref.load %arg5[%c3] : memref<10xi32, #tpu.memory_space<smem>>
    %c-1_i32_60 = arith.constant -1 : i32
    %159 = arith.cmpi ne, %158, %c-1_i32_60 : i32
    %c0_i32_61 = arith.constant 0 : i32
    %160 = arith.cmpi eq, %158, %c0_i32_61 : i32
    %c1_i32_62 = arith.constant 1 : i32
    %161 = arith.cmpi eq, %158, %c1_i32_62 : i32
    %cst_63 = arith.constant 2.000000e+00 : f32
    %cst_64 = arith.constant 4.000000e+00 : f32
    %162 = arith.select %161, %cst_63, %cst_64 : f32
    %cst_65 = arith.constant 1.000000e+00 : f32
    %163 = arith.select %160, %cst_65, %162 : f32
    %164 = vector.broadcast %158 : i32 to vector<1x3xi32>
    %165 = arith.cmpi eq, %94, %164 : vector<1x3xi32>
    %166 = vector.extract_strided_slice %93 {offsets = [3, 0], sizes = [1, 3], strides = [1, 1]} : vector<10x3xf32> to vector<1x3xf32>
    %cst_66 = arith.constant 0.000000e+00 : f32
    %167 = vector.broadcast %cst_66 : f32 to vector<1x3xf32>
    %168 = arith.select %165, %166, %167 : vector<1x3xi1>, vector<1x3xf32>
    %169 = vector.shape_cast %168 : vector<1x3xf32> to vector<1x1x3xf32>
    %cst_67 = arith.constant dense<0.000000e+00> : vector<1xf32>
    %170 = vector.multi_reduction <add>, %169, %cst_67 [1, 2] : vector<1x1x3xf32> to vector<1xf32>
    %171 = vector.shape_cast %170 : vector<1xf32> to vector<1x1x1xf32>
    %172 = vector.extract %171[0, 0, 0] : f32 from vector<1x1x1xf32>
    %cst_68 = arith.constant 0.000000e+00 : f32
    %173 = arith.subf %cst_68, %172 : f32
    %174 = arith.mulf %163, %173 : f32
    %cst_69 = arith.constant 0.000000e+00 : f32
    %175 = arith.select %159, %174, %cst_69 : f32
    %176 = arith.addf %155, %175 : f32
    %cst_70 = arith.constant 0.000000e+00 : f32
    %177 = arith.select %159, %163, %cst_70 : f32
    %178 = arith.addf %157, %177 : f32
    %c4 = arith.constant 4 : index
    %179 = memref.load %arg5[%c4] : memref<10xi32, #tpu.memory_space<smem>>
    %c-1_i32_71 = arith.constant -1 : i32
    %180 = arith.cmpi ne, %179, %c-1_i32_71 : i32
    %c0_i32_72 = arith.constant 0 : i32
    %181 = arith.cmpi eq, %179, %c0_i32_72 : i32
    %c1_i32_73 = arith.constant 1 : i32
    %182 = arith.cmpi eq, %179, %c1_i32_73 : i32
    %cst_74 = arith.constant 2.000000e+00 : f32
    %cst_75 = arith.constant 4.000000e+00 : f32
    %183 = arith.select %182, %cst_74, %cst_75 : f32
    %cst_76 = arith.constant 1.000000e+00 : f32
    %184 = arith.select %181, %cst_76, %183 : f32
    %185 = vector.broadcast %179 : i32 to vector<1x3xi32>
    %186 = arith.cmpi eq, %94, %185 : vector<1x3xi32>
    %187 = vector.extract_strided_slice %93 {offsets = [4, 0], sizes = [1, 3], strides = [1, 1]} : vector<10x3xf32> to vector<1x3xf32>
    %cst_77 = arith.constant 0.000000e+00 : f32
    %188 = vector.broadcast %cst_77 : f32 to vector<1x3xf32>
    %189 = arith.select %186, %187, %188 : vector<1x3xi1>, vector<1x3xf32>
    %190 = vector.shape_cast %189 : vector<1x3xf32> to vector<1x1x3xf32>
    %cst_78 = arith.constant dense<0.000000e+00> : vector<1xf32>
    %191 = vector.multi_reduction <add>, %190, %cst_78 [1, 2] : vector<1x1x3xf32> to vector<1xf32>
    %192 = vector.shape_cast %191 : vector<1xf32> to vector<1x1x1xf32>
    %193 = vector.extract %192[0, 0, 0] : f32 from vector<1x1x1xf32>
    %cst_79 = arith.constant 0.000000e+00 : f32
    %194 = arith.subf %cst_79, %193 : f32
    %195 = arith.mulf %184, %194 : f32
    %cst_80 = arith.constant 0.000000e+00 : f32
    %196 = arith.select %180, %195, %cst_80 : f32
    %197 = arith.addf %176, %196 : f32
    %cst_81 = arith.constant 0.000000e+00 : f32
    %198 = arith.select %180, %184, %cst_81 : f32
    %199 = arith.addf %178, %198 : f32
    %c5 = arith.constant 5 : index
    %200 = memref.load %arg5[%c5] : memref<10xi32, #tpu.memory_space<smem>>
    %c-1_i32_82 = arith.constant -1 : i32
    %201 = arith.cmpi ne, %200, %c-1_i32_82 : i32
    %c0_i32_83 = arith.constant 0 : i32
    %202 = arith.cmpi eq, %200, %c0_i32_83 : i32
    %c1_i32_84 = arith.constant 1 : i32
    %203 = arith.cmpi eq, %200, %c1_i32_84 : i32
    %cst_85 = arith.constant 2.000000e+00 : f32
    %cst_86 = arith.constant 4.000000e+00 : f32
    %204 = arith.select %203, %cst_85, %cst_86 : f32
    %cst_87 = arith.constant 1.000000e+00 : f32
    %205 = arith.select %202, %cst_87, %204 : f32
    %206 = vector.broadcast %200 : i32 to vector<1x3xi32>
    %207 = arith.cmpi eq, %94, %206 : vector<1x3xi32>
    %208 = vector.extract_strided_slice %93 {offsets = [5, 0], sizes = [1, 3], strides = [1, 1]} : vector<10x3xf32> to vector<1x3xf32>
    %cst_88 = arith.constant 0.000000e+00 : f32
    %209 = vector.broadcast %cst_88 : f32 to vector<1x3xf32>
    %210 = arith.select %207, %208, %209 : vector<1x3xi1>, vector<1x3xf32>
    %211 = vector.shape_cast %210 : vector<1x3xf32> to vector<1x1x3xf32>
    %cst_89 = arith.constant dense<0.000000e+00> : vector<1xf32>
    %212 = vector.multi_reduction <add>, %211, %cst_89 [1, 2] : vector<1x1x3xf32> to vector<1xf32>
    %213 = vector.shape_cast %212 : vector<1xf32> to vector<1x1x1xf32>
    %214 = vector.extract %213[0, 0, 0] : f32 from vector<1x1x1xf32>
    %cst_90 = arith.constant 0.000000e+00 : f32
    %215 = arith.subf %cst_90, %214 : f32
    %216 = arith.mulf %205, %215 : f32
    %cst_91 = arith.constant 0.000000e+00 : f32
    %217 = arith.select %201, %216, %cst_91 : f32
    %218 = arith.addf %197, %217 : f32
    %cst_92 = arith.constant 0.000000e+00 : f32
    %219 = arith.select %201, %205, %cst_92 : f32
    %220 = arith.addf %199, %219 : f32
    %c6 = arith.constant 6 : index
    %221 = memref.load %arg5[%c6] : memref<10xi32, #tpu.memory_space<smem>>
    %c-1_i32_93 = arith.constant -1 : i32
    %222 = arith.cmpi ne, %221, %c-1_i32_93 : i32
    %c0_i32_94 = arith.constant 0 : i32
    %223 = arith.cmpi eq, %221, %c0_i32_94 : i32
    %c1_i32_95 = arith.constant 1 : i32
    %224 = arith.cmpi eq, %221, %c1_i32_95 : i32
    %cst_96 = arith.constant 2.000000e+00 : f32
    %cst_97 = arith.constant 4.000000e+00 : f32
    %225 = arith.select %224, %cst_96, %cst_97 : f32
    %cst_98 = arith.constant 1.000000e+00 : f32
    %226 = arith.select %223, %cst_98, %225 : f32
    %227 = vector.broadcast %221 : i32 to vector<1x3xi32>
    %228 = arith.cmpi eq, %94, %227 : vector<1x3xi32>
    %229 = vector.extract_strided_slice %93 {offsets = [6, 0], sizes = [1, 3], strides = [1, 1]} : vector<10x3xf32> to vector<1x3xf32>
    %cst_99 = arith.constant 0.000000e+00 : f32
    %230 = vector.broadcast %cst_99 : f32 to vector<1x3xf32>
    %231 = arith.select %228, %229, %230 : vector<1x3xi1>, vector<1x3xf32>
    %232 = vector.shape_cast %231 : vector<1x3xf32> to vector<1x1x3xf32>
    %cst_100 = arith.constant dense<0.000000e+00> : vector<1xf32>
    %233 = vector.multi_reduction <add>, %232, %cst_100 [1, 2] : vector<1x1x3xf32> to vector<1xf32>
    %234 = vector.shape_cast %233 : vector<1xf32> to vector<1x1x1xf32>
    %235 = vector.extract %234[0, 0, 0] : f32 from vector<1x1x1xf32>
    %cst_101 = arith.constant 0.000000e+00 : f32
    %236 = arith.subf %cst_101, %235 : f32
    %237 = arith.mulf %226, %236 : f32
    %cst_102 = arith.constant 0.000000e+00 : f32
    %238 = arith.select %222, %237, %cst_102 : f32
    %239 = arith.addf %218, %238 : f32
    %cst_103 = arith.constant 0.000000e+00 : f32
    %240 = arith.select %222, %226, %cst_103 : f32
    %241 = arith.addf %220, %240 : f32
    %c7 = arith.constant 7 : index
    %242 = memref.load %arg5[%c7] : memref<10xi32, #tpu.memory_space<smem>>
    %c-1_i32_104 = arith.constant -1 : i32
    %243 = arith.cmpi ne, %242, %c-1_i32_104 : i32
    %c0_i32_105 = arith.constant 0 : i32
    %244 = arith.cmpi eq, %242, %c0_i32_105 : i32
    %c1_i32_106 = arith.constant 1 : i32
    %245 = arith.cmpi eq, %242, %c1_i32_106 : i32
    %cst_107 = arith.constant 2.000000e+00 : f32
    %cst_108 = arith.constant 4.000000e+00 : f32
    %246 = arith.select %245, %cst_107, %cst_108 : f32
    %cst_109 = arith.constant 1.000000e+00 : f32
    %247 = arith.select %244, %cst_109, %246 : f32
    %248 = vector.broadcast %242 : i32 to vector<1x3xi32>
    %249 = arith.cmpi eq, %94, %248 : vector<1x3xi32>
    %250 = vector.extract_strided_slice %93 {offsets = [7, 0], sizes = [1, 3], strides = [1, 1]} : vector<10x3xf32> to vector<1x3xf32>
    %cst_110 = arith.constant 0.000000e+00 : f32
    %251 = vector.broadcast %cst_110 : f32 to vector<1x3xf32>
    %252 = arith.select %249, %250, %251 : vector<1x3xi1>, vector<1x3xf32>
    %253 = vector.shape_cast %252 : vector<1x3xf32> to vector<1x1x3xf32>
    %cst_111 = arith.constant dense<0.000000e+00> : vector<1xf32>
    %254 = vector.multi_reduction <add>, %253, %cst_111 [1, 2] : vector<1x1x3xf32> to vector<1xf32>
    %255 = vector.shape_cast %254 : vector<1xf32> to vector<1x1x1xf32>
    %256 = vector.extract %255[0, 0, 0] : f32 from vector<1x1x1xf32>
    %cst_112 = arith.constant 0.000000e+00 : f32
    %257 = arith.subf %cst_112, %256 : f32
    %258 = arith.mulf %247, %257 : f32
    %cst_113 = arith.constant 0.000000e+00 : f32
    %259 = arith.select %243, %258, %cst_113 : f32
    %260 = arith.addf %239, %259 : f32
    %cst_114 = arith.constant 0.000000e+00 : f32
    %261 = arith.select %243, %247, %cst_114 : f32
    %262 = arith.addf %241, %261 : f32
    %c8 = arith.constant 8 : index
    %263 = memref.load %arg5[%c8] : memref<10xi32, #tpu.memory_space<smem>>
    %c-1_i32_115 = arith.constant -1 : i32
    %264 = arith.cmpi ne, %263, %c-1_i32_115 : i32
    %c0_i32_116 = arith.constant 0 : i32
    %265 = arith.cmpi eq, %263, %c0_i32_116 : i32
    %c1_i32_117 = arith.constant 1 : i32
    %266 = arith.cmpi eq, %263, %c1_i32_117 : i32
    %cst_118 = arith.constant 2.000000e+00 : f32
    %cst_119 = arith.constant 4.000000e+00 : f32
    %267 = arith.select %266, %cst_118, %cst_119 : f32
    %cst_120 = arith.constant 1.000000e+00 : f32
    %268 = arith.select %265, %cst_120, %267 : f32
    %269 = vector.broadcast %263 : i32 to vector<1x3xi32>
    %270 = arith.cmpi eq, %94, %269 : vector<1x3xi32>
    %271 = vector.extract_strided_slice %93 {offsets = [8, 0], sizes = [1, 3], strides = [1, 1]} : vector<10x3xf32> to vector<1x3xf32>
    %cst_121 = arith.constant 0.000000e+00 : f32
    %272 = vector.broadcast %cst_121 : f32 to vector<1x3xf32>
    %273 = arith.select %270, %271, %272 : vector<1x3xi1>, vector<1x3xf32>
    %274 = vector.shape_cast %273 : vector<1x3xf32> to vector<1x1x3xf32>
    %cst_122 = arith.constant dense<0.000000e+00> : vector<1xf32>
    %275 = vector.multi_reduction <add>, %274, %cst_122 [1, 2] : vector<1x1x3xf32> to vector<1xf32>
    %276 = vector.shape_cast %275 : vector<1xf32> to vector<1x1x1xf32>
    %277 = vector.extract %276[0, 0, 0] : f32 from vector<1x1x1xf32>
    %cst_123 = arith.constant 0.000000e+00 : f32
    %278 = arith.subf %cst_123, %277 : f32
    %279 = arith.mulf %268, %278 : f32
    %cst_124 = arith.constant 0.000000e+00 : f32
    %280 = arith.select %264, %279, %cst_124 : f32
    %281 = arith.addf %260, %280 : f32
    %cst_125 = arith.constant 0.000000e+00 : f32
    %282 = arith.select %264, %268, %cst_125 : f32
    %283 = arith.addf %262, %282 : f32
    %c9 = arith.constant 9 : index
    %284 = memref.load %arg5[%c9] : memref<10xi32, #tpu.memory_space<smem>>
    %c-1_i32_126 = arith.constant -1 : i32
    %285 = arith.cmpi ne, %284, %c-1_i32_126 : i32
    %c0_i32_127 = arith.constant 0 : i32
    %286 = arith.cmpi eq, %284, %c0_i32_127 : i32
    %c1_i32_128 = arith.constant 1 : i32
    %287 = arith.cmpi eq, %284, %c1_i32_128 : i32
    %cst_129 = arith.constant 2.000000e+00 : f32
    %cst_130 = arith.constant 4.000000e+00 : f32
    %288 = arith.select %287, %cst_129, %cst_130 : f32
    %cst_131 = arith.constant 1.000000e+00 : f32
    %289 = arith.select %286, %cst_131, %288 : f32
    %290 = vector.broadcast %284 : i32 to vector<1x3xi32>
    %291 = arith.cmpi eq, %94, %290 : vector<1x3xi32>
    %292 = vector.extract_strided_slice %93 {offsets = [9, 0], sizes = [1, 3], strides = [1, 1]} : vector<10x3xf32> to vector<1x3xf32>
    %cst_132 = arith.constant 0.000000e+00 : f32
    %293 = vector.broadcast %cst_132 : f32 to vector<1x3xf32>
    %294 = arith.select %291, %292, %293 : vector<1x3xi1>, vector<1x3xf32>
    %295 = vector.shape_cast %294 : vector<1x3xf32> to vector<1x1x3xf32>
    %cst_133 = arith.constant dense<0.000000e+00> : vector<1xf32>
    %296 = vector.multi_reduction <add>, %295, %cst_133 [1, 2] : vector<1x1x3xf32> to vector<1xf32>
    %297 = vector.shape_cast %296 : vector<1xf32> to vector<1x1x1xf32>
    %298 = vector.extract %297[0, 0, 0] : f32 from vector<1x1x1xf32>
    %cst_134 = arith.constant 0.000000e+00 : f32
    %299 = arith.subf %cst_134, %298 : f32
    %300 = arith.mulf %289, %299 : f32
    %cst_135 = arith.constant 0.000000e+00 : f32
    %301 = arith.select %285, %300, %cst_135 : f32
    %302 = arith.addf %281, %301 : f32
    %cst_136 = arith.constant 0.000000e+00 : f32
    %303 = arith.select %285, %289, %cst_136 : f32
    %304 = arith.addf %283, %303 : f32
    %305 = arith.divf %302, %304 : f32
    %c0_137 = arith.constant 0 : index
    %306 = memref.load %arg7[%c0_137] : memref<1xf32, #tpu.memory_space<smem>>
    memref.store %305, %arg7[%c0_137] : memref<1xf32, #tpu.memory_space<smem>>
    return
  }
  func.func @transform_0(%arg0: i32) -> (i32, i32, i32) {
    %c0_i32 = arith.constant 0 : i32
    %c0_i32_0 = arith.constant 0 : i32
    %c0_i32_1 = arith.constant 0 : i32
    %c0_i32_2 = arith.constant 0 : i32
    return %c0_i32, %c0_i32_0, %c0_i32_1 : i32, i32, i32
  }
  func.func @transform_1(%arg0: i32) -> (i32, i32) {
    %c0_i32 = arith.constant 0 : i32
    %c0_i32_0 = arith.constant 0 : i32
    %c0_i32_1 = arith.constant 0 : i32
    return %c0_i32, %c0_i32_0 : i32, i32
  }
  func.func @transform_2(%arg0: i32) -> (i32, i32) {
    %c0_i32 = arith.constant 0 : i32
    %c0_i32_0 = arith.constant 0 : i32
    %c0_i32_1 = arith.constant 0 : i32
    return %c0_i32, %c0_i32_0 : i32, i32
  }
  func.func @transform_3(%arg0: i32) -> i32 {
    %c0_i32 = arith.constant 0 : i32
    %c0_i32_0 = arith.constant 0 : i32
    return %c0_i32 : i32
  }
  func.func @transform_4(%arg0: i32) -> i32 {
    %c0_i32 = arith.constant 0 : i32
    %c0_i32_0 = arith.constant 0 : i32
    return %c0_i32 : i32
  }
  func.func @transform_5(%arg0: i32) -> (i32, i32) {
    %c0_i32 = arith.constant 0 : i32
    %c0_i32_0 = arith.constant 0 : i32
    %c0_i32_1 = arith.constant 0 : i32
    return %c0_i32, %c0_i32_0 : i32, i32
  }
  func.func @transform_6(%arg0: i32) -> i32 {
    %c0_i32 = arith.constant 0 : i32
    %c0_i32_0 = arith.constant 0 : i32
    return %c0_i32 : i32
  }
}

</mosaic_0001>

<bundles_post_ra>
// kernel: second_stage_forward.1
= control target key start
LH: loop header
LB: loop body
LE: loop exit
PB: predicated region body
PF: predicated region fallthrough
CT: control target
= control target key end

     0   :  { %s3668_s0 = inlined_call_operand.vmem [shape: f32[10,1,256], index: 0, kind: input, shape index: {}]   ;;  %s3669_s1 = inlined_call_operand.vmem [shape: f32[32,2], index: 1, kind: input, shape index: {}]   ;;  %s3670_s2 = inlined_call_operand.vmem [shape: f32[3,32], index: 2, kind: input, shape index: {}]   ;;  %s3671_s3 = inlined_call_operand.vmem [shape: f32[3], index: 3, kind: input, shape index: {}]   ;;  %s3672_s4 = inlined_call_operand.vmem [shape: s32[10], index: 4, kind: input, shape index: {}]   ;;  %s3673_s5 = inlined_call_operand.vmem [shape: f32[10,3], index: 5, kind: output, shape index: {0}]   ;;  %s3674_s6 = inlined_call_operand.hbm [shape: f32[1], index: 6, kind: output, shape index: {1}]  }
   0x1   :  { %3701 = sst [smem:[#allocation34_spill]] %s3674_s6 }
   0x2   :  { %12 = vsyncpa [#allocation4], 0 }
   0x3   :  { %13 = vsyncpa [#allocation6], 0 }
   0x4   :  { %14 = vsyncpa [#allocation3], 0  ;;  %s26_s23 = sshll.u32 %s3671_s3, 4  ;;  %s35_s26 = sshll.u32 %s3672_s4, 4  ;;  %s27_s23 = int_to_ptr.vmem [resolvable:$true] %s26_s23  ;;  %s36_s26 = int_to_ptr.vmem [resolvable:$true] %s35_s26 }
   0x5   :  { %s2167_s27 = smov [#allocation2]   ;;  %s2168_s28 = smov [#allocation5]  }
   0x6   :  { %29 = dma.vmem_to_smem %s27_s23, 16, %s2167_s27, [#allocation4]  }
   0x7   :  { %38 = dma.vmem_to_smem %s36_s26, 16, %s2168_s28, [#allocation6]  }
   0x8   :  { %2161 = dma.done.wait [#allocation4], 16  }
   0x9   :  { %2162 = vsyncadd [#allocation4], 4294967280 }
   0xa   :  { %2163 = dma.done.wait [#allocation6], 16  }
   0xb   :  { %2164 = vsyncadd [#allocation6], 4294967280 }
   0xc   :  { %47 = sfence }
   0xd   :  { %v60_v0 = vld [vmem:[%s3669_s1 + $0x10] sm:$0xff]  ;;  %v58_v1 = vld [vmem:[%s3669_s1] sm:$0xff]  ;;  %v3676_v2 = vmov 0   ;;  %v2170_v3 = vmov 1   ;;  %v61_v4 = vld [vmem:[%s3669_s1 + $0x18] sm:$0xff]  ;;  %vm554_vm0 = vcmask 130112  }
   0xe   :  { %2068 = vset.pattern.permute.xlu1 %v3676_v2  ;;  %2067 = vset.pattern.permute.xlu0 %v3676_v2  ;;  %v59_v5 = vld [vmem:[%s3669_s1 + $0x8] sm:$0xff]  ;;  %v48_v6 = vld [vmem:[%s3668_s0] sm:$0x3]  ;;  %v49_v18 = vld [vmem:[%s3668_s0 + $0x2] sm:$0x3]  ;;  %vm558_vm1 = vcmask 195712  }
   0xf   :  { %74 = vperm.xlu1 %2068, %v60_v0   ;;  %64 = vperm.xlu0 %2067, %v58_v1   ;;  %v92_v8 = vperm.slane %v48_v6, 0  ;;  %v93_v9 = vperm.slane %v48_v6, 1  ;;  %v94_v24 = vperm.slane %v49_v18, 0  ;;  %v95_v25 = vperm.slane %v49_v18, 1  ;;  %v50_v31 = vld [vmem:[%s3668_s0 + $0x4] sm:$0x3] }
  0x10   :  { %2069 = vset.pattern.permute.xlu2 %v2170_v3  ;;  %v2259_v34 = vperm.slane %v50_v31, 0  ;;  %v2263_v38 = vperm.slane %v50_v31, 1  ;;  %vm562_vm2 = vcmask 261312   ;;  %vm627_vm3 = vcmask 1041409   ;;  %s2024_s3 = sld [smem:[#allocation2 + $0x1]] }
  0x11   :  { %213 = vperm.xlu2 %2069, %v58_v1   ;;  %vm629_vm4 = vcmask 1042434   ;;  %vm631_vm5 = vcmask 1043459   ;;  %vm633_vm6 = vcmask 1044484   ;;  %vm635_vm7 = vcmask 1045509   ;;  %s2027_s7 = sld [smem:[#allocation2 + $0x2]] }
  0x12   :  { %vm637_vm8 = vcmask 1046534   ;;  %vm639_vm9 = vcmask 1047559   ;;  %vm644_vm10 = vcmask 261120   ;;  %vm648_vm11 = vcmask 254976   ;;  %s3440_s4 = sld [smem:[#allocation5]] }
  0x13   :  { %s3442_s8 = sld [smem:[#allocation5 + $0x1]] }
  0x14   :  { %s3444_s9 = sld [smem:[#allocation5 + $0x2]] }
  0x15   :  { %s3450_s12 = sld [smem:[#allocation5 + $0x3]] }
  0x16   :  { %s3452_s1 = sld [smem:[#allocation5 + $0x4]] }
  0x17   :  { %79 = vperm.xlu1 %2068, %v61_v4   ;;  %69 = vperm.xlu0 %2067, %v59_v5   ;;  %s3454_s13 = sld [smem:[#allocation5 + $0x5]] }
  0x18   :  { %s3459_s14 = sld [smem:[#allocation5 + $0x6]]  ;;  %p1712_p0 = scmp.eq.s32.totalorder %s3440_s4, 1 }
  0x19   :  { %217 = vperm.xlu2 %2069, %v59_v5   ;;  %s3479_s15 = sld [smem:[#allocation5 + $0x7]]  ;;  %p1711_p1 = scmp.eq.s32.totalorder %s3440_s4, 0 }
  0x1a   :  { %s3521_s16 = sld [smem:[#allocation5 + $0x8]]  ;;  %p1738_p2 = scmp.eq.s32.totalorder %s3442_s8, 1 }
  0x1b   :  { %s3525_s17 = sld [smem:[#allocation5 + $0x9]]  ;;  %p1710_p3 = scmp.ne.s32.totalorder %s3440_s4, 4294967295 }
  0x1c   :  { %p1737_p4 = scmp.eq.s32.totalorder %s3442_s8, 0  ;;  %p1736_p5 = scmp.ne.s32.totalorder %s3442_s8, 4294967295 }
  0x1d   :  { %s1739_s20 = scalar_select %p1738_p2, 2.0, 4.0 }
  0x1e   :  { %p1766_p6 = scmp.eq.s32.totalorder %s3444_s9, 1  ;;  %p1794_p7 = scmp.eq.s32.totalorder %s3450_s12, 1 }
  0x1f   :  { %2071 = vset.pattern.permute.xlu1 %v2170_v3  ;;  %2070 = vset.pattern.permute.xlu0 %v2170_v3  ;;  %s3768_s20 = smov (%p1737_p4, %s1739_s20), 1.0  ;;  %p1765_p8 = scmp.eq.s32.totalorder %s3444_s9, 0 }
  0x20   :  { %225 = vperm.xlu1 %2071, %v61_v4   ;;  %221 = vperm.xlu0 %2070, %v60_v0   ;;  %s1761_s22 = scalar_select %p1736_p5, %s3768_s20, 0.0 }
  0x21   :  { %3761 = sst [smem:[#allocation33_spill]] %s3525_s17  ;;  %p1793_p9 = scmp.eq.s32.totalorder %s3450_s12, 0 }
  0x22   :  { %s1767_s23 = scalar_select %p1766_p6, 2.0, 4.0 }
  0x23   :  { %s1795_s24 = scalar_select %p1794_p7, 2.0, 4.0 }
  0x24   :  { %p1764_p10 = scmp.ne.s32.totalorder %s3444_s9, 4294967295  ;;  %p1792_p11 = scmp.ne.s32.totalorder %s3450_s12, 4294967295 }
  0x25   :  { %p1822_p12 = scmp.eq.s32.totalorder %s3452_s1, 1  ;;  %s3770_s23 = smov (%p1765_p8, %s1767_s23), 1.0 }
  0x26   :  { %s3772_s24 = smov (%p1793_p9, %s1795_s24), 1.0  ;;  %p1821_p13 = scmp.eq.s32.totalorder %s3452_s1, 0 }
  0x27   :  { %s1823_s26 = scalar_select %p1822_p12, 2.0, 4.0 }
  0x28   :  { %s1789_s27 = scalar_select %p1764_p10, %s3770_s23, 0.0 }
  0x29   :  { %s1817_s28 = scalar_select %p1792_p11, %s3772_s24, 0.0 }
  0x2a   :  { %s3774_s26 = smov (%p1821_p13, %s1823_s26), 1.0  ;;  %p3699_p2 = scmp.ne.s32.totalorder %s3454_s13, 4294967295 }
  0x2b   :  { %p1849_p4 = scmp.eq.s32.totalorder %s3454_s13, 0  ;;  %p1878_p6 = scmp.eq.s32.totalorder %s3459_s14, 1 }
  0x2c   :  { %p1877_p7 = scmp.eq.s32.totalorder %s3459_s14, 0  ;;  %p1876_p8 = scmp.ne.s32.totalorder %s3459_s14, 4294967295 }
  0x2d   :  { %p1906_p9 = scmp.eq.s32.totalorder %s3479_s15, 1  ;;  %p1905_p12 = scmp.eq.s32.totalorder %s3479_s15, 0 }
  0x2e   :  { %p1904_p13 = scmp.ne.s32.totalorder %s3479_s15, 4294967295 }
  0x2f   :  { %s1907_s10 = scalar_select %p1906_p9, 2.0, 4.0 }
  0x30   :  { %p1958_p9 = scmp.eq.s32.totalorder %s3525_s17, 0 }
  0x31   :  { %s3780_s10 = smov (%p1905_p12, %s1907_s10), 1.0 }
  0x6b   :  { %v2231_v7 = vpop.permute.xlu2 %213 }
  0x73   :  { %v2250_v26 = vpop.permute.xlu2 %217 }
  0x81   :  { %v2233_v10 = vpop.permute.xlu1 %74  ;;  %v2235_v11 = vpop.permute.xlu0 %64 }
  0x82   :  { %v132_v12 = vmul.f32 %v92_v8, %v2235_v11  ;;  %v133_v13 = vmul.f32 %v93_v9, %v2235_v11  ;;  %v136_v39 = vmul.f32 %v92_v8, %v2233_v10  ;;  %v137_v40 = vmul.f32 %v93_v9, %v2233_v10 }
  0x83   :  { %v140_v45 = vmul.f32 %v94_v24, %v2235_v11  ;;  %v141_v46 = vmul.f32 %v95_v25, %v2235_v11  ;;  %v148_v47 = vmul.f32 %v2259_v34, %v2235_v11  ;;  %v149_v48 = vmul.f32 %v2263_v38, %v2235_v11 }
  0x84   :  { %v228_v14 = vadd.f32 %v2231_v7, %v132_v12  ;;  %v229_v15 = vadd.f32 %v2231_v7, %v133_v13  ;;  %v51_v12 = vld [vmem:[%s3668_s0 + $0x6] sm:$0x3]  ;;  %v153_v18 = vmul.f32 %v2263_v38, %v2233_v10 }
  0x85   :  { %v236_v61 = vadd.f32 %v2231_v7, %v140_v45  ;;  %v237_v62 = vadd.f32 %v2231_v7, %v141_v46  ;;  %v244_v5 = vadd.f32 %v2231_v7, %v148_v47  ;;  %v245_v6 = vadd.f32 %v2231_v7, %v149_v48  ;;  %v52_v45 = vld [vmem:[%s3668_s0 + $0x8] sm:$0x3] }
  0x86   :  { %v308_v16 = vmax.f32 %v228_v14, 0.0  ;;  %v309_v17 = vmax.f32 %v229_v15, 0.0 }
  0x87   :  { %v324_v15 = vmax.f32 %v244_v5, 0.0 }
  0x88   :  { %v388_v19 = vmax.f32 %v308_v16, %v309_v17  ;;  %v325_v16 = vmax.f32 %v245_v6, 0.0  ;;  %v152_v17 = vmul.f32 %v2259_v34, %v2233_v10 }
  0x89   :  { %v2244_v20 = vpop.permute.xlu1 %79  ;;  %v2246_v21 = vpop.permute.xlu0 %69 }
  0x8a   :  { %389 = vmax.xlane.f32.xlu2 %v388_v19  ;;  %v134_v22 = vmul.f32 %v92_v8, %v2246_v21  ;;  %v135_v23 = vmul.f32 %v93_v9, %v2246_v21  ;;  %v142_v29 = vmul.f32 %v94_v24, %v2246_v21  ;;  %v143_v30 = vmul.f32 %v95_v25, %v2246_v21 }
  0x8b   :  { %v138_v41 = vmul.f32 %v92_v8, %v2244_v20  ;;  %v139_v42 = vmul.f32 %v93_v9, %v2244_v20  ;;  %v146_v55 = vmul.f32 %v94_v24, %v2244_v20  ;;  %v147_v56 = vmul.f32 %v95_v25, %v2244_v20 }
  0x8c   :  { %v230_v27 = vadd.f32 %v2250_v26, %v134_v22  ;;  %v231_v28 = vadd.f32 %v2250_v26, %v135_v23  ;;  %v238_v36 = vadd.f32 %v2250_v26, %v142_v29  ;;  %v239_v37 = vadd.f32 %v2250_v26, %v143_v30 }
  0x8d   :  { %v316_v8 = vmax.f32 %v236_v61, 0.0  ;;  %v317_v9 = vmax.f32 %v237_v62, 0.0  ;;  %v144_v19 = vmul.f32 %v94_v24, %v2233_v10  ;;  %v145_v22 = vmul.f32 %v95_v25, %v2233_v10 }
  0x8e   :  { %v310_v32 = vmax.f32 %v230_v27, 0.0  ;;  %v311_v33 = vmax.f32 %v231_v28, 0.0  ;;  %v318_v53 = vmax.f32 %v238_v36, 0.0  ;;  %v319_v54 = vmax.f32 %v239_v37, 0.0 }
  0x8f   :  { %v2300_v23 = vperm.slane %v51_v12, 0  ;;  %v400_v27 = vmax.f32 %v316_v8, %v317_v9  ;;  %v154_v29 = vmul.f32 %v2259_v34, %v2244_v20  ;;  %v155_v30 = vmul.f32 %v2263_v38, %v2244_v20 }
  0x90   :  { %v391_v35 = vmax.f32 %v310_v32, %v311_v33  ;;  %v403_v4 = vmax.f32 %v318_v53, %v319_v54  ;;  %v2312_v37 = vperm.slane %v51_v12, 1  ;;  %v2337_v62 = vperm.slane %v52_v45, 1 }
  0x92   :  { %v2269_v43 = vpop.permute.xlu1 %225  ;;  %v2271_v44 = vpop.permute.xlu0 %221  ;;  %392 = vmax.xlane.f32.xlu1 %v391_v35  ;;  %v412_v35 = vmax.f32 %v324_v15, %v325_v16 }
  0x93   :  { %v232_v49 = vadd.f32 %v2271_v44, %v136_v39  ;;  %v233_v50 = vadd.f32 %v2271_v44, %v137_v40  ;;  %v234_v51 = vadd.f32 %v2269_v43, %v138_v41  ;;  %v235_v52 = vadd.f32 %v2269_v43, %v139_v42 }
  0x94   :  { %v242_v1 = vadd.f32 %v2269_v43, %v146_v55  ;;  %v243_v3 = vadd.f32 %v2269_v43, %v147_v56  ;;  %v248_v28 = vadd.f32 %v2271_v44, %v152_v17  ;;  %v249_v32 = vadd.f32 %v2271_v44, %v153_v18 }
  0x95   :  { %v312_v57 = vmax.f32 %v232_v49, 0.0  ;;  %v313_v58 = vmax.f32 %v233_v50, 0.0  ;;  %v314_v59 = vmax.f32 %v234_v51, 0.0  ;;  %v315_v60 = vmax.f32 %v235_v52, 0.0 }
  0x96   :  { %v322_v13 = vmax.f32 %v242_v1, 0.0  ;;  %v323_v14 = vmax.f32 %v243_v3, 0.0  ;;  %v240_v33 = vadd.f32 %v2271_v44, %v144_v19  ;;  %v241_v24 = vadd.f32 %v2271_v44, %v145_v22  ;;  %v53_v19 = vld [vmem:[%s3668_s0 + $0xa] sm:$0x3] }
  0x97   :  { %v394_v63 = vmax.f32 %v312_v57, %v313_v58  ;;  %v397_v0 = vmax.f32 %v314_v59, %v315_v60  ;;  %v250_v25 = vadd.f32 %v2269_v43, %v154_v29  ;;  %v251_v36 = vadd.f32 %v2269_v43, %v155_v30 }
  0x98   :  { %v409_v31 = vmax.f32 %v322_v13, %v323_v14  ;;  %v158_v39 = vmul.f32 %v2300_v23, %v2246_v21  ;;  %v159_v40 = vmul.f32 %v2312_v37, %v2246_v21  ;;  %v150_v41 = vmul.f32 %v2259_v34, %v2246_v21 }
  0x99   :  { %395 = vmax.xlane.f32.xlu0 %v394_v63  ;;  %398 = vmax.xlane.f32.xlu2 %v397_v0  ;;  %v151_v42 = vmul.f32 %v2263_v38, %v2246_v21  ;;  %v328_v46 = vmax.f32 %v248_v28, 0.0  ;;  %v329_v47 = vmax.f32 %v249_v32, 0.0  ;;  %v320_v48 = vmax.f32 %v240_v33, 0.0 }
  0x9a   :  { %404 = vmax.xlane.f32.xlu1 %v403_v4  ;;  %v321_v49 = vmax.f32 %v241_v24, 0.0  ;;  %v330_v50 = vmax.f32 %v250_v25, 0.0  ;;  %v331_v51 = vmax.f32 %v251_v36, 0.0  ;;  %v2325_v52 = vperm.slane %v52_v45, 0 }
  0x9b   :  { %v254_v53 = vadd.f32 %v2250_v26, %v158_v39  ;;  %v255_v54 = vadd.f32 %v2250_v26, %v159_v40  ;;  %v160_v34 = vmul.f32 %v2300_v23, %v2233_v10  ;;  %v161_v38 = vmul.f32 %v2312_v37, %v2233_v10 }
  0x9c   :  { %v418_v55 = vmax.f32 %v328_v46, %v329_v47  ;;  %v406_v56 = vmax.f32 %v320_v48, %v321_v49  ;;  %v246_v57 = vadd.f32 %v2250_v26, %v150_v41  ;;  %v247_v58 = vadd.f32 %v2250_v26, %v151_v42 }
  0x9d   :  { %v421_v59 = vmax.f32 %v330_v50, %v331_v51  ;;  %v256_v60 = vadd.f32 %v2271_v44, %v160_v34  ;;  %v257_v61 = vadd.f32 %v2271_v44, %v161_v38  ;;  %v164_v63 = vmul.f32 %v2325_v52, %v2235_v11 }
  0x9e   :  { %v165_v0 = vmul.f32 %v2337_v62, %v2235_v11  ;;  %v156_v1 = vmul.f32 %v2300_v23, %v2235_v11  ;;  %v157_v3 = vmul.f32 %v2312_v37, %v2235_v11  ;;  %v334_v4 = vmax.f32 %v254_v53, 0.0 }
  0x9f   :  { %v335_v5 = vmax.f32 %v255_v54, 0.0  ;;  %v326_v6 = vmax.f32 %v246_v57, 0.0  ;;  %v327_v8 = vmax.f32 %v247_v58, 0.0  ;;  %v336_v9 = vmax.f32 %v256_v60, 0.0 }
  0xa0   :  { %v337_v12 = vmax.f32 %v257_v61, 0.0  ;;  %v166_v13 = vmul.f32 %v2325_v52, %v2246_v21  ;;  %v167_v14 = vmul.f32 %v2337_v62, %v2246_v21  ;;  %v260_v15 = vadd.f32 %v2231_v7, %v164_v63 }
  0xa1   :  { %410 = vmax.xlane.f32.xlu0 %v409_v31  ;;  %401 = vmax.xlane.f32.xlu2 %v400_v27  ;;  %v261_v16 = vadd.f32 %v2231_v7, %v165_v0  ;;  %v252_v17 = vadd.f32 %v2231_v7, %v156_v1  ;;  %v253_v18 = vadd.f32 %v2231_v7, %v157_v3  ;;  %v102_v31 = vperm.slane %v53_v19, 0  ;;  %v54_v1 = vld [vmem:[%s3668_s0 + $0xc] sm:$0x3] }
  0xa2   :  { %413 = vmax.xlane.f32.xlu1 %v412_v35  ;;  %v427_v22 = vmax.f32 %v334_v4, %v335_v5  ;;  %v415_v27 = vmax.f32 %v326_v6, %v327_v8  ;;  %v430_v28 = vmax.f32 %v336_v9, %v337_v12  ;;  %v262_v29 = vadd.f32 %v2250_v26, %v166_v13 }
  0xa3   :  { %v263_v30 = vadd.f32 %v2250_v26, %v167_v14  ;;  %v103_v32 = vperm.slane %v53_v19, 1  ;;  %v340_v33 = vmax.f32 %v260_v15, 0.0  ;;  %v341_v24 = vmax.f32 %v261_v16, 0.0 }
  0xa4   :  { %v332_v35 = vmax.f32 %v252_v17, 0.0  ;;  %v333_v25 = vmax.f32 %v253_v18, 0.0  ;;  %v342_v36 = vmax.f32 %v262_v29, 0.0  ;;  %v172_v40 = vmul.f32 %v102_v31, %v2235_v11 }
  0xa5   :  { %v343_v39 = vmax.f32 %v263_v30, 0.0  ;;  %v173_v41 = vmul.f32 %v103_v32, %v2235_v11  ;;  %v170_v42 = vmul.f32 %v2325_v52, %v2244_v20  ;;  %v171_v45 = vmul.f32 %v2337_v62, %v2244_v20 }
  0xa6   :  { %v162_v46 = vmul.f32 %v2300_v23, %v2244_v20  ;;  %v163_v47 = vmul.f32 %v2312_v37, %v2244_v20  ;;  %v436_v48 = vmax.f32 %v340_v33, %v341_v24  ;;  %v424_v49 = vmax.f32 %v332_v35, %v333_v25  ;;  %v55_v35 = vld [vmem:[%s3668_s0 + $0xe] sm:$0x3] }
  0xa7   :  { %v266_v50 = vadd.f32 %v2269_v43, %v170_v42  ;;  %v267_v51 = vadd.f32 %v2269_v43, %v171_v45  ;;  %v439_v34 = vmax.f32 %v342_v36, %v343_v39  ;;  %v268_v38 = vadd.f32 %v2231_v7, %v172_v40 }
  0xa8   :  { %v258_v53 = vadd.f32 %v2269_v43, %v162_v46  ;;  %v259_v54 = vadd.f32 %v2269_v43, %v163_v47  ;;  %v176_v60 = vmul.f32 %v102_v31, %v2233_v10  ;;  %v177_v61 = vmul.f32 %v103_v32, %v2233_v10 }
  0xa9   :  { %419 = vmax.xlane.f32.xlu0 %v418_v55  ;;  %407 = vmax.xlane.f32.xlu2 %v406_v56  ;;  %v269_v55 = vadd.f32 %v2231_v7, %v173_v41  ;;  %v346_v23 = vmax.f32 %v266_v50, 0.0  ;;  %v347_v37 = vmax.f32 %v267_v51, 0.0  ;;  %v348_v58 = vmax.f32 %v268_v38, 0.0 }
  0xaa   :  { %422 = vmax.xlane.f32.xlu1 %v421_v59  ;;  %v338_v56 = vmax.f32 %v258_v53, 0.0  ;;  %v339_v57 = vmax.f32 %v259_v54, 0.0  ;;  %v168_v63 = vmul.f32 %v2325_v52, %v2233_v10  ;;  %v169_v0 = vmul.f32 %v2337_v62, %v2233_v10 }
  0xab   :  { %v349_v59 = vmax.f32 %v269_v55, 0.0  ;;  %v272_v3 = vadd.f32 %v2271_v44, %v176_v60  ;;  %v273_v4 = vadd.f32 %v2271_v44, %v177_v61  ;;  %v178_v5 = vmul.f32 %v102_v31, %v2244_v20 }
  0xac   :  { %v179_v6 = vmul.f32 %v103_v32, %v2244_v20  ;;  %v445_v8 = vmax.f32 %v346_v23, %v347_v37  ;;  %v433_v9 = vmax.f32 %v338_v56, %v339_v57  ;;  %v264_v12 = vadd.f32 %v2271_v44, %v168_v63 }
  0xad   :  { %v265_v52 = vadd.f32 %v2271_v44, %v169_v0  ;;  %v448_v13 = vmax.f32 %v348_v58, %v349_v59  ;;  %v274_v62 = vadd.f32 %v2269_v43, %v178_v5  ;;  %v2393_v15 = vperm.slane %v54_v1, 0 }
  0xae   :  { %v275_v14 = vadd.f32 %v2269_v43, %v179_v6  ;;  %v2395_v16 = vperm.slane %v54_v1, 1  ;;  %v352_v17 = vmax.f32 %v272_v3, 0.0  ;;  %v353_v18 = vmax.f32 %v273_v4, 0.0  ;;  %v56_v3 = vld [vmem:[%s3668_s0 + $0x10] sm:$0x3] }
  0xaf   :  { %v182_v19 = vmul.f32 %v2393_v15, %v2246_v21  ;;  %v175_v30 = vmul.f32 %v103_v32, %v2246_v21  ;;  %v354_v33 = vmax.f32 %v274_v62, 0.0  ;;  %v180_v54 = vmul.f32 %v2393_v15, %v2235_v11 }
  0xb0   :  { %v183_v29 = vmul.f32 %v2395_v16, %v2246_v21  ;;  %v355_v24 = vmax.f32 %v275_v14, 0.0  ;;  %v185_v39 = vmul.f32 %v2395_v16, %v2233_v10  ;;  %v454_v40 = vmax.f32 %v352_v17, %v353_v18 }
  0xb1   :  { %428 = vmax.xlane.f32.xlu0 %v427_v22  ;;  %416 = vmax.xlane.f32.xlu2 %v415_v27  ;;  %v174_v22 = vmul.f32 %v102_v31, %v2246_v21  ;;  %v344_v27 = vmax.f32 %v264_v12, 0.0  ;;  %v278_v25 = vadd.f32 %v2250_v26, %v182_v19  ;;  %v184_v31 = vmul.f32 %v2393_v15, %v2233_v10 }
  0xb2   :  { %431 = vmax.xlane.f32.xlu1 %v430_v28  ;;  %v345_v28 = vmax.f32 %v265_v52, 0.0  ;;  %v279_v32 = vadd.f32 %v2250_v26, %v183_v29  ;;  %v271_v42 = vadd.f32 %v2250_v26, %v175_v30  ;;  %v457_v45 = vmax.f32 %v354_v33, %v355_v24 }
  0xb3   :  { %v270_v36 = vadd.f32 %v2250_v26, %v174_v22  ;;  %v280_v46 = vadd.f32 %v2271_v44, %v184_v31  ;;  %v281_v47 = vadd.f32 %v2271_v44, %v185_v39  ;;  %v358_v50 = vmax.f32 %v278_v25, 0.0 }
  0xb4   :  { %v442_v41 = vmax.f32 %v344_v27, %v345_v28  ;;  %v351_v38 = vmax.f32 %v271_v42, 0.0  ;;  %v181_v23 = vmul.f32 %v2395_v16, %v2235_v11  ;;  %v276_v60 = vadd.f32 %v2231_v7, %v180_v54 }
  0xb5   :  { %v350_v51 = vmax.f32 %v270_v36, 0.0  ;;  %v360_v37 = vmax.f32 %v280_v46, 0.0  ;;  %v361_v56 = vmax.f32 %v281_v47, 0.0  ;;  %v108_v12 = vperm.slane %v56_v3, 0 }
  0xb6   :  { %v277_v1 = vadd.f32 %v2231_v7, %v181_v23  ;;  %v109_v52 = vperm.slane %v56_v3, 1  ;;  %v186_v28 = vmul.f32 %v2393_v15, %v2244_v20  ;;  %v187_v29 = vmul.f32 %v2395_v16, %v2244_v20 }
  0xb7   :  { %v451_v63 = vmax.f32 %v350_v51, %v351_v38  ;;  %v466_v4 = vmax.f32 %v360_v37, %v361_v56  ;;  %v196_v22 = vmul.f32 %v108_v12, %v2235_v11  ;;  %v200_v42 = vmul.f32 %v108_v12, %v2233_v10 }
  0xb8   :  { %v357_v62 = vmax.f32 %v277_v1, 0.0  ;;  %v197_v27 = vmul.f32 %v109_v52, %v2235_v11  ;;  %v282_v25 = vadd.f32 %v2269_v43, %v186_v28  ;;  %v283_v36 = vadd.f32 %v2269_v43, %v187_v29 }
  0xb9   :  { %437 = vmax.xlane.f32.xlu0 %v436_v48  ;;  %425 = vmax.xlane.f32.xlu2 %v424_v49  ;;  %v2416_v48 = vperm.slane %v55_v35, 0  ;;  %v2418_v49 = vperm.slane %v55_v35, 1  ;;  %v292_v39 = vadd.f32 %v2231_v7, %v196_v22  ;;  %v296_v51 = vadd.f32 %v2271_v44, %v200_v42 }
  0xba   :  { %440 = vmax.xlane.f32.xlu1 %v439_v34  ;;  %v359_v34 = vmax.f32 %v279_v32, 0.0  ;;  %v363_v32 = vmax.f32 %v283_v36, 0.0  ;;  %v203_v23 = vmul.f32 %v109_v52, %v2244_v20 }
  0xbb   :  { %v188_v53 = vmul.f32 %v2416_v48, %v2235_v11  ;;  %v189_v55 = vmul.f32 %v2418_v49, %v2235_v11  ;;  %v190_v57 = vmul.f32 %v2416_v48, %v2246_v21  ;;  %v191_v58 = vmul.f32 %v2418_v49, %v2246_v21 }
  0xbc   :  { %v463_v61 = vmax.f32 %v358_v50, %v359_v34  ;;  %v194_v14 = vmul.f32 %v2416_v48, %v2244_v20  ;;  %v195_v17 = vmul.f32 %v2418_v49, %v2244_v20  ;;  %v372_v46 = vmax.f32 %v292_v39, 0.0  ;;  %v57_v34 = vld [vmem:[%s3668_s0 + $0x12] sm:$0x3] }
  0xbd   :  { %v284_v59 = vadd.f32 %v2231_v7, %v188_v53  ;;  %v285_v0 = vadd.f32 %v2231_v7, %v189_v55  ;;  %v286_v5 = vadd.f32 %v2250_v26, %v190_v57  ;;  %v287_v6 = vadd.f32 %v2250_v26, %v191_v58 }
  0xbe   :  { %v290_v30 = vadd.f32 %v2269_v43, %v194_v14  ;;  %v291_v33 = vadd.f32 %v2269_v43, %v195_v17  ;;  %v192_v50 = vmul.f32 %v2416_v48, %v2233_v10  ;;  %v193_v54 = vmul.f32 %v2418_v49, %v2233_v10 }
  0xbf   :  { %v366_v18 = vmax.f32 %v286_v5, 0.0  ;;  %v367_v19 = vmax.f32 %v287_v6, 0.0  ;;  %v202_v55 = vmul.f32 %v108_v12, %v2244_v20  ;;  %v110_v49 = vperm.slane %v57_v34, 0 }
  0xc0   :  { %v370_v15 = vmax.f32 %v290_v30, 0.0  ;;  %v371_v16 = vmax.f32 %v291_v33, 0.0  ;;  %v288_v38 = vadd.f32 %v2271_v44, %v192_v50  ;;  %v289_v48 = vadd.f32 %v2271_v44, %v193_v54 }
  0xc1   :  { %446 = vmax.xlane.f32.xlu0 %v445_v8  ;;  %434 = vmax.xlane.f32.xlu2 %v433_v9  ;;  %v364_v8 = vmax.f32 %v284_v59, 0.0  ;;  %v356_v9 = vmax.f32 %v276_v60, 0.0  ;;  %v475_v31 = vmax.f32 %v366_v18, %v367_v19  ;;  %v298_v58 = vadd.f32 %v2269_v43, %v202_v55 }
  0xc2   :  { %449 = vmax.xlane.f32.xlu1 %v448_v13  ;;  %v365_v13 = vmax.f32 %v285_v0, 0.0  ;;  %v481_v37 = vmax.f32 %v370_v15, %v371_v16  ;;  %v299_v59 = vadd.f32 %v2269_v43, %v203_v23  ;;  %v376_v60 = vmax.f32 %v296_v51, 0.0 }
  0xc3   :  { %v460_v35 = vmax.f32 %v356_v9, %v357_v62  ;;  %v368_v0 = vmax.f32 %v288_v38, 0.0  ;;  %v206_v1 = vmul.f32 %v110_v49, %v2246_v21  ;;  %v369_v3 = vmax.f32 %v289_v48, 0.0 }
  0xc4   :  { %v472_v24 = vmax.f32 %v364_v8, %v365_v13  ;;  %v198_v5 = vmul.f32 %v108_v12, %v2246_v21  ;;  %v199_v6 = vmul.f32 %v109_v52, %v2246_v21  ;;  %v378_v8 = vmax.f32 %v298_v58, 0.0 }
  0xc5   :  { %v379_v9 = vmax.f32 %v299_v59, 0.0  ;;  %v302_v62 = vadd.f32 %v2250_v26, %v206_v1  ;;  %v208_v14 = vmul.f32 %v110_v49, %v2233_v10  ;;  %v549_v18 = vlaneseq }
  0xc6   :  { %v478_v19 = vmax.f32 %v368_v0, %v369_v3  ;;  %v295_v28 = vadd.f32 %v2250_v26, %v199_v6  ;;  %v204_v30 = vmul.f32 %v110_v49, %v2235_v11 }
  0xc7   :  { %v493_v12 = vmax.f32 %v378_v8, %v379_v9  ;;  %v2487_v29 = vshrl.u32 %v549_v18, 7 }
  0xc8   :  { %v300_v39 = vadd.f32 %v2231_v7, %v204_v30 }
  0xc9   :  { %455 = vmax.xlane.f32.xlu0 %v454_v40  ;;  %443 = vmax.xlane.f32.xlu2 %v442_v41  ;;  %v293_v40 = vadd.f32 %v2231_v7, %v197_v27  ;;  %v362_v41 = vmax.f32 %v282_v25, 0.0  ;;  %v294_v27 = vadd.f32 %v2250_v26, %v198_v5  ;;  %v2526_v48 = vadd.s32 24, %v2487_v29 }
  0xca   :  { %458 = vmax.xlane.f32.xlu1 %v457_v45  ;;  %v201_v45 = vmul.f32 %v109_v52, %v2233_v10  ;;  %v380_v16 = vmax.f32 %v300_v39, 0.0 }
  0xcb   :  { %v373_v47 = vmax.f32 %v293_v40, 0.0  ;;  %v469_v56 = vmax.f32 %v362_v41, %v363_v32  ;;  %2072 = vset.pattern.permute.xlu1 %v2487_v29  ;;  %v210_v32 = vmul.f32 %v110_v49, %v2244_v20  ;;  %3702 = vst [vmem:[#allocation11_spill] sm:$0xff] %v2526_v48  ;;  %2081 = vset.pattern.permute.xlu0 %v2526_v48  ;;  %v2536_v49 = vadd.s32 16, %v2487_v29 }
  0xcc   :  { %v297_v53 = vadd.f32 %v2271_v44, %v201_v45 }
  0xcd   :  { %v484_v57 = vmax.f32 %v372_v46, %v373_v47  ;;  %v306_v45 = vadd.f32 %v2269_v43, %v210_v32  ;;  %v2499_v47 = vadd.s32 8, %v2487_v29 }
  0xcf   :  { %2077 = vset.pattern.permute.xlu2 %v2499_v47 }
  0xd1   :  { %464 = vmax.xlane.f32.xlu0 %v463_v61  ;;  %452 = vmax.xlane.f32.xlu2 %v451_v63  ;;  %v377_v61 = vmax.f32 %v297_v53, 0.0  ;;  %v111_v63 = vperm.slane %v57_v34, 1 }
  0xd2   :  { %467 = vmax.xlane.f32.xlu1 %v466_v4 }
  0xd3   :  { %v207_v4 = vmul.f32 %v111_v63, %v2246_v21  ;;  %v490_v13 = vmax.f32 %v376_v60, %v377_v61  ;;  %v209_v17 = vmul.f32 %v111_v63, %v2233_v10  ;;  %v304_v21 = vadd.f32 %v2271_v44, %v208_v14 }
  0xd4   :  { %v382_v10 = vmax.f32 %v302_v62, 0.0  ;;  %v205_v25 = vmul.f32 %v111_v63, %v2235_v11  ;;  %v211_v11 = vmul.f32 %v111_v63, %v2244_v20  ;;  %v2507_v20 = vld [vmem:[%s3670_s2] sm:$0x7]  ;;  %v2570_v14 = vand.u32 127, %v549_v18  ;;  %s1551_s2 = sld [smem:[#allocation2]] }
  0xd5   :  { %v303_v22 = vadd.f32 %v2250_v26, %v207_v4  ;;  %v305_v52 = vadd.f32 %v2271_v44, %v209_v17  ;;  %v384_v26 = vmax.f32 %v304_v21, 0.0  ;;  %v2552_v4 = vperm.slane %v2507_v20, 1 }
  0xd6   :  { %v301_v40 = vadd.f32 %v2231_v7, %v205_v25  ;;  %v307_v46 = vadd.f32 %v2269_v43, %v211_v11  ;;  %v386_v7 = vmax.f32 %v306_v45, 0.0  ;;  %v1095_v43 = vperm.slane %v2507_v20, 0 }
  0xd7   :  { %v383_v33 = vmax.f32 %v303_v22, 0.0  ;;  %v385_v36 = vmax.f32 %v305_v52, 0.0  ;;  %v2579_v22 = vadd.s32 4294967280, %v2570_v14 }
  0xd8   :  { %v381_v41 = vmax.f32 %v301_v40, 0.0  ;;  %v387_v50 = vmax.f32 %v307_v46, 0.0 }
  0xd9   :  { %473 = vmax.xlane.f32.xlu0 %v472_v24  ;;  %461 = vmax.xlane.f32.xlu2 %v460_v35  ;;  %v374_v24 = vmax.f32 %v294_v27, 0.0  ;;  %v375_v35 = vmax.f32 %v295_v28, 0.0  ;;  %v502_v15 = vmax.f32 %v384_v26, %v385_v36 }
  0xda   :  { %476 = vmax.xlane.f32.xlu1 %v475_v31  ;;  %v499_v31 = vmax.f32 %v382_v10, %v383_v33  ;;  %v496_v42 = vmax.f32 %v380_v16, %v381_v41  ;;  %v505_v51 = vmax.f32 %v386_v7, %v387_v50 }
  0xdb   :  { %v487_v44 = vmax.f32 %v374_v24, %v375_v35 }
  0xe1   :  { %482 = vmax.xlane.f32.xlu0 %v481_v37  ;;  %470 = vmax.xlane.f32.xlu2 %v469_v56 }
  0xe2   :  { %485 = vmax.xlane.f32.xlu1 %v484_v57 }
  0xe9   :  { %491 = vmax.xlane.f32.xlu0 %v490_v13  ;;  %479 = vmax.xlane.f32.xlu2 %v478_v19  ;;  %v2576_v19 = vadd.s32 4294967288, %v2570_v14 }
  0xea   :  { %494 = vmax.xlane.f32.xlu1 %v493_v12  ;;  %v2586_v12 = vadd.s32 4294967272, %v2570_v14 }
  0xf1   :  { %500 = vmax.xlane.f32.xlu0 %v499_v31  ;;  %488 = vmax.xlane.f32.xlu2 %v487_v44 }
  0xf2   :  { %503 = vmax.xlane.f32.xlu1 %v502_v15 }
  0xf9   :  { %497 = vmax.xlane.f32.xlu2 %v496_v42 }
  0xfd   :  { %v2502_v53 = vpop.xlane.xlu2 %389 }
  0xfe   :  { %v551_v52 = vperm.slane %v2502_v53, %v2570_v14 }
 0x101   :  { %506 = vmax.xlane.f32.xlu2 %v505_v51 }
 0x105   :  { %v2509_v54 = vpop.xlane.xlu1 %392 }
 0x106   :  { %v553_v28 = vperm.slane %v2509_v54, %v2576_v19 }
 0x108   :  { %v555_v30 = vsel %vm554_vm0, %v553_v28, %v551_v52 }
 0x10b   :  { %1101 = vperm.xlu1 %2072, %v1095_v43  }
 0x10c   :  { %v2512_v34 = vpop.xlane.xlu0 %395  ;;  %v2514_v38 = vpop.xlane.xlu2 %398 }
 0x10d   :  { %v2516_v55 = vpop.xlane.xlu1 %404  ;;  %v557_v21 = vperm.slane %v2512_v34, %v2579_v22  ;;  %v561_v33 = vperm.slane %v2514_v38, %v2586_v12 }
 0x10e   :  { %v565_v26 = vperm.slane %v2516_v55, %v2576_v19 }
 0x10f   :  { %v559_v24 = vsel %vm558_vm1, %v557_v21, %v555_v30 }
 0x110   :  { %v563_v39 = vsel %vm562_vm2, %v561_v33, %v559_v24 }
 0x113   :  { %2073 = vset.pattern.permute.xlu1 %v2499_v47 }
 0x114   :  { %v2519_v23 = vpop.xlane.xlu0 %410  ;;  %v2521_v37 = vpop.xlane.xlu2 %401 }
 0x115   :  { %v2523_v56 = vpop.xlane.xlu1 %413  ;;  %v564_v35 = vperm.slane %v2521_v37, %v2570_v14  ;;  %v569_v15 = vperm.slane %v2519_v23, %v2586_v12 }
 0x116   :  { %v571_v36 = vperm.slane %v2523_v56, %v2570_v14 }
 0x117   :  { %v566_v16 = vsel %vm554_vm0, %v565_v26, %v564_v35 }
 0x119   :  { %1177 = vperm.xlu2 %2077, %v2552_v4  }
 0x11b   :  { %1107 = vperm.xlu1 %2073, %v1095_v43  }
 0x11c   :  { %v2529_v57 = vpop.xlane.xlu0 %419  ;;  %v2531_v58 = vpop.xlane.xlu2 %407 }
 0x11d   :  { %v2533_v59 = vpop.xlane.xlu1 %422  ;;  %v567_v31 = vperm.slane %v2531_v58, %v2579_v22  ;;  %v574_v11 = vperm.slane %v2529_v57, %v2579_v22 }
 0x11e   :  { %v576_v24 = vperm.slane %v2533_v59, %v2586_v12 }
 0x11f   :  { %v568_v50 = vsel %vm558_vm1, %v567_v31, %v566_v16 }
 0x120   :  { %v570_v26 = vsel %vm562_vm2, %v569_v15, %v568_v50 }
 0x121   :  { %2079 = vset.pattern.permute.xlu2 %v3676_v2 }
 0x123   :  { %2074 = vset.pattern.permute.xlu1 %v2536_v49 }
 0x124   :  { %v2539_v60 = vpop.xlane.xlu0 %428  ;;  %v2541_v61 = vpop.xlane.xlu2 %416 }
 0x125   :  { %v2543_v63 = vpop.xlane.xlu1 %431  ;;  %v572_v25 = vperm.slane %v2541_v61, %v2576_v19  ;;  %v579_v42 = vperm.slane %v2539_v60, %v2576_v19 }
 0x126   :  { %v581_v35 = vperm.slane %v2543_v63, %v2579_v22 }
 0x127   :  { %v573_v41 = vsel %vm554_vm0, %v572_v25, %v571_v36 }
 0x128   :  { %v575_v21 = vsel %vm558_vm1, %v574_v11, %v573_v41 }
 0x129   :  { %v577_v16 = vsel %vm562_vm2, %v576_v24, %v575_v21 }
 0x12b   :  { %1113 = vperm.xlu1 %2074, %v1095_v43  }
 0x12c   :  { %v2545_v0 = vpop.xlane.xlu0 %437  ;;  %v2547_v1 = vpop.xlane.xlu2 %425 }
 0x12d   :  { %v2549_v3 = vpop.xlane.xlu1 %440  ;;  %v578_v40 = vperm.slane %v2547_v1, %v2570_v14  ;;  %v585_v45 = vperm.slane %v2545_v0, %v2570_v14 }
 0x12e   :  { %v586_v46 = vperm.slane %v2549_v3, %v2576_v19 }
 0x12f   :  { %v580_v52 = vsel %vm554_vm0, %v579_v42, %v578_v40 }
 0x130   :  { %v587_v36 = vsel %vm554_vm0, %v586_v46, %v585_v45  ;;  %v582_v11 = vsel %vm558_vm1, %v581_v35, %v580_v52 }
 0x133   :  { %2075 = vset.pattern.permute.xlu1 %v2526_v48 }
 0x134   :  { %v2556_v5 = vpop.xlane.xlu0 %446  ;;  %v2558_v6 = vpop.xlane.xlu2 %434 }
 0x135   :  { %v2560_v8 = vpop.xlane.xlu1 %449  ;;  %v583_v30 = vperm.slane %v2558_v6, %v2586_v12  ;;  %v590_v41 = vperm.slane %v2556_v5, %v2586_v12 }
 0x136   :  { %v592_v51 = vperm.slane %v2560_v8, %v2570_v14 }
 0x13b   :  { %1119 = vperm.xlu1 %2075, %v1095_v43  }
 0x13c   :  { %v2563_v9 = vpop.xlane.xlu0 %455  ;;  %v2565_v13 = vpop.xlane.xlu2 %443 }
 0x13d   :  { %v2567_v62 = vpop.xlane.xlu1 %458  ;;  %v588_v43 = vperm.slane %v2565_v13, %v2579_v22  ;;  %v595_v31 = vperm.slane %v2563_v9, %v2579_v22 }
 0x13e   :  { %v597_v50 = vperm.slane %v2567_v62, %v2586_v12 }
 0x13f   :  { %v589_v42 = vsel %vm558_vm1, %v588_v43, %v587_v36 }
 0x143   :  { %2076 = vset.pattern.permute.xlu1 %v2487_v29 }
 0x144   :  { %v2573_v17 = vpop.xlane.xlu2 %452  ;;  %v2581_v27 = vpop.xlane.xlu0 %464 }
 0x145   :  { %v2588_v18 = vpop.xlane.xlu1 %467  ;;  %v593_v32 = vperm.slane %v2573_v17, %v2576_v19  ;;  %v600_v40 = vperm.slane %v2581_v27, %v2576_v19 }
 0x147   :  { %v594_v25 = vsel %vm554_vm0, %v593_v32, %v592_v51  ;;  %v584_v32 = vsel %vm562_vm2, %v583_v30, %v582_v11  ;;  %v602_v51 = vperm.slane %v2588_v18, %v2579_v22  ;;  %v628_v30 = vsel %vm627_vm3, %v570_v26, %v563_v39 }
 0x148   :  { %v596_v15 = vsel %vm558_vm1, %v595_v31, %v594_v25  ;;  %v630_v24 = vsel %vm629_vm4, %v577_v16, %v628_v30 }
 0x149   :  { %v598_v25 = vsel %vm562_vm2, %v597_v50, %v596_v15  ;;  %v632_v31 = vsel %vm631_vm5, %v584_v32, %v630_v24 }
 0x14b   :  { %1171 = vperm.xlu1 %2076, %v2552_v4  }
 0x14c   :  { %v2595_v10 = vpop.xlane.xlu2 %461  ;;  %v2611_v44 = vpop.xlane.xlu0 %473 }
 0x14d   :  { %v2630_v7 = vpop.xlane.xlu1 %476  ;;  %v599_v33 = vperm.slane %v2595_v10, %v2570_v14  ;;  %v606_v21 = vperm.slane %v2611_v44, %v2570_v14 }
 0x14e   :  { %v607_v43 = vperm.slane %v2630_v7, %v2576_v19 }
 0x14f   :  { %v601_v45 = vsel %vm554_vm0, %v600_v40, %v599_v33  ;;  %v591_v33 = vsel %vm562_vm2, %v590_v41, %v589_v42 }
 0x150   :  { %v603_v36 = vsel %vm558_vm1, %v602_v51, %v601_v45  ;;  %v608_v26 = vsel %vm554_vm0, %v607_v43, %v606_v21  ;;  %v634_v41 = vsel %vm633_vm6, %v591_v33, %v632_v31 }
 0x151   :  { %v636_v32 = vsel %vm635_vm7, %v598_v25, %v634_v41 }
 0x153   :  { %2078 = vset.pattern.permute.xlu1 %v3676_v2 }
 0x154   :  { %v2638_v28 = vpop.xlane.xlu2 %470  ;;  %v2675_v52 = vpop.xlane.xlu0 %482 }
 0x155   :  { %v604_v46 = vperm.slane %v2638_v28, %v2586_v12  ;;  %v2685_v40 = vpop.xlane.xlu1 %485  ;;  %v611_v16 = vperm.slane %v2675_v52, %v2586_v12 }
 0x156   :  { %v613_v25 = vperm.slane %v2685_v40, %v2570_v14 }
 0x157   :  { %v605_v39 = vsel %vm562_vm2, %v604_v46, %v603_v36 }
 0x158   :  { %v638_v45 = vsel %vm637_vm8, %v605_v39, %v636_v32 }
 0x15c   :  { %v2680_v35 = vpop.xlane.xlu2 %479  ;;  %v2700_v51 = vpop.xlane.xlu0 %491 }
 0x15d   :  { %v609_v11 = vperm.slane %v2680_v35, %v2579_v22  ;;  %v2702_v43 = vpop.xlane.xlu1 %494 }
 0x15f   :  { %v610_v42 = vsel %vm558_vm1, %v609_v11, %v608_v26  ;;  %v616_v26 = vperm.slane %v2700_v51, %v2579_v22 }
 0x160   :  { %v612_v15 = vsel %vm562_vm2, %v611_v16, %v610_v42 }
 0x161   :  { %v640_v46 = vsel %vm639_vm9, %v612_v15, %v638_v45  ;;  %v618_v15 = vperm.slane %v2702_v43, %v2586_v12 }
 0x162   :  { %v645_v50 = vsel %vm644_vm10, %v640_v46, 0.0 }
 0x163   :  { %646 = vadd.xlane.f32.xlu0 %v645_v50 }
 0x164   :  { %v489_v21 = vpop.xlane.xlu2 %488  ;;  %v2705_v24 = vpop.xlane.xlu0 %500 }
 0x165   :  { %v614_v33 = vperm.slane %v489_v21, %v2576_v19  ;;  %v621_v31 = vperm.slane %v2705_v24, %v2576_v19  ;;  %v504_v39 = vpop.xlane.xlu1 %503 }
 0x166   :  { %v623_v41 = vperm.slane %v504_v39, %v2579_v22 }
 0x167   :  { %v615_v11 = vsel %vm554_vm0, %v614_v33, %v613_v25 }
 0x168   :  { %v617_v32 = vsel %vm558_vm1, %v616_v26, %v615_v11 }
 0x169   :  { %v619_v50 = vsel %vm562_vm2, %v618_v15, %v617_v32 }
 0x16c   :  { %v498_v30 = vpop.xlane.xlu2 %497 }
 0x16d   :  { %v620_v36 = vperm.slane %v498_v30, %v2570_v14 }
 0x16f   :  { %v622_v16 = vsel %vm554_vm0, %v621_v31, %v620_v36  ;;  %v2171_v31 = vmov 32.0  }
 0x170   :  { %v624_v46 = vsel %vm558_vm1, %v623_v41, %v622_v16  ;;  %2089 = vrcp.f32 %v2171_v31 }
 0x174   :  { %v2717_v42 = vpop.xlane.xlu2 %506 }
 0x175   :  { %v625_v45 = vperm.slane %v2717_v42, %v2586_v12 }
 0x176   :  { %v2090_v11 = vpop.eup %2089 }
 0x177   :  { %v626_v33 = vsel %vm562_vm2, %v625_v45, %v624_v46  ;;  %1189 = vperm.xlu0 %2081, %v2552_v4   ;;  %v653_v26 = vmul.f32 32.0, %v2090_v11  ;;  %vm657_vm12 = vweird.f32 %v2090_v11 }
 0x178   :  { %v641_v25 = vsel %vm627_vm3, %v626_v33, %v619_v50 }
 0x179   :  { %v649_v36 = vsel %vm648_vm11, %v641_v25, 0.0  ;;  %v654_v16 = vsub.f32 1.0, %v653_v26 }
 0x17a   :  { %650 = vadd.xlane.f32.xlu1 %v649_v36 }
 0x17b   :  { %v655_v41 = vmul.f32 %v2090_v11, %v654_v16 }
 0x17d   :  { %v2731_v48 = vpop.permute.xlu1 %1101  ;;  %v656_v15 = vadd.f32 %v2090_v11, %v655_v41 }
 0x17f   :  { %2082 = vset.pattern.permute.xlu0 %v3676_v2  ;;  %v2735_v45 = vsel %vm657_vm12, %v2090_v11, %v656_v15 }
 0x18d   :  { %v2733_v32 = vpop.permute.xlu1 %1107 }
 0x19d   :  { %v2737_v46 = vpop.permute.xlu1 %1113 }
 0x1ad   :  { %v2746_v31 = vpop.permute.xlu1 %1119 }
 0x1ae   :  { %3703 = vst [vmem:[#allocation12_spill] sm:$0xff] %v2746_v31 }
 0x1bd   :  { %v2757_v41 = vpop.permute.xlu1 %1171 }
 0x1be   :  { %3705 = vst [vmem:[#allocation14_spill] sm:$0xff] %v2757_v41 }
 0x1d6   :  { %v647_v50 = vpop.xlane.xlu0 %646 }
 0x1d7   :  { %v2740_v33 = vmul.f32 %v2735_v45, %v647_v50 }
 0x1d9   :  { %v663_v25 = vperm.slane %v2740_v33, 0  ;;  %v2751_v16 = vperm.slane %v2740_v33, 2 }
 0x1db   :  { %v2744_v36 = vsub.f32 %v2509_v54, %v663_v25  ;;  %v2755_v11 = vsub.f32 %v2523_v56, %v2751_v16  ;;  %v2763_v54 = vsub.f32 %v2533_v59, %v2751_v16 }
 0x1dd   :  { %v724_v26 = vmul.f32 %v2744_v36, %v2744_v36  ;;  %3704 = vst [vmem:[#allocation13_spill] sm:$0xff] %v2755_v11  ;;  %v731_v15 = vmul.f32 %v2755_v11, %v2755_v11  ;;  %v734_v2 = vmul.f32 %v2763_v54, %v2763_v54 }
 0x1de   :  { %3706 = vst [vmem:[#allocation15_spill] sm:$0xff] %v2763_v54 }
 0x1df   :  { %807 = vperm.xlu0 %2082, %v724_v26   ;;  %v2768_v26 = vperm.slane %v2740_v33, 3 }
 0x1e7   :  { %828 = vperm.xlu0 %2082, %v731_v15   ;;  %v2777_v15 = vsub.f32 %v2543_v63, %v2768_v26 }
 0x1ed   :  { %v651_v50 = vpop.xlane.xlu1 %650 }
 0x1ee   :  { %v660_v56 = vmul.f32 %v2735_v45, %v651_v50  ;;  %v737_v50 = vmul.f32 %v2777_v15, %v2777_v15 }
 0x1ef   :  { %837 = vperm.xlu0 %2082, %v734_v2  }
 0x1f0   :  { %v2771_v31 = vperm.slane %v660_v56, 0  ;;  %v2773_v41 = vperm.slane %v660_v56, 1  ;;  %v2792_v56 = vperm.slane %v2740_v33, 4 }
 0x1f2   :  { %v2780_v59 = vsub.f32 %v498_v30, %v2773_v41  ;;  %v2783_v11 = vsub.f32 %v489_v21, %v2771_v31  ;;  %v2795_v63 = vsub.f32 %v504_v39, %v2773_v41  ;;  %v2799_v21 = vsub.f32 %v2700_v51, %v2771_v31 }
 0x1f3   :  { %v2803_v30 = vsub.f32 %v2549_v3, %v2792_v56  ;;  %v2812_v39 = vperm.slane %v2740_v33, 5  ;;  %v2815_v51 = vsub.f32 %v2502_v53, %v663_v25  ;;  %v2819_v3 = vsub.f32 %v2717_v42, %v2773_v41 }
 0x1f4   :  { %3707 = vst [vmem:[#allocation16_spill] sm:$0xff] %v2780_v59  ;;  %v759_v54 = vmul.f32 %v2780_v59, %v2780_v59  ;;  %v756_v2 = vmul.f32 %v2783_v11, %v2783_v11  ;;  %v761_v59 = vmul.f32 %v2795_v63, %v2795_v63  ;;  %v2832_v53 = vperm.slane %v2740_v33, 6 }
 0x1f5   :  { %3708 = vst [vmem:[#allocation17_spill] sm:$0xff] %v2783_v11  ;;  %v757_v11 = vmul.f32 %v2799_v21, %v2799_v21  ;;  %v2835_v42 = vsub.f32 %v2514_v38, %v663_v25 }
 0x1f6   :  { %912 = vperm.xlu2 %2079, %v759_v54   ;;  %903 = vperm.xlu1 %2078, %v756_v2   ;;  %3709 = vst [vmem:[#allocation18_spill] sm:$0xff] %v2795_v63  ;;  %v740_v54 = vmul.f32 %v2803_v30, %v2803_v30  ;;  %v2823_v2 = vsub.f32 %v2560_v8, %v2812_v39 }
 0x1f7   :  { %846 = vperm.xlu0 %2082, %v737_v50   ;;  %3710 = vst [vmem:[#allocation19_spill] sm:$0xff] %v2799_v21  ;;  %v723_v50 = vmul.f32 %v2815_v51, %v2815_v51  ;;  %v762_v63 = vmul.f32 %v2819_v3, %v2819_v3  ;;  %v2838_v8 = vsub.f32 %v2512_v34, %v663_v25 }
 0x1f8   :  { %3711 = vst [vmem:[#allocation20_spill] sm:$0xff] %v2819_v3 }
 0x1f9   :  { %3712 = vst [vmem:[#allocation21_spill] sm:$0xff] %v2823_v2  ;;  %v725_v3 = vmul.f32 %v2838_v8, %v2838_v8 }
 0x1fe   :  { %918 = vperm.xlu2 %2079, %v761_v59   ;;  %906 = vperm.xlu1 %2078, %v757_v11   ;;  %v743_v11 = vmul.f32 %v2823_v2, %v2823_v2  ;;  %v2842_v59 = vsub.f32 %v2595_v10, %v2832_v53  ;;  %v2859_v10 = vsub.f32 %v2588_v18, %v2832_v53 }
 0x1ff   :  { %855 = vperm.xlu0 %2082, %v740_v54   ;;  %v726_v54 = vmul.f32 %v2835_v42, %v2835_v42  ;;  %v2875_v18 = vsub.f32 %v2638_v28, %v2832_v53  ;;  %v2893_v28 = vsub.f32 %v2685_v40, %v2771_v31  ;;  %v2911_v40 = vsub.f32 %v2705_v24, %v2773_v41 }
 0x200   :  { %3713 = vst [vmem:[#allocation22_spill] sm:$0xff] %v2842_v59  ;;  %v2929_v24 = vsub.f32 %v2702_v43, %v2771_v31 }
 0x201   :  { %3714 = vst [vmem:[#allocation23_spill] sm:$0xff] %v2859_v10 }
 0x202   :  { %3715 = vst [vmem:[#allocation24_spill] sm:$0xff] %v2875_v18 }
 0x203   :  { %3716 = vst [vmem:[#allocation25_spill] sm:$0xff] %v2893_v28 }
 0x204   :  { %3717 = vst [vmem:[#allocation26_spill] sm:$0xff] %v2911_v40 }
 0x205   :  { %3718 = vst [vmem:[#allocation27_spill] sm:$0xff] %v2929_v24 }
 0x206   :  { %804 = vperm.xlu2 %2079, %v723_v50   ;;  %921 = vperm.xlu1 %2078, %v762_v63   ;;  %v664_v50 = vperm.slane %v2740_v33, 1  ;;  %v747_v63 = vmul.f32 %v2842_v59, %v2842_v59 }
 0x207   :  { %864 = vperm.xlu0 %2082, %v743_v11  }
 0x208   :  { %v2852_v34 = vsub.f32 %v2516_v55, %v664_v50  ;;  %v2855_v38 = vsub.f32 %v2521_v37, %v664_v50  ;;  %v2868_v55 = vsub.f32 %v2519_v23, %v664_v50  ;;  %v2871_v37 = vsub.f32 %v2531_v58, %v664_v50 }
 0x209   :  { %v2885_v23 = vsub.f32 %v2529_v57, %v2751_v16  ;;  %v2889_v58 = vsub.f32 %v2541_v61, %v2751_v16  ;;  %v2903_v57 = vsub.f32 %v2539_v60, %v2768_v26  ;;  %v2907_v61 = vsub.f32 %v2547_v1, %v2768_v26 }
 0x20a   :  { %v728_v25 = vmul.f32 %v2852_v34, %v2852_v34  ;;  %v727_v11 = vmul.f32 %v2855_v38, %v2855_v38  ;;  %v2921_v60 = vsub.f32 %v2545_v0, %v2792_v56  ;;  %v2925_v1 = vsub.f32 %v2558_v6, %v2768_v26 }
 0x20b   :  { %v733_v50 = vmul.f32 %v2885_v23, %v2885_v23  ;;  %v736_v16 = vmul.f32 %v2903_v57, %v2903_v57  ;;  %v2939_v0 = vsub.f32 %v2556_v5, %v2792_v56  ;;  %v2943_v6 = vsub.f32 %v2565_v13, %v2792_v56 }
 0x20c   :  { %v739_v41 = vmul.f32 %v2921_v60, %v2921_v60  ;;  %v2951_v26 = vsub.f32 %v2563_v9, %v2812_v39  ;;  %v2955_v5 = vsub.f32 %v2573_v17, %v2812_v39  ;;  %v2967_v9 = vsub.f32 %v2567_v62, %v2812_v39 }
 0x20d   :  { %v742_v43 = vmul.f32 %v2939_v0, %v2939_v0  ;;  %v741_v31 = vmul.f32 %v2943_v6, %v2943_v6  ;;  %v2971_v17 = vsub.f32 %v2581_v27, %v2832_v53 }
 0x20e   :  { %813 = vperm.xlu2 %2079, %v726_v54   ;;  %810 = vperm.xlu1 %2078, %v725_v3   ;;  %v749_v3 = vmul.f32 %v2859_v10, %v2859_v10  ;;  %v730_v54 = vmul.f32 %v2868_v55, %v2868_v55  ;;  %3719 = vst [vmem:[#allocation28_spill] sm:$0xff] %v2951_v26 }
 0x20f   :  { %876 = vperm.xlu0 %2082, %v747_v63   ;;  %v729_v63 = vmul.f32 %v2871_v37, %v2871_v37  ;;  %v745_v13 = vmul.f32 %v2951_v26, %v2951_v26  ;;  %v744_v56 = vmul.f32 %v2955_v5, %v2955_v5  ;;  %3720 = vst [vmem:[#allocation29_spill] sm:$0xff] %v2967_v9 }
 0x216   :  { %819 = vperm.xlu2 %2079, %v728_v25   ;;  %816 = vperm.xlu1 %2078, %v727_v11   ;;  %v750_v25 = vmul.f32 %v2875_v18, %v2875_v18  ;;  %v732_v11 = vmul.f32 %v2889_v58, %v2889_v58 }
 0x217   :  { %882 = vperm.xlu0 %2082, %v749_v3   ;;  %v755_v3 = vmul.f32 %v2893_v28, %v2893_v28 }
 0x21e   :  { %825 = vperm.xlu2 %2079, %v730_v54   ;;  %822 = vperm.xlu1 %2078, %v729_v63   ;;  %v735_v54 = vmul.f32 %v2907_v61, %v2907_v61  ;;  %v760_v63 = vmul.f32 %v2911_v40, %v2911_v40 }
 0x21f   :  { %885 = vperm.xlu0 %2082, %v750_v25   ;;  %v738_v25 = vmul.f32 %v2925_v1, %v2925_v1 }
 0x226   :  { %834 = vperm.xlu2 %2079, %v733_v50   ;;  %831 = vperm.xlu1 %2078, %v732_v11   ;;  %v758_v50 = vmul.f32 %v2929_v24, %v2929_v24  ;;  %v2961_v11 = vpop.permute.xlu2 %1177 }
 0x227   :  { %900 = vperm.xlu0 %2082, %v755_v3   ;;  %v2963_v3 = vpop.permute.xlu0 %1189 }
 0x22e   :  { %843 = vperm.xlu2 %2079, %v736_v16   ;;  %840 = vperm.xlu1 %2078, %v735_v54   ;;  %v746_v16 = vmul.f32 %v2967_v9, %v2967_v9  ;;  %v748_v54 = vmul.f32 %v2971_v17, %v2971_v17 }
 0x22f   :  { %915 = vperm.xlu0 %2082, %v760_v63   ;;  %v670_v63 = vperm.slane %v2740_v33, 7 }
 0x231   :  { %v2984_v62 = vsub.f32 %v2611_v44, %v670_v63 }
 0x233   :  { %v751_v53 = vmul.f32 %v2984_v62, %v2984_v62 }
 0x236   :  { %852 = vperm.xlu2 %2079, %v739_v41   ;;  %849 = vperm.xlu1 %2078, %v738_v25   ;;  %v2981_v25 = vsub.f32 %v2630_v7, %v670_v63 }
 0x237   :  { %909 = vperm.xlu0 %2082, %v758_v50   ;;  %v2993_v50 = vsub.f32 %v2680_v35, %v670_v63 }
 0x238   :  { %3721 = vst [vmem:[#allocation30_spill] sm:$0xff] %v2981_v25  ;;  %v752_v39 = vmul.f32 %v2981_v25, %v2981_v25 }
 0x239   :  { %3722 = vst [vmem:[#allocation31_spill] sm:$0xff] %v2993_v50  ;;  %v753_v7 = vmul.f32 %v2993_v50, %v2993_v50 }
 0x23e   :  { %861 = vperm.xlu2 %2079, %v742_v43   ;;  %858 = vperm.xlu1 %2078, %v741_v31  }
 0x246   :  { %870 = vperm.xlu2 %2079, %v745_v13   ;;  %867 = vperm.xlu1 %2078, %v744_v56  }
 0x24e   :  { %873 = vperm.xlu2 %2079, %v746_v16   ;;  %879 = vperm.xlu1 %2078, %v748_v54   ;;  %v1235_v16 = vperm.slane %v2507_v20, 2 }
 0x250   :  { %v2978_v41 = vpop.permute.xlu2 %912 }
 0x251   :  { %v808_v27 = vpop.permute.xlu0 %807 }
 0x252   :  { %v924_v31 = vperm.slane %v808_v27, %v2576_v19 }
 0x256   :  { %891 = vperm.xlu2 %2079, %v752_v39   ;;  %888 = vperm.xlu1 %2078, %v751_v53  }
 0x258   :  { %v2990_v33 = vpop.permute.xlu2 %918 }
 0x259   :  { %v829_v43 = vpop.permute.xlu0 %828 }
 0x25e   :  { %2085 = vset.pattern.permute.xlu2 %v2536_v49  ;;  %894 = vperm.xlu1 %2078, %v753_v7   ;;  %v3008_v7 = vsub.f32 %v2675_v52, %v670_v63 }
 0x260   :  { %v805_v44 = vpop.permute.xlu2 %804  ;;  %3723 = vst [vmem:[#allocation32_spill] sm:$0xff] %v3008_v7  ;;  %v754_v27 = vmul.f32 %v3008_v7, %v3008_v7 }
 0x261   :  { %v923_v13 = vperm.slane %v805_v44, %v2570_v14  ;;  %v838_v56 = vpop.permute.xlu0 %837  ;;  %v3724_v44 = vmov 0  }
 0x262   :  { %v942_v2 = vperm.slane %v838_v56, %v2586_v12 }
 0x263   :  { %v925_v54 = vsel %vm554_vm0, %v924_v31, %v923_v13 }
 0x266   :  { %1253 = vperm.xlu2 %2085, %v1235_v16   ;;  %2080 = vset.pattern.permute.xlu1 %v2536_v49 }
 0x268   :  { %v3003_v35 = vpop.permute.xlu1 %903  ;;  %v814_v39 = vpop.permute.xlu2 %813 }
 0x269   :  { %v3005_v53 = vpop.permute.xlu0 %846 }
 0x26e   :  { %2087 = vset.pattern.permute.xlu2 %v3724_v44  ;;  %1183 = vperm.xlu1 %2080, %v2552_v4   ;;  %v928_v4 = vperm.slane %v814_v39, %v2586_v12 }
 0x26f   :  { %897 = vperm.xlu2 %2087, %v754_v27  }
 0x270   :  { %v3014_v20 = vpop.permute.xlu1 %906  ;;  %v820_v31 = vpop.permute.xlu2 %819 }
 0x271   :  { %v3016_v49 = vpop.permute.xlu0 %855  ;;  %v931_v18 = vperm.slane %v820_v31, %v2576_v19 }
 0x276   :  { %2083 = vset.pattern.permute.xlu1 %v2487_v29 }
 0x278   :  { %v3019_v13 = vpop.permute.xlu1 %921  ;;  %v826_v24 = vpop.permute.xlu2 %825 }
 0x279   :  { %v3021_v52 = vpop.permute.xlu0 %864 }
 0x27e   :  { %1241 = vperm.xlu1 %2083, %v1235_v16  }
 0x280   :  { %v811_v63 = vpop.permute.xlu1 %810  ;;  %v835_v7 = vpop.permute.xlu2 %834 }
 0x281   :  { %v926_v40 = vperm.slane %v811_v63, %v2579_v22  ;;  %v3024_v28 = vpop.permute.xlu0 %876 }
 0x283   :  { %v927_v27 = vsel %vm558_vm1, %v926_v40, %v925_v54  ;;  %v935_v40 = vperm.slane %v826_v24, %v2586_v12 }
 0x284   :  { %v929_v25 = vsel %vm562_vm2, %v928_v4, %v927_v27  ;;  %v3725_v27 = vld [vmem:[#allocation11_spill] sm:$0xff] }
 0x286   :  { %2084 = vset.pattern.permute.xlu1 %v2499_v47 }
 0x288   :  { %v817_v29 = vpop.permute.xlu1 %816  ;;  %v844_v10 = vpop.permute.xlu2 %843 }
 0x289   :  { %v930_v21 = vperm.slane %v817_v29, %v2570_v14  ;;  %v3032_v9 = vpop.permute.xlu0 %882 }
 0x28b   :  { %v932_v63 = vsel %vm554_vm0, %v931_v18, %v930_v21  ;;  %v937_v21 = vperm.slane %v829_v43, %v2570_v14 }
 0x28e   :  { %1247 = vperm.xlu1 %2084, %v1235_v16  }
 0x290   :  { %v823_v26 = vpop.permute.xlu1 %822  ;;  %v853_v4 = vpop.permute.xlu2 %852 }
 0x291   :  { %v933_v39 = vperm.slane %v823_v26, %v2579_v22  ;;  %v3036_v59 = vpop.permute.xlu0 %885  ;;  %v940_v26 = vperm.slane %v835_v7, %v2579_v22  ;;  %v986_v7 = vperm.slane %v2978_v41, %v2570_v14 }
 0x293   :  { %v934_v47 = vsel %vm558_vm1, %v933_v39, %v932_v63 }
 0x294   :  { %v936_v54 = vsel %vm562_vm2, %v935_v40, %v934_v47 }
 0x295   :  { %v993_v31 = vsel %vm627_vm3, %v936_v54, %v929_v25 }
 0x296   :  { %2086 = vset.pattern.permute.xlu1 %v3725_v27 }
 0x298   :  { %v832_v29 = vpop.permute.xlu1 %831  ;;  %v862_v40 = vpop.permute.xlu2 %861 }
 0x299   :  { %v938_v18 = vperm.slane %v832_v29, %v2576_v19  ;;  %v901_v50 = vpop.permute.xlu0 %900  ;;  %v945_v29 = vperm.slane %v844_v10, %v2576_v19  ;;  %v982_v10 = vperm.slane %v3014_v20, %v2579_v22 }
 0x29a   :  { %v979_v56 = vperm.slane %v901_v50, %v2570_v14 }
 0x29b   :  { %v939_v24 = vsel %vm554_vm0, %v938_v18, %v937_v21  ;;  %v947_v18 = vperm.slane %v3005_v53, %v2579_v22 }
 0x29c   :  { %v941_v63 = vsel %vm558_vm1, %v940_v26, %v939_v24 }
 0x29d   :  { %v943_v39 = vsel %vm562_vm2, %v942_v2, %v941_v63  ;;  %v980_v2 = vperm.slane %v3003_v35, %v2576_v19 }
 0x29e   :  { %v994_v25 = vsel %vm629_vm4, %v943_v39, %v993_v31  ;;  %1259 = vperm.xlu1 %2086, %v1235_v16   ;;  %v989_v16 = vperm.slane %v2990_v33, %v2579_v22  ;;  %v991_v33 = vperm.slane %v3019_v13, %v2586_v12 }
 0x29f   :  { %v981_v41 = vsel %vm554_vm0, %v980_v2, %v979_v56  ;;  %v952_v56 = vperm.slane %v3016_v49, %v2576_v19 }
 0x2a0   :  { %v841_v47 = vpop.permute.xlu1 %840  ;;  %v871_v26 = vpop.permute.xlu2 %870 }
 0x2a1   :  { %v916_v54 = vpop.permute.xlu0 %915  ;;  %v944_v27 = vperm.slane %v841_v47, %v2570_v14  ;;  %v983_v47 = vsel %vm558_vm1, %v982_v10, %v981_v41  ;;  %v961_v10 = vperm.slane %v871_v26, %v2579_v22  ;;  %v968_v26 = vperm.slane %v3032_v9, %v2579_v22 }
 0x2a2   :  { %v987_v43 = vperm.slane %v916_v54, %v2576_v19 }
 0x2a3   :  { %v946_v21 = vsel %vm554_vm0, %v945_v29, %v944_v27 }
 0x2a4   :  { %v988_v31 = vsel %vm554_vm0, %v987_v43, %v986_v7  ;;  %v948_v63 = vsel %vm558_vm1, %v947_v18, %v946_v21  ;;  %v951_v7 = vperm.slane %v853_v4, %v2570_v14 }
 0x2a6   :  { %2088 = vset.pattern.permute.xlu1 %v3724_v44  ;;  %v990_v44 = vsel %vm558_vm1, %v989_v16, %v988_v31  ;;  %v953_v31 = vsel %vm554_vm0, %v952_v56, %v951_v7 }
 0x2a7   :  { %v992_v43 = vsel %vm562_vm2, %v991_v33, %v990_v44 }
 0x2a8   :  { %v850_v50 = vpop.permute.xlu1 %849  ;;  %v874_v16 = vpop.permute.xlu2 %873 }
 0x2a9   :  { %v949_v35 = vperm.slane %v850_v50, %v2586_v12  ;;  %v910_v24 = vpop.permute.xlu0 %909  ;;  %v958_v50 = vperm.slane %v3021_v52, %v2570_v14 }
 0x2aa   :  { %v984_v39 = vperm.slane %v910_v24, %v2586_v12 }
 0x2ab   :  { %v950_v53 = vsel %vm562_vm2, %v949_v35, %v948_v63  ;;  %v963_v35 = vperm.slane %v874_v16, %v2586_v12 }
 0x2ac   :  { %v995_v54 = vsel %vm631_vm5, %v950_v53, %v994_v25  ;;  %v985_v20 = vsel %vm562_vm2, %v984_v39, %v983_v47  ;;  %v956_v25 = vperm.slane %v862_v40, %v2586_v12  ;;  %v965_v53 = vperm.slane %v3024_v28, %v2570_v14 }
 0x2ad   :  { %v1000_v27 = vsel %vm627_vm3, %v992_v43, %v985_v20  ;;  %v970_v47 = vperm.slane %v3036_v59, %v2586_v12 }
 0x2ae   :  { %v1006_v13 = vsel %vm648_vm11, %v1000_v27, 0.0 }
 0x2af   :  { %1007 = vadd.xlane.f32.xlu0 %v1006_v13 }
 0x2b0   :  { %v859_v29 = vpop.permute.xlu1 %858  ;;  %v892_v44 = vpop.permute.xlu2 %891 }
 0x2b1   :  { %v954_v2 = vperm.slane %v859_v29, %v2579_v22  ;;  %v973_v29 = vperm.slane %v892_v44, %v2576_v19 }
 0x2b3   :  { %v955_v21 = vsel %vm558_vm1, %v954_v2, %v953_v31 }
 0x2b4   :  { %v957_v18 = vsel %vm562_vm2, %v956_v25, %v955_v21 }
 0x2b5   :  { %v996_v4 = vsel %vm633_vm6, %v957_v18, %v995_v54 }
 0x2b8   :  { %v868_v41 = vpop.permute.xlu1 %867 }
 0x2b9   :  { %v959_v49 = vperm.slane %v868_v41, %v2576_v19 }
 0x2bb   :  { %v960_v24 = vsel %vm554_vm0, %v959_v49, %v958_v50 }
 0x2bc   :  { %v962_v40 = vsel %vm558_vm1, %v961_v10, %v960_v24 }
 0x2bd   :  { %v964_v33 = vsel %vm562_vm2, %v963_v35, %v962_v40 }
 0x2be   :  { %v997_v63 = vsel %vm635_vm7, %v964_v33, %v996_v4 }
 0x2c0   :  { %v880_v39 = vpop.permute.xlu1 %879  ;;  %v3109_v43 = vpop.permute.xlu2 %1253 }
 0x2c1   :  { %v966_v52 = vperm.slane %v880_v39, %v2576_v19 }
 0x2c3   :  { %v967_v54 = vsel %vm554_vm0, %v966_v52, %v965_v53 }
 0x2c4   :  { %v969_v20 = vsel %vm558_vm1, %v968_v26, %v967_v54 }
 0x2c5   :  { %v971_v27 = vsel %vm562_vm2, %v970_v47, %v969_v20 }
 0x2c6   :  { %v998_v7 = vsel %vm637_vm8, %v971_v27, %v997_v63 }
 0x2c8   :  { %v889_v13 = vpop.permute.xlu1 %888 }
 0x2c9   :  { %v972_v28 = vperm.slane %v889_v13, %v2570_v14  ;;  %v898_v56 = vpop.permute.xlu2 %897 }
 0x2ca   :  { %v977_v31 = vperm.slane %v898_v56, %v2586_v12 }
 0x2cb   :  { %v974_v59 = vsel %vm554_vm0, %v973_v29, %v972_v28 }
 0x2d0   :  { %v895_v9 = vpop.permute.xlu1 %894 }
 0x2d1   :  { %v975_v2 = vperm.slane %v895_v9, %v2579_v22  ;;  %v3726_v9 = vld [vmem:[#allocation14_spill] sm:$0xff] }
 0x2d3   :  { %v976_v25 = vsel %vm558_vm1, %v975_v2, %v974_v59  ;;  %v3727_v2 = vld [vmem:[#allocation12_spill] sm:$0xff] }
 0x2d4   :  { %v978_v16 = vsel %vm562_vm2, %v977_v31, %v976_v25 }
 0x2d5   :  { %v999_v21 = vsel %vm639_vm9, %v978_v16, %v998_v7 }
 0x2d6   :  { %v1003_v18 = vsel %vm644_vm10, %v999_v21, 0.0 }
 0x2d7   :  { %1004 = vadd.xlane.f32.xlu2 %v1003_v18 }
 0x2e0   :  { %v3123_v49 = vpop.permute.xlu1 %1183 }
 0x2f0   :  { %v3125_v44 = vpop.permute.xlu1 %1241 }
 0x300   :  { %v3139_v56 = vpop.permute.xlu1 %1247 }
 0x34a   :  { %v1005_v4 = vpop.xlane.xlu2 %1004 }
 0x34b   :  { %v1009_v41 = vmul.f32 %v1005_v4, %v2735_v45 }
 0x34d   :  { %v1011_v50 = vadd.f32 1e-05, %v1009_v41 }
 0x34f   :  { %2091 = vrsqrt.f32 %v1011_v50  ;;  %vm1019_vm14 = vweird.f32 %v1011_v50 }
 0x355   :  { %v2092_v10 = vpop.eup %2091 }
 0x356   :  { %v1014_v35 = vmul.f32 %v2092_v10, %v1011_v50  ;;  %vm1020_vm13 = vweird.f32 %v2092_v10  ;;  %v3728_v50 = vld [vmem:[#allocation13_spill] sm:$0xff] }
 0x357   :  { %vm1021_vm15 = vmor %vm1019_vm14, %vm1020_vm13 }
 0x358   :  { %v1015_v24 = vmul.f32 %v2092_v10, %v1014_v35 }
 0x35a   :  { %v1016_v40 = vmul.f32 0.5, %v1015_v24 }
 0x35c   :  { %v1017_v33 = vsub.f32 1.5, %v1016_v40  ;;  %v3165_v40 = vpop.permute.xlu1 %1259 }
 0x35e   :  { %v1018_v63 = vmul.f32 %v2092_v10, %v1017_v33 }
 0x360   :  { %v3127_v39 = vsel %vm1021_vm15, %v2092_v10, %v1018_v63 }
 0x361   :  { %v1035_v53 = vperm.slane %v3127_v39, 0  ;;  %v1036_v52 = vperm.slane %v3127_v39, 1  ;;  %v3147_v59 = vperm.slane %v3127_v39, 3  ;;  %v3150_v31 = vperm.slane %v3127_v39, 2 }
 0x362   :  { %v3168_v33 = vperm.slane %v3127_v39, 4 }
 0x363   :  { %v1057_v26 = vmul.f32 %v1035_v53, %v2838_v8  ;;  %v1056_v47 = vmul.f32 %v1035_v53, %v2744_v36  ;;  %v1055_v54 = vmul.f32 %v1035_v53, %v2815_v51  ;;  %v1062_v20 = vmul.f32 %v1036_v52, %v2868_v55 }
 0x364   :  { %v1060_v28 = vmul.f32 %v1036_v52, %v2852_v34  ;;  %v1059_v29 = vmul.f32 %v1036_v52, %v2855_v38  ;;  %v1068_v41 = vmul.f32 %v3147_v59, %v2903_v57  ;;  %v1063_v10 = vmul.f32 %v3150_v31, %v3728_v50 }
 0x365   :  { %v1127_v27 = vmul.f32 %v2737_v46, %v1057_v26  ;;  %v1126_v7 = vmul.f32 %v2733_v32, %v1056_v47  ;;  %v1125_v13 = vmul.f32 %v2731_v48, %v1055_v54  ;;  %v1132_v55 = vmul.f32 %v3727_v2, %v1062_v20 }
 0x366   :  { %v1130_v16 = vmul.f32 %v2733_v32, %v1060_v28  ;;  %v1129_v21 = vmul.f32 %v2731_v48, %v1059_v29  ;;  %v1061_v24 = vmul.f32 %v1036_v52, %v2871_v37  ;;  %v1138_v47 = vmul.f32 %v2733_v32, %v1068_v41  ;;  %v1008_v37 = vpop.xlane.xlu0 %1007 }
 0x367   :  { %v1197_v8 = vadd.f32 %v3123_v49, %v1127_v27  ;;  %v1196_v36 = vadd.f32 %v2961_v11, %v1126_v7  ;;  %v1195_v51 = vadd.f32 %v3726_v9, %v1125_v13  ;;  %v1202_v18 = vadd.f32 %v2963_v3, %v1132_v55 }
 0x368   :  { %v1200_v4 = vadd.f32 %v2961_v11, %v1130_v16  ;;  %v1199_v35 = vadd.f32 %v3726_v9, %v1129_v21  ;;  %v1133_v57 = vmul.f32 %v2731_v48, %v1063_v10  ;;  %v1131_v20 = vmul.f32 %v2737_v46, %v1061_v24 }
 0x369   :  { %v1267_v34 = vmul.f32 %v3109_v43, %v1197_v8  ;;  %v1266_v25 = vmul.f32 %v3139_v56, %v1196_v36  ;;  %v1265_v38 = vmul.f32 %v3125_v44, %v1195_v51  ;;  %v1272_v63 = vmul.f32 %v3165_v40, %v1202_v18 }
 0x36a   :  { %v1270_v26 = vmul.f32 %v3139_v56, %v1200_v4  ;;  %v1269_v54 = vmul.f32 %v3125_v44, %v1199_v35  ;;  %v1208_v52 = vadd.f32 %v2961_v11, %v1138_v47  ;;  %v1203_v27 = vadd.f32 %v3726_v9, %v1133_v57  ;;  %v3729_v47 = vld [vmem:[#allocation15_spill] sm:$0xff] }
 0x36b   :  { %1352 = vperm.xlu0 %2082, %v1267_v34   ;;  %1349 = vperm.xlu1 %2088, %v1266_v25   ;;  %v1071_v7 = vmul.f32 %v3168_v33, %v2921_v60  ;;  %v1058_v13 = vmul.f32 %v1035_v53, %v2835_v42  ;;  %v1201_v28 = vadd.f32 %v3123_v49, %v1131_v20 }
 0x36c   :  { %1346 = vperm.xlu2 %2087, %v1265_v38   ;;  %v1064_v29 = vmul.f32 %v3150_v31, %v2889_v58  ;;  %v1010_v8 = vmul.f32 %v1008_v37, %v2735_v45  ;;  %v1278_v36 = vmul.f32 %v3139_v56, %v1208_v52  ;;  %v1273_v51 = vmul.f32 %v3125_v44, %v1203_v27 }
 0x36d   :  { %v1141_v55 = vmul.f32 %v2731_v48, %v1071_v7  ;;  %v1128_v34 = vmul.f32 %v3727_v2, %v1058_v13  ;;  %v1271_v25 = vmul.f32 %v3109_v43, %v1201_v28  ;;  %v1073_v53 = vmul.f32 %v3168_v33, %v2943_v6 }
 0x36e   :  { %v1134_v60 = vmul.f32 %v2733_v32, %v1064_v29  ;;  %v3191_v42 = vadd.f32 1e-05, %v1010_v8  ;;  %v1067_v38 = vmul.f32 %v3147_v59, %v2907_v61  ;;  %v1065_v21 = vmul.f32 %v3150_v31, %v2885_v23 }
 0x36f   :  { %v1211_v58 = vadd.f32 %v3726_v9, %v1141_v55  ;;  %v1198_v45 = vadd.f32 %v2963_v3, %v1128_v34  ;;  %v1143_v41 = vmul.f32 %v2737_v46, %v1073_v53  ;;  %v1074_v23 = vmul.f32 %v3168_v33, %v2939_v0 }
 0x370   :  { %v1204_v16 = vadd.f32 %v2961_v11, %v1134_v60  ;;  %2093 = vrsqrt.f32 %v3191_v42  ;;  %v1137_v50 = vmul.f32 %v2731_v48, %v1067_v38  ;;  %v1135_v10 = vmul.f32 %v2737_v46, %v1065_v21 }
 0x371   :  { %v1281_v18 = vmul.f32 %v3125_v44, %v1211_v58  ;;  %v1268_v4 = vmul.f32 %v3165_v40, %v1198_v45  ;;  %v1213_v35 = vadd.f32 %v3123_v49, %v1143_v41  ;;  %v1066_v57 = vmul.f32 %v3150_v31, %v3729_v47  ;;  %v3732_v47 = vld [vmem:[#allocation22_spill] sm:$0xff] }
 0x372   :  { %v1274_v6 = vmul.f32 %v3139_v56, %v1204_v16  ;;  %v1207_v24 = vadd.f32 %v3726_v9, %v1137_v50  ;;  %v1144_v20 = vmul.f32 %v3727_v2, %v1074_v23  ;;  %v3221_v37 = vperm.slane %v3127_v39, 6 }
 0x373   :  { %1367 = vperm.xlu0 %2082, %v1272_v63   ;;  %1361 = vperm.xlu1 %2088, %v1270_v26   ;;  %v1069_v63 = vmul.f32 %v3147_v59, %v2777_v15  ;;  %v1205_v26 = vadd.f32 %v3123_v49, %v1135_v10  ;;  %v1283_v0 = vmul.f32 %v3109_v43, %v1213_v35  ;;  %v1040_v45 = vperm.slane %v3127_v39, 5 }
 0x374   :  { %1358 = vperm.xlu2 %2087, %v1269_v54   ;;  %v1277_v52 = vmul.f32 %v3125_v44, %v1207_v24  ;;  %v1136_v7 = vmul.f32 %v3727_v2, %v1066_v57  ;;  %v1214_v13 = vadd.f32 %v2963_v3, %v1144_v20  ;;  %v1080_v28 = vmul.f32 %v3221_v37, %v2971_v17 }
 0x375   :  { %v1139_v27 = vmul.f32 %v2737_v46, %v1069_v63  ;;  %v1275_v15 = vmul.f32 %v3109_v43, %v1205_v26  ;;  %v1070_v8 = vmul.f32 %v3147_v59, %v2925_v1  ;;  %v3242_v17 = vperm.slane %v3127_v39, 7  ;;  %v3730_v39 = vld [vmem:[#allocation21_spill] sm:$0xff]  ;;  %v3731_v63 = vld [vmem:[#allocation31_spill] sm:$0xff] }
 0x376   :  { %v2094_v61 = vpop.eup %2093  ;;  %v1284_v34 = vmul.f32 %v3165_v40, %v1214_v13  ;;  %v1076_v16 = vmul.f32 %v1040_v45, %v2955_v5  ;;  %vm1029_vm13 = vweird.f32 %v3191_v42  ;;  %v1079_v57 = vmul.f32 %v3221_v37, %v3732_v47  ;;  %v3741_v47 = vld [vmem:[#allocation25_spill] sm:$0xff] }
 0x377   :  { %v1024_v54 = vmul.f32 %v2094_v61, %v3191_v42  ;;  %v1209_v29 = vadd.f32 %v3123_v49, %v1139_v27  ;;  %v1140_v58 = vmul.f32 %v3727_v2, %v1070_v8  ;;  %v1083_v38 = vmul.f32 %v3242_v17, %v2984_v62 }
 0x378   :  { %vm1030_vm12 = vweird.f32 %v2094_v61  ;;  %v1146_v10 = vmul.f32 %v2733_v32, %v1076_v16  ;;  %v1085_v26 = vmul.f32 %v3242_v17, %v3731_v63 }
 0x379   :  { %v1025_v31 = vmul.f32 %v2094_v61, %v1024_v54  ;;  %v1279_v60 = vmul.f32 %v3109_v43, %v1209_v29  ;;  %v1210_v53 = vadd.f32 %v2963_v3, %v1140_v58  ;;  %vm1031_vm14 = vmor %vm1029_vm13, %vm1030_vm12  ;;  %v3733_v54 = vld [vmem:[#allocation28_spill] sm:$0xff]  ;;  %v3734_v29 = vld [vmem:[#allocation17_spill] sm:$0xff] }
 0x37a   :  { %v1216_v24 = vadd.f32 %v2961_v11, %v1146_v10  ;;  %v1077_v20 = vmul.f32 %v1040_v45, %v3733_v54  ;;  %v1155_v27 = vmul.f32 %v2737_v46, %v1085_v26  ;;  %v3742_v54 = vld [vmem:[#allocation32_spill] sm:$0xff] }
 0x37b   :  { %1385 = vperm.xlu0 %2082, %v1278_v36   ;;  %1370 = vperm.xlu1 %2088, %v1273_v51   ;;  %v1206_v36 = vadd.f32 %v2963_v3, %v1136_v7  ;;  %v1072_v51 = vmul.f32 %v3168_v33, %v2803_v30  ;;  %v1026_v55 = vmul.f32 0.5, %v1025_v31  ;;  %v1280_v50 = vmul.f32 %v3165_v40, %v1210_v53 }
 0x37c   :  { %1364 = vperm.xlu2 %2087, %v1271_v25   ;;  %v1150_v25 = vmul.f32 %v2733_v32, %v1080_v28  ;;  %v1147_v31 = vmul.f32 %v2737_v46, %v1077_v20  ;;  %v1225_v13 = vadd.f32 %v3123_v49, %v1155_v27  ;;  %v1086_v20 = vmul.f32 %v3242_v17, %v3742_v54 }
 0x37d   :  { %v1276_v1 = vmul.f32 %v3165_v40, %v1206_v36  ;;  %v1142_v59 = vmul.f32 %v2733_v32, %v1072_v51  ;;  %v1027_v30 = vsub.f32 1.5, %v1026_v55  ;;  %v3735_v36 = vld [vmem:[#allocation23_spill] sm:$0xff] }
 0x37e   :  { %v1220_v33 = vadd.f32 %v2961_v11, %v1150_v25  ;;  %v1081_v51 = vmul.f32 %v3221_v37, %v3735_v36  ;;  %v1217_v55 = vadd.f32 %v3123_v49, %v1147_v31  ;;  %v1156_v31 = vmul.f32 %v3727_v2, %v1086_v20  ;;  %v3744_v36 = vld [vmem:[#allocation16_spill] sm:$0xff] }
 0x37f   :  { %v1212_v21 = vadd.f32 %v2961_v11, %v1142_v59 }
 0x380   :  { %v1290_v41 = vmul.f32 %v3139_v56, %v1220_v33  ;;  %v1151_v59 = vmul.f32 %v2737_v46, %v1081_v51 }
 0x381   :  { %v1282_v62 = vmul.f32 %v3139_v56, %v1212_v21  ;;  %v3738_v21 = vld [vmem:[#allocation24_spill] sm:$0xff] }
 0x383   :  { %1394 = vperm.xlu0 %2082, %v1281_v18   ;;  %1355 = vperm.xlu1 %2088, %v1268_v4   ;;  %v1075_v18 = vmul.f32 %v1040_v45, %v3730_v39  ;;  %v1028_v4 = vmul.f32 %v2094_v61, %v1027_v30  ;;  %v1287_v30 = vmul.f32 %v3109_v43, %v1217_v55 }
 0x384   :  { %1373 = vperm.xlu2 %2087, %v1274_v6   ;;  %v1153_v6 = vmul.f32 %v2731_v48, %v1083_v38  ;;  %v1221_v38 = vadd.f32 %v3123_v49, %v1151_v59  ;;  %v1082_v39 = vmul.f32 %v3221_v37, %v3738_v21  ;;  %v3745_v59 = vld [vmem:[#allocation27_spill] sm:$0xff] }
 0x385   :  { %v1145_v5 = vmul.f32 %v2731_v48, %v1075_v18  ;;  %v1032_v23 = vsel %vm1031_vm14, %v2094_v61, %v1028_v4  ;;  %v1286_v61 = vmul.f32 %v3139_v56, %v1216_v24  ;;  %v3739_v4 = vld [vmem:[#allocation30_spill] sm:$0xff] }
 0x386   :  { %v1223_v35 = vadd.f32 %v3726_v9, %v1153_v6  ;;  %v1291_v10 = vmul.f32 %v3109_v43, %v1221_v38  ;;  %v3746_v38 = vld [vmem:[#allocation18_spill] sm:$0xff] }
 0x387   :  { %v1215_v42 = vadd.f32 %v3726_v9, %v1145_v5  ;;  %v1152_v5 = vmul.f32 %v3727_v2, %v1082_v39 }
 0x389   :  { %v1285_v7 = vmul.f32 %v3125_v44, %v1215_v42  ;;  %v1222_v63 = vadd.f32 %v2963_v3, %v1152_v5 }
 0x38b   :  { %1400 = vperm.xlu0 %2082, %v1283_v0   ;;  %1382 = vperm.xlu1 %2088, %v1277_v52   ;;  %v3269_v0 = vperm.slane %v1032_v23, 0  ;;  %v1293_v52 = vmul.f32 %v3125_v44, %v1223_v35 }
 0x38c   :  { %1376 = vperm.xlu2 %2087, %v1275_v15   ;;  %v1149_v15 = vmul.f32 %v2731_v48, %v1079_v57 }
 0x38d   :  { %v1088_v8 = vmul.f32 %v3269_v0, %v3734_v29  ;;  %v1087_v57 = vmul.f32 %v3269_v0, %v3741_v47 }
 0x38e   :  { %v1219_v28 = vadd.f32 %v3726_v9, %v1149_v15 }
 0x38f   :  { %v1157_v15 = vmul.f32 %v2731_v48, %v1087_v57 }
 0x390   :  { %v1289_v58 = vmul.f32 %v3125_v44, %v1219_v28 }
 0x391   :  { %v1227_v28 = vadd.f32 %v3726_v9, %v1157_v15 }
 0x393   :  { %1403 = vperm.xlu0 %2082, %v1284_v34   ;;  %1388 = vperm.xlu1 %2088, %v1279_v60   ;;  %v3736_v34 = vld [vmem:[#allocation29_spill] sm:$0xff]  ;;  %v1295_v60 = vmul.f32 %v3109_v43, %v1225_v13 }
 0x394   :  { %1379 = vperm.xlu2 %2087, %v1276_v1   ;;  %v1078_v25 = vmul.f32 %v1040_v45, %v3736_v34  ;;  %v1158_v1 = vmul.f32 %v2733_v32, %v1088_v8  ;;  %v3737_v45 = vld [vmem:[#allocation19_spill] sm:$0xff]  ;;  %v1226_v8 = vadd.f32 %v2963_v3, %v1156_v31  ;;  %v1297_v34 = vmul.f32 %v3125_v44, %v1227_v28 }
 0x395   :  { %v1089_v16 = vmul.f32 %v3269_v0, %v3737_v45 }
 0x396   :  { %v1148_v33 = vmul.f32 %v3727_v2, %v1078_v25  ;;  %v1228_v53 = vadd.f32 %v2961_v11, %v1158_v1 }
 0x398   :  { %v1218_v18 = vadd.f32 %v2963_v3, %v1148_v33  ;;  %v1298_v6 = vmul.f32 %v3139_v56, %v1228_v53 }
 0x39a   :  { %v1288_v35 = vmul.f32 %v3165_v40, %v1218_v18 }
 0x39b   :  { %1421 = vperm.xlu0 %2082, %v1290_v41   ;;  %1391 = vperm.xlu1 %2088, %v1280_v50   ;;  %v1084_v41 = vmul.f32 %v3242_v17, %v3739_v4  ;;  %v1044_v50 = vperm.slane %v1032_v23, 1  ;;  %v3740_v23 = vld [vmem:[#allocation20_spill] sm:$0xff]  ;;  %v3743_v17 = vld [vmem:[#allocation26_spill] sm:$0xff] }
 0x39c   :  { %1397 = vperm.xlu2 %2087, %v1282_v62   ;;  %v1159_v62 = vmul.f32 %v2737_v46, %v1089_v16 }
 0x39d   :  { %v1154_v24 = vmul.f32 %v2733_v32, %v1084_v41  ;;  %v1094_v26 = vmul.f32 %v1044_v50, %v3740_v23  ;;  %v1092_v29 = vmul.f32 %v1044_v50, %v3743_v17  ;;  %v1091_v51 = vmul.f32 %v1044_v50, %v3744_v36 }
 0x39e   :  { %v1229_v37 = vadd.f32 %v3123_v49, %v1159_v62  ;;  %v1093_v45 = vmul.f32 %v1044_v50, %v3746_v38 }
 0x39f   :  { %v1224_v42 = vadd.f32 %v2961_v11, %v1154_v24  ;;  %v1164_v27 = vmul.f32 %v3727_v2, %v1094_v26  ;;  %v1162_v25 = vmul.f32 %v2733_v32, %v1092_v29 }
 0x3a1   :  { %v1234_v13 = vadd.f32 %v2963_v3, %v1164_v27  ;;  %v1232_v1 = vadd.f32 %v2961_v11, %v1162_v25 }
 0x3a3   :  { %1430 = vperm.xlu0 %2082, %v1293_v52   ;;  %1409 = vperm.xlu1 %2088, %v1286_v61   ;;  %v1299_v52 = vmul.f32 %v3109_v43, %v1229_v37  ;;  %v1292_v61 = vmul.f32 %v3165_v40, %v1222_v63  ;;  %v1304_v55 = vmul.f32 %v3165_v40, %v1234_v13 }
 0x3a4   :  { %1406 = vperm.xlu2 %2087, %v1285_v7   ;;  %v1294_v7 = vmul.f32 %v3139_v56, %v1224_v42  ;;  %v1302_v16 = vmul.f32 %v3139_v56, %v1232_v1 }
 0x3ab   :  { %1436 = vperm.xlu0 %2082, %v1295_v60   ;;  %1418 = vperm.xlu1 %2088, %v1289_v58   ;;  %v1296_v60 = vmul.f32 %v3165_v40, %v1226_v8  ;;  %v1161_v58 = vmul.f32 %v2731_v48, %v1091_v51  ;;  %v1163_v48 = vmul.f32 %v2737_v46, %v1093_v45 }
 0x3ac   :  { %1412 = vperm.xlu2 %2087, %v1287_v30   ;;  %v1090_v30 = vmul.f32 %v3269_v0, %v3745_v59 }
 0x3ad   :  { %v1231_v53 = vadd.f32 %v3726_v9, %v1161_v58  ;;  %v1233_v0 = vadd.f32 %v3123_v49, %v1163_v48 }
 0x3ae   :  { %v1160_v32 = vmul.f32 %v3727_v2, %v1090_v30 }
 0x3af   :  { %v1301_v21 = vmul.f32 %v3125_v44, %v1231_v53  ;;  %v1303_v9 = vmul.f32 %v3109_v43, %v1233_v0 }
 0x3b0   :  { %v1230_v11 = vadd.f32 %v2963_v3, %v1160_v32 }
 0x3b2   :  { %v1300_v18 = vmul.f32 %v3165_v40, %v1230_v11 }
 0x3b3   :  { %1445 = vperm.xlu0 %2082, %v1298_v6   ;;  %1424 = vperm.xlu1 %2088, %v1291_v10  }
 0x3b4   :  { %1415 = vperm.xlu2 %2087, %v1288_v35  }
 0x3bb   :  { %1448 = vperm.xlu0 %2082, %v1299_v52   ;;  %1427 = vperm.xlu1 %2088, %v1292_v61  }
 0x3bc   :  { %1433 = vperm.xlu2 %2087, %v1294_v7  }
 0x3c3   :  { %1463 = vperm.xlu0 %2082, %v1304_v55   ;;  %1442 = vperm.xlu1 %2088, %v1297_v34  }
 0x3c4   :  { %1439 = vperm.xlu2 %2087, %v1296_v60  }
 0x3c6   :  { %v1347_v33 = vpop.permute.xlu2 %1346 }
 0x3c7   :  { %v1465_v44 = vperm.slane %v1347_v33, %v2570_v14 }
 0x3cb   :  { %1457 = vperm.xlu1 %2088, %v1302_v16  }
 0x3cc   :  { %1454 = vperm.xlu2 %2087, %v1301_v21  }
 0x3ce   :  { %v1359_v39 = vpop.permute.xlu2 %1358 }
 0x3cf   :  { %v1472_v49 = vperm.slane %v1359_v39, %v2570_v14 }
 0x3d3   :  { %1451 = vperm.xlu1 %2088, %v1300_v18  }
 0x3d4   :  { %1460 = vperm.xlu2 %2087, %v1303_v9  }
 0x3d6   :  { %v1365_v56 = vpop.permute.xlu2 %1364 }
 0x3d7   :  { %v1475_v43 = vperm.slane %v1365_v56, %v2579_v22 }
 0x3dd   :  { %v1353_v4 = vpop.permute.xlu0 %1352  ;;  %v1350_v2 = vpop.permute.xlu1 %1349 }
 0x3de   :  { %v1466_v46 = vperm.slane %v1350_v2, %v2576_v19  ;;  %v1374_v41 = vpop.permute.xlu2 %1373  ;;  %v1468_v63 = vperm.slane %v1353_v4, %v2579_v22 }
 0x3df   :  { %v1480_v25 = vperm.slane %v1374_v41, %v2576_v19 }
 0x3e0   :  { %v1467_v50 = vsel %vm554_vm0, %v1466_v46, %v1465_v44 }
 0x3e1   :  { %v1469_v42 = vsel %vm558_vm1, %v1468_v63, %v1467_v50 }
 0x3e5   :  { %v1368_v3 = vpop.permute.xlu0 %1367  ;;  %v1362_v6 = vpop.permute.xlu1 %1361 }
 0x3e6   :  { %v1473_v40 = vperm.slane %v1362_v6, %v2576_v19  ;;  %v1377_v10 = vpop.permute.xlu2 %1376  ;;  %v1477_v47 = vperm.slane %v1368_v3, %v2586_v12 }
 0x3e7   :  { %v1482_v1 = vperm.slane %v1377_v10, %v2579_v22 }
 0x3e8   :  { %v1474_v62 = vsel %vm554_vm0, %v1473_v40, %v1472_v49 }
 0x3e9   :  { %v1476_v5 = vsel %vm558_vm1, %v1475_v43, %v1474_v62 }
 0x3ea   :  { %v1478_v20 = vsel %vm562_vm2, %v1477_v47, %v1476_v5 }
 0x3ed   :  { %v1386_v35 = vpop.permute.xlu0 %1385  ;;  %v1371_v24 = vpop.permute.xlu1 %1370 }
 0x3ee   :  { %v1380_v37 = vpop.permute.xlu2 %1379  ;;  %v1479_v55 = vperm.slane %v1371_v24, %v2570_v14  ;;  %v1487_v38 = vperm.slane %v1386_v35, %v2576_v19 }
 0x3ef   :  { %v1484_v45 = vperm.slane %v1380_v37, %v2586_v12 }
 0x3f0   :  { %v1481_v58 = vsel %vm554_vm0, %v1480_v25, %v1479_v55 }
 0x3f1   :  { %v1483_v33 = vsel %vm558_vm1, %v1482_v1, %v1481_v58 }
 0x3f2   :  { %v1485_v11 = vsel %vm562_vm2, %v1484_v45, %v1483_v33 }
 0x3f5   :  { %v1395_v23 = vpop.permute.xlu0 %1394  ;;  %v1356_v26 = vpop.permute.xlu1 %1355 }
 0x3f6   :  { %v1470_v57 = vperm.slane %v1356_v26, %v2586_v12  ;;  %v1398_v52 = vpop.permute.xlu2 %1397  ;;  %v1493_v18 = vperm.slane %v1395_v23, %v2570_v14 }
 0x3f7   :  { %v1494_v9 = vperm.slane %v1398_v52, %v2576_v19 }
 0x3f8   :  { %v1471_v54 = vsel %vm562_vm2, %v1470_v57, %v1469_v42 }
 0x3f9   :  { %v1535_v61 = vsel %vm627_vm3, %v1478_v20, %v1471_v54  ;;  %v1495_v5 = vsel %vm554_vm0, %v1494_v9, %v1493_v18  ;;  %v1598_v18 = vstv %s2027_s7 }
 0x3fa   :  { %v1536_v10 = vsel %vm629_vm4, %v1485_v11, %v1535_v61 }
 0x3fd   :  { %v1401_v27 = vpop.permute.xlu0 %1400  ;;  %v1383_v15 = vpop.permute.xlu1 %1382 }
 0x3fe   :  { %v1407_v7 = vpop.permute.xlu2 %1406  ;;  %v1486_v59 = vperm.slane %v1383_v15, %v2570_v14  ;;  %v1496_v2 = vperm.slane %v1401_v27, %v2579_v22 }
 0x3ff   :  { %v1500_v16 = vperm.slane %v1407_v7, %v2570_v14 }
 0x400   :  { %v1488_v39 = vsel %vm554_vm0, %v1487_v38, %v1486_v59  ;;  %v1497_v37 = vsel %vm558_vm1, %v1496_v2, %v1495_v5 }
 0x405   :  { %v1389_v31 = vpop.permute.xlu1 %1388  ;;  %v1404_v13 = vpop.permute.xlu0 %1403 }
 0x406   :  { %v1413_v28 = vpop.permute.xlu2 %1412  ;;  %v1489_v53 = vperm.slane %v1389_v31, %v2579_v22  ;;  %v1498_v50 = vperm.slane %v1404_v13, %v2586_v12 }
 0x407   :  { %v1503_v4 = vperm.slane %v1413_v28, %v2579_v22 }
 0x408   :  { %v1490_v56 = vsel %vm558_vm1, %v1489_v53, %v1488_v39  ;;  %v1499_v57 = vsel %vm562_vm2, %v1498_v50, %v1497_v37 }
 0x40d   :  { %v1392_v17 = vpop.permute.xlu1 %1391  ;;  %v1422_v29 = vpop.permute.xlu0 %1421 }
 0x40e   :  { %v1416_v36 = vpop.permute.xlu2 %1415  ;;  %v1491_v32 = vperm.slane %v1392_v17, %v2586_v12  ;;  %v1508_v35 = vperm.slane %v1422_v29, %v2576_v19 }
 0x40f   :  { %v1505_v43 = vperm.slane %v1416_v36, %v2586_v12 }
 0x410   :  { %v1492_v44 = vsel %vm562_vm2, %v1491_v32, %v1490_v56 }
 0x411   :  { %v1537_v24 = vsel %vm631_vm5, %v1492_v44, %v1536_v10 }
 0x412   :  { %v1538_v27 = vsel %vm633_vm6, %v1499_v57, %v1537_v24 }
 0x415   :  { %v1410_v8 = vpop.permute.xlu1 %1409  ;;  %v1431_v51 = vpop.permute.xlu0 %1430 }
 0x416   :  { %v1434_v60 = vpop.permute.xlu2 %1433  ;;  %v1501_v30 = vperm.slane %v1410_v8, %v2576_v19  ;;  %v1514_v46 = vperm.slane %v1431_v51, %v2570_v14 }
 0x417   :  { %v1515_v41 = vperm.slane %v1434_v60, %v2576_v19 }
 0x418   :  { %v1502_v0 = vsel %vm554_vm0, %v1501_v30, %v1500_v16 }
 0x419   :  { %v1504_v3 = vsel %vm558_vm1, %v1503_v4, %v1502_v0  ;;  %v1516_v63 = vsel %vm554_vm0, %v1515_v41, %v1514_v46  ;;  %v1556_v0 = vstv %s2024_s3  ;;  %s1879_s3 = scalar_select %p1878_p6, 2.0, 4.0 }
 0x41a   :  { %v1506_v47 = vsel %vm562_vm2, %v1505_v43, %v1504_v3  ;;  %p1932_p6 = scmp.ne.s32.totalorder %s3521_s16, 4294967295 }
 0x41b   :  { %v1539_v7 = vsel %vm635_vm7, %v1506_v47, %v1538_v27  ;;  %s3778_s3 = smov (%p1877_p7, %s1879_s3), 1.0  ;;  %p1959_p7 = scmp.eq.s32.totalorder %s3525_s17, 1 }
 0x41c   :  { %s1901_s18 = scalar_select %p1876_p8, %s3778_s3, 0.0 }
 0x41d   :  { %v1419_v34 = vpop.permute.xlu1 %1418  ;;  %v1437_v21 = vpop.permute.xlu0 %1436 }
 0x41e   :  { %v1517_v6 = vperm.slane %v1437_v21, %v2579_v22  ;;  %v1507_v49 = vperm.slane %v1419_v34, %v2570_v14  ;;  %v1440_v40 = vpop.permute.xlu2 %1439 }
 0x41f   :  { %v1519_v23 = vperm.slane %v1440_v40, %v2586_v12 }
 0x420   :  { %v1518_v42 = vsel %vm558_vm1, %v1517_v6, %v1516_v63  ;;  %v1509_v54 = vsel %vm554_vm0, %v1508_v35, %v1507_v49 }
 0x421   :  { %v1520_v31 = vsel %vm562_vm2, %v1519_v23, %v1518_v42 }
 0x425   :  { %v1425_v48 = vpop.permute.xlu1 %1424  ;;  %v1446_v52 = vpop.permute.xlu0 %1445 }
 0x426   :  { %v1510_v62 = vperm.slane %v1425_v48, %v2579_v22  ;;  %v1455_v8 = vpop.permute.xlu2 %1454  ;;  %v1522_v58 = vperm.slane %v1446_v52, %v2576_v19 }
 0x427   :  { %v1528_v34 = vperm.slane %v1455_v8, %v2570_v14 }
 0x428   :  { %v1511_v61 = vsel %vm558_vm1, %v1510_v62, %v1509_v54 }
 0x42d   :  { %v1428_v26 = vpop.permute.xlu1 %1427  ;;  %v1449_v36 = vpop.permute.xlu0 %1448 }
 0x42e   :  { %v1512_v20 = vperm.slane %v1428_v26, %v2586_v12  ;;  %v1461_v25 = vpop.permute.xlu2 %1460  ;;  %v1524_v53 = vperm.slane %v1449_v36, %v2579_v22 }
 0x42f   :  { %v1531_v59 = vperm.slane %v1461_v25, %v2579_v22  ;;  %v1552_v22 = vstv %s1551_s2 }
 0x430   :  { %v1513_v15 = vsel %vm562_vm2, %v1512_v20, %v1511_v61 }
 0x431   :  { %v1540_v13 = vsel %vm637_vm8, %v1513_v15, %v1539_v7  ;;  %vm1640_vm8 = vcmp.eq.s32.totalorder %v2570_v14, 1 }
 0x432   :  { %v1541_v28 = vsel %vm639_vm9, %v1520_v31, %v1540_v13  ;;  %vm1639_vm9 = vcmp.eq.s32.totalorder %v2570_v14, 0 }
 0x433   :  { %v1545_v17 = vsel %vm644_vm10, %v1541_v28, 0.0  ;;  %vm1649_vm10 = vcmask 23552  }
 0x434   :  { %1546 = vadd.xlane.f32.xlu2 %v1545_v17 }
 0x435   :  { %v1443_v29 = vpop.permute.xlu1 %1442  ;;  %v1464_v30 = vpop.permute.xlu0 %1463 }
 0x436   :  { %v1521_v60 = vperm.slane %v1443_v29, %v2570_v14  ;;  %v1533_v16 = vperm.slane %v1464_v30, %v2586_v12 }
 0x438   :  { %v1523_v33 = vsel %vm554_vm0, %v1522_v58, %v1521_v60 }
 0x439   :  { %v1525_v21 = vsel %vm558_vm1, %v1524_v53, %v1523_v33 }
 0x43d   :  { %v1458_v51 = vpop.permute.xlu1 %1457 }
 0x43e   :  { %v1529_v55 = vperm.slane %v1458_v51, %v2576_v19 }
 0x440   :  { %v1530_v1 = vsel %vm554_vm0, %v1529_v55, %v1528_v34 }
 0x441   :  { %v1532_v45 = vsel %vm558_vm1, %v1531_v59, %v1530_v1 }
 0x442   :  { %v1534_v48 = vsel %vm562_vm2, %v1533_v16, %v1532_v45 }
 0x445   :  { %v1452_v38 = vpop.permute.xlu1 %1451 }
 0x446   :  { %v1526_v32 = vperm.slane %v1452_v38, %v2586_v12 }
 0x448   :  { %v1527_v19 = vsel %vm562_vm2, %v1526_v32, %v1525_v21 }
 0x449   :  { %v1542_v11 = vsel %vm627_vm3, %v1534_v48, %v1527_v19 }
 0x44a   :  { %v1548_v39 = vsel %vm648_vm11, %v1542_v11, 0.0 }
 0x44b   :  { %1549 = vadd.xlane.f32.xlu1 %v1548_v39 }
 0x4a7   :  { %v1547_v9 = vpop.xlane.xlu2 %1546 }
 0x4a8   :  { %v1553_v56 = vadd.f32 %v1552_v22, %v1547_v9 }
 0x4aa   :  { %v1557_v12 = vsub.f32 %v1556_v0, %v1553_v56  ;;  %v1599_v4 = vsub.f32 %v1598_v18, %v1553_v56 }
 0x4ac   :  { %v2025_v2 = vmul.f32 -1.442695, %v1557_v12  ;;  %v2028_v44 = vmul.f32 -1.442695, %v1599_v4 }
 0x4ae   :  { %2095 = vpow2.f32 %v2025_v2 }
 0x4af   :  { %2097 = vpow2.f32 %v2028_v44 }
 0x4b4   :  { %v2096_v46 = vpop.eup %2095 }
 0x4b5   :  { %v2098_v41 = vpop.eup %2097  ;;  %v1565_v50 = vadd.f32 1.0, %v2096_v46 }
 0x4b6   :  { %v1607_v3 = vadd.f32 1.0, %v2098_v41 }
 0x4b7   :  { %2099 = vrcp.f32 %v1565_v50  ;;  %v1576_v35 = vand.u32 2147483647, %v1565_v50  ;;  %v1578_v63 = vand.u32 2147483648, %v1565_v50  ;;  %vm1572_vm2 = vweird.f32 %v1565_v50 }
 0x4b8   :  { %2101 = vrcp.f32 %v1607_v3  ;;  %v1618_v47 = vand.u32 2147483647, %v1607_v3  ;;  %v1620_v57 = vand.u32 2147483648, %v1607_v3  ;;  %vm1614_vm4 = vweird.f32 %v1607_v3 }
 0x4b9   :  { %v1579_v61 = vor.u32 1.1754944e-38, %v1578_v63  ;;  %vm1577_vm5 = vcmp.eq.f32.partialorder %v1576_v35, 8.507059e+37 }
 0x4ba   :  { %v1621_v7 = vor.u32 1.1754944e-38, %v1620_v57  ;;  %vm1619_vm7 = vcmp.eq.f32.partialorder %v1618_v47, 8.507059e+37 }
 0x4bd   :  { %v2100_v6 = vpop.eup %2099 }
 0x4be   :  { %v2102_v49 = vpop.eup %2101  ;;  %v1550_v40 = vpop.xlane.xlu1 %1549  ;;  %v1568_v10 = vmul.f32 %v2100_v6, %v1565_v50  ;;  %vm1573_vm0 = vweird.f32 %v2100_v6 }
 0x4bf   :  { %v1554_v43 = vadd.f32 %v1552_v22, %v1550_v40  ;;  %v1610_v62 = vmul.f32 %v2102_v49, %v1607_v3  ;;  %vm1615_vm1 = vweird.f32 %v2102_v49  ;;  %vm1574_vm3 = vmor %vm1572_vm2, %vm1573_vm0 }
 0x4c0   :  { %v1569_v5 = vsub.f32 1.0, %v1568_v10  ;;  %vm1616_vm6 = vmor %vm1614_vm4, %vm1615_vm1 }
 0x4c1   :  { %v1558_v24 = vsub.f32 %v1556_v0, %v1554_v43  ;;  %v1600_v37 = vsub.f32 %v1598_v18, %v1554_v43  ;;  %v1611_v23 = vsub.f32 1.0, %v1610_v62 }
 0x4c2   :  { %v1570_v26 = vmul.f32 %v2100_v6, %v1569_v5 }
 0x4c3   :  { %v2026_v42 = vmul.f32 -1.442695, %v1558_v24  ;;  %v2029_v54 = vmul.f32 -1.442695, %v1600_v37  ;;  %v1612_v20 = vmul.f32 %v2102_v49, %v1611_v23 }
 0x4c4   :  { %v1571_v52 = vadd.f32 %v2100_v6, %v1570_v26 }
 0x4c5   :  { %2103 = vpow2.f32 %v2026_v42  ;;  %v1613_v27 = vadd.f32 %v2102_v49, %v1612_v20 }
 0x4c6   :  { %2105 = vpow2.f32 %v2029_v54  ;;  %v1575_v15 = vsel %vm1574_vm3, %v2100_v6, %v1571_v52  ;;  %vm1653_vm3 = vcmask 17408  }
 0x4c7   :  { %v1580_v31 = vsel %vm1577_vm5, %v1579_v61, %v1575_v15  ;;  %v1617_v13 = vsel %vm1616_vm6, %v2102_v49, %v1613_v27 }
 0x4c8   :  { %v1622_v28 = vsel %vm1619_vm7, %v1621_v7, %v1617_v13  ;;  %v1715_v7 = vstv %s3440_s4  ;;  %v1769_v13 = vstv %s3444_s9 }
 0x4c9   :  { %v1641_v17 = vsub.f32 %v1622_v28, %v1580_v31  ;;  %v1643_v29 = vsub.f32 1.0, %v1622_v28  ;;  %v1797_v28 = vstv %s3450_s12 }
 0x4cb   :  { %v2104_v8 = vpop.eup %2103  ;;  %v1645_v36 = vsel %vm1640_vm8, %v1641_v17, %v1643_v29  ;;  %v1825_v17 = vstv %s3452_s1 }
 0x4cc   :  { %v2106_v51 = vpop.eup %2105  ;;  %v1566_v55 = vadd.f32 1.0, %v2104_v8  ;;  %v1647_v34 = vsel %vm1639_vm9, %v1580_v31, %v1645_v36  ;;  %v1741_v31 = vstv %s3442_s8 }
 0x4cd   :  { %v1608_v25 = vadd.f32 1.0, %v2106_v51  ;;  %v1650_v60 = vsel %vm1649_vm10, %v1647_v34, -inf }
 0x4ce   :  { %2107 = vrcp.f32 %v1566_v55  ;;  %1651 = vmax.xlane.f32.xlu0 %v1650_v60  ;;  %v1593_v53 = vand.u32 2147483648, %v1566_v55  ;;  %v1591_v16 = vand.u32 2147483647, %v1566_v55  ;;  %vm1587_vm12 = vweird.f32 %v1566_v55 }
 0x4cf   :  { %2109 = vrcp.f32 %v1608_v25  ;;  %v1635_v32 = vand.u32 2147483648, %v1608_v25  ;;  %v1633_v19 = vand.u32 2147483647, %v1608_v25  ;;  %vm1629_vm14 = vweird.f32 %v1608_v25 }
 0x4d0   :  { %v1594_v11 = vor.u32 1.1754944e-38, %v1593_v53  ;;  %vm1592_vm0 = vcmp.eq.f32.partialorder %v1591_v16, 8.507059e+37 }
 0x4d1   :  { %v1636_v0 = vor.u32 1.1754944e-38, %v1635_v32  ;;  %vm1634_vm2 = vcmp.eq.f32.partialorder %v1633_v19, 8.507059e+37 }
 0x4d4   :  { %v2108_v58 = vpop.eup %2107 }
 0x4d5   :  { %v2110_v1 = vpop.eup %2109  ;;  %v1583_v59 = vmul.f32 %v2108_v58, %v1566_v55  ;;  %vm1588_vm11 = vweird.f32 %v2108_v58  ;;  %v1853_v55 = vstv %s3454_s13 }
 0x4d6   :  { %v1625_v30 = vmul.f32 %v2110_v1, %v1608_v25  ;;  %vm1630_vm15 = vweird.f32 %v2110_v1  ;;  %vm1589_vm13 = vmor %vm1587_vm12, %vm1588_vm11  ;;  %vm1718_vm11 = vcmask 16384   ;;  %vm3487_vm12 = vcmp.eq.s32.totalorder %v2570_v14, %v1825_v17 }
 0x4d7   :  { %v1584_v33 = vsub.f32 1.0, %v1583_v59  ;;  %vm1631_vm1 = vmor %vm1629_vm14, %vm1630_vm15  ;;  %vm3482_vm15 = vcmp.eq.s32.totalorder %v2570_v14, %v1797_v28 }
 0x4d8   :  { %v1626_v38 = vsub.f32 1.0, %v1625_v30 }
 0x4d9   :  { %v1585_v45 = vmul.f32 %v2108_v58, %v1584_v33 }
 0x4da   :  { %v1627_v21 = vmul.f32 %v2110_v1, %v1626_v38 }
 0x4db   :  { %v1586_v48 = vadd.f32 %v2108_v58, %v1585_v45 }
 0x4dc   :  { %v1628_v39 = vadd.f32 %v2110_v1, %v1627_v21 }
 0x4dd   :  { %v1590_v22 = vsel %vm1589_vm13, %v2108_v58, %v1586_v48  ;;  %vm3498_vm13 = vcmp.eq.s32.totalorder %v2570_v14, %v1853_v55 }
 0x4de   :  { %v1595_v18 = vsel %vm1592_vm0, %v1594_v11, %v1590_v22  ;;  %v1632_v9 = vsel %vm1631_vm1, %v2110_v1, %v1628_v39  ;;  %v1881_v11 = vstv %s3459_s14  ;;  %s3764_s14 = sld [smem:[#allocation34_spill]] }
 0x4df   :  { %v1637_v56 = vsel %vm1634_vm2, %v1636_v0, %v1632_v9  ;;  %vm3513_vm2 = vcmp.eq.s32.totalorder %v2570_v14, %v1881_v11 }
 0x4e0   :  { %v1642_v12 = vsub.f32 %v1637_v56, %v1595_v18  ;;  %v1644_v4 = vsub.f32 1.0, %v1637_v56 }
 0x4e2   :  { %v1646_v2 = vsel %vm1640_vm8, %v1642_v12, %v1644_v4  ;;  %vm3464_vm8 = vcmp.eq.s32.totalorder %v2570_v14, %v1715_v7 }
 0x4e3   :  { %v1648_v44 = vsel %vm1639_vm9, %v1595_v18, %v1646_v2  ;;  %vm3469_vm9 = vcmp.eq.s32.totalorder %v2570_v14, %v1741_v31 }
 0x4e4   :  { %v1654_v46 = vsel %vm1653_vm3, %v1648_v44, -inf }
 0x4e5   :  { %1655 = vmax.xlane.f32.xlu2 %v1654_v46 }
 0x541   :  { %v1652_v41 = vpop.xlane.xlu0 %1651 }
 0x542   :  { %v1657_v50 = vsub.f32 %v1647_v34, %v1652_v41 }
 0x544   :  { %v1659_v3 = vmul.f32 1.442695, %v1657_v50 }
 0x546   :  { %2111 = vpow2.f32 %v1659_v3 }
 0x54c   :  { %v2112_v6 = vpop.eup %2111 }
 0x54d   :  { %v1663_v49 = vsel %vm1649_vm10, %v2112_v6, 0.0 }
 0x54e   :  { %1664 = vadd.xlane.f32.xlu1 %v1663_v49 }
 0x558   :  { %v1656_v40 = vpop.xlane.xlu2 %1655 }
 0x559   :  { %v1658_v10 = vsub.f32 %v1648_v44, %v1656_v40  ;;  %v1909_v44 = vstv %s3479_s15  ;;  %s2172_s15 = smov [#allocation7]  }
 0x55b   :  { %v1661_v43 = vmul.f32 1.442695, %v1658_v10 }
 0x55d   :  { %2113 = vpow2.f32 %v1661_v43 }
 0x563   :  { %v3436_v62 = vpop.eup %2113 }
 0x564   :  { %v1666_v5 = vsel %vm1653_vm3, %v3436_v62, 0.0 }
 0x565   :  { %1667 = vadd.xlane.f32.xlu0 %v1666_v5 }
 0x5c1   :  { %v1665_v35 = vpop.xlane.xlu1 %1664 }
 0x5c2   :  { %2115 = vrcp.f32 %v1665_v35  ;;  %v1680_v23 = vand.u32 2147483648, %v1665_v35  ;;  %v1678_v47 = vand.u32 2147483647, %v1665_v35  ;;  %vm1674_vm5 = vweird.f32 %v1665_v35 }
 0x5c4   :  { %v1681_v42 = vor.u32 1.1754944e-38, %v1680_v23  ;;  %vm1679_vm7 = vcmp.eq.f32.partialorder %v1678_v47, 8.507059e+37  ;;  %v1937_v23 = vstv %s3521_s16 }
 0x5c8   :  { %v2116_v24 = vpop.eup %2115 }
 0x5c9   :  { %v1670_v37 = vmul.f32 %v2116_v24, %v1665_v35  ;;  %vm1675_vm4 = vweird.f32 %v2116_v24 }
 0x5ca   :  { %vm1676_vm6 = vmor %vm1674_vm5, %vm1675_vm4  ;;  %vm1910_vm5 = vcmp.eq.s32.totalorder %v2570_v14, %v1909_v44 }
 0x5cb   :  { %v1671_v63 = vsub.f32 1.0, %v1670_v37 }
 0x5cd   :  { %v1672_v26 = vmul.f32 %v2116_v24, %v1671_v63 }
 0x5cf   :  { %v1673_v57 = vadd.f32 %v2116_v24, %v1672_v26  ;;  %v1962_v26 = vstv %s3525_s17 }
 0x5d1   :  { %v1677_v54 = vsel %vm1676_vm6, %v2116_v24, %v1673_v57  ;;  %vm1963_vm6 = vcmp.eq.s32.totalorder %v2570_v14, %v1962_v26 }
 0x5d2   :  { %v1682_v20 = vsel %vm1679_vm7, %v1681_v42, %v1677_v54 }
 0x5d3   :  { %v1683_v52 = vmul.f32 %v2112_v6, %v1682_v20 }
 0x5d5   :  { %1699 = vst.msk [vmem:[%s3673_s5] sm:$0xff] %vm1649_vm10, %v1683_v52  ;;  %v1701_v61 = vmax.f32 %v1683_v52, 1e-05  ;;  %vm3474_vm10 = vcmp.eq.s32.totalorder %v2570_v14, %v1769_v13 }
 0x5d7   :  { %v1703_v27 = vmin.f32 %v1701_v61, 0.99999 }
 0x5d8   :  { %v1668_v15 = vpop.xlane.xlu0 %1667 }
 0x5d9   :  { %2117 = vlog2.f32 %v1703_v27  ;;  %v1693_v21 = vand.u32 2147483647, %v1668_v15  ;;  %v1695_v19 = vand.u32 2147483648, %v1668_v15  ;;  %vm1689_vm0 = vweird.f32 %v1668_v15 }
 0x5da   :  { %2119 = vrcp.f32 %v1668_v15 }
 0x5db   :  { %v1696_v4 = vor.u32 1.1754944e-38, %v1695_v19  ;;  %vm1694_vm4 = vcmp.eq.f32.partialorder %v1693_v21, 8.507059e+37 }
 0x5df   :  { %v2118_v29 = vpop.eup %2117 }
 0x5e0   :  { %v2120_v34 = vpop.eup %2119  ;;  %v1706_v25 = vmul.f32 0.6931472, %v2118_v29 }
 0x5e1   :  { %v1685_v60 = vmul.f32 %v2120_v34, %v1668_v15  ;;  %vm1690_vm14 = vweird.f32 %v2120_v34 }
 0x5e2   :  { %v1717_v59 = vsel %vm3464_vm8, %v1706_v25, 0.0  ;;  %v1743_v30 = vsel %vm3469_vm9, %v1706_v25, 0.0  ;;  %v1771_v33 = vsel %vm3474_vm10, %v1706_v25, 0.0  ;;  %v1799_v48 = vsel %vm3482_vm15, %v1706_v25, 0.0  ;;  %vm1691_vm1 = vmor %vm1689_vm0, %vm1690_vm14 }
 0x5e3   :  { %v1686_v38 = vsub.f32 1.0, %v1685_v60  ;;  %v1719_v45 = vsel %vm1718_vm11, %v1717_v59, 0.0  ;;  %v1745_v16 = vrot.slane %v1743_v30, 1  ;;  %v1773_v32 = vrot.slane %v1771_v33, 2 }
 0x5e4   :  { %1720 = vadd.xlane.f32.xlu2 %v1719_v45  ;;  %v1827_v18 = vsel %vm3487_vm12, %v1706_v25, 0.0  ;;  %v1855_v9 = vsel %vm3498_vm13, %v1706_v25, 0.0  ;;  %v1801_v12 = vrot.slane %v1799_v48, 3  ;;  %v1883_v40 = vsel %vm3513_vm2, %v1706_v25, 0.0 }
 0x5e5   :  { %v1687_v39 = vmul.f32 %v2120_v34, %v1686_v38  ;;  %v1747_v22 = vsel %vm1718_vm11, %v1745_v16, 0.0  ;;  %v1775_v0 = vsel %vm1718_vm11, %v1773_v32, 0.0  ;;  %v1829_v46 = vrot.slane %v1827_v18, 4 }
 0x5e6   :  { %1748 = vadd.xlane.f32.xlu1 %v1747_v22  ;;  %1776 = vadd.xlane.f32.xlu0 %v1775_v0  ;;  %v1857_v41 = vrot.slane %v1855_v9, 5  ;;  %v1803_v6 = vsel %vm1718_vm11, %v1801_v12, 0.0  ;;  %v1885_v35 = vrot.slane %v1883_v40, 6 }
 0x5e7   :  { %v1688_v56 = vadd.f32 %v2120_v34, %v1687_v39  ;;  %v1831_v10 = vsel %vm1718_vm11, %v1829_v46, 0.0 }
 0x5e8   :  { %v1859_v43 = vsel %vm1718_vm11, %v1857_v41, 0.0  ;;  %v1887_v63 = vsel %vm1718_vm11, %v1885_v35, 0.0 }
 0x5e9   :  { %v1692_v50 = vsel %vm1691_vm1, %v2120_v34, %v1688_v56 }
 0x5ea   :  { %v1697_v3 = vsel %vm1694_vm4, %v1696_v4, %v1692_v50 }
 0x5eb   :  { %v1698_v49 = vmul.f32 %v3436_v62, %v1697_v3  ;;  %v1911_v62 = vsel %vm1910_vm5, %v1706_v25, 0.0 }
 0x5ec   :  { %1804 = vadd.xlane.f32.xlu2 %v1803_v6  ;;  %v1913_v37 = vrot.slane %v1911_v62, 7 }
 0x5ed   :  { %v1702_v5 = vmax.f32 %v1698_v49, 1e-05  ;;  %1700 = vst.msk [vmem:[%s3673_s5 + $0x8] sm:$0x3] %vm1653_vm3, %v1698_v49  ;;  %vm1938_vm3 = vcmp.eq.s32.totalorder %v2570_v14, %v1937_v23  ;;  %s1713_s5 = scalar_select %p1712_p0, 2.0, 4.0 }
 0x5ee   :  { %1832 = vadd.xlane.f32.xlu1 %v1831_v10  ;;  %1860 = vadd.xlane.f32.xlu0 %v1859_v43  ;;  %v1915_v47 = vsel %vm1718_vm11, %v1913_v37, 0.0  ;;  %p1820_p0 = scmp.ne.s32.totalorder %s3452_s1, 4294967295 }
 0x5ef   :  { %v1704_v24 = vmin.f32 %v1702_v5, 0.99999  ;;  %s3766_s5 = smov (%p1711_p1, %s1713_s5), 1.0  ;;  %p1850_p1 = scmp.eq.s32.totalorder %s3454_s13, 1 }
 0x5f0   :  { %s1733_s21 = scalar_select %p1710_p3, %s3766_s5, 0.0 }
 0x5f1   :  { %2121 = vlog2.f32 %v1704_v24  ;;  %s1851_s0 = scalar_select %p1850_p1, 2.0, 4.0 }
 0x5f2   :  { %s1762_s25 = sadd.f32 %s1761_s22, %s1733_s21  ;;  %p1934_p1 = scmp.eq.s32.totalorder %s3521_s16, 1 }
 0x5f3   :  { %s1845_s30 = scalar_select %p1820_p0, %s3774_s26, 0.0 }
 0x5f4   :  { %1888 = vadd.xlane.f32.xlu2 %v1887_v63  ;;  %s1790_s29 = sadd.f32 %s1789_s27, %s1762_s25  ;;  %s3776_s0 = smov (%p1849_p4, %s1851_s0), 1.0 }
 0x5f5   :  { %s1873_s11 = scalar_select %p3699_p2, %s3776_s0, 0.0 }
 0x5f6   :  { %1916 = vadd.xlane.f32.xlu1 %v1915_v47  ;;  %s1818_s2 = sadd.f32 %s1817_s28, %s1790_s29  ;;  %p1933_p4 = scmp.eq.s32.totalorder %s3521_s16, 0 }
 0x5f7   :  { %v2122_v57 = vpop.eup %2121  ;;  %s1935_s21 = scalar_select %p1934_p1, 2.0, 4.0 }
 0x5f8   :  { %v1708_v42 = vmul.f32 0.6931472, %v2122_v57  ;;  %s1846_s7 = sadd.f32 %s1845_s30, %s1818_s2  ;;  %p1957_p2 = scmp.ne.s32.totalorder %s3525_s17, 4294967295 }
 0x5f9   :  { %s1929_s22 = scalar_select %p1904_p13, %s3780_s10, 0.0 }
 0x5fa   :  { %v1939_v54 = vsel %vm1938_vm3, %v1708_v42, 0.0  ;;  %v1964_v20 = vsel %vm1963_vm6, %v1708_v42, 0.0  ;;  %s1874_s19 = sadd.f32 %s1873_s11, %s1846_s7  ;;  %s3782_s21 = smov (%p1933_p4, %s1935_s21), 1.0 }
 0x5fb   :  { %v1940_v52 = vsel %vm1718_vm11, %v1939_v54, 0.0  ;;  %v1966_v61 = vrot.slane %v1964_v20, 1  ;;  %s1960_s27 = scalar_select %p1959_p7, 2.0, 4.0 }
 0x5fc   :  { %1941 = vadd.xlane.f32.xlu0 %v1940_v52  ;;  %s1902_s25 = sadd.f32 %s1901_s18, %s1874_s19 }
 0x5fd   :  { %v1968_v27 = vsel %vm1718_vm11, %v1966_v61, 0.0  ;;  %s1954_s29 = scalar_select %p1932_p6, %s3782_s21, 0.0 }
 0x5fe   :  { %1969 = vadd.xlane.f32.xlu2 %v1968_v27  ;;  %s1930_s28 = sadd.f32 %s1929_s22, %s1902_s25  ;;  %s3784_s27 = smov (%p1958_p9, %s1960_s27), 1.0 }
 0x5ff   :  { %s1982_s2 = scalar_select %p1957_p2, %s3784_s27, 0.0 }
 0x600   :  { %s1955_s30 = sadd.f32 %s1954_s29, %s1930_s28 }
 0x602   :  { %s1983_s7 = sadd.f32 %s1982_s2, %s1955_s30 }
 0x604   :  { %v3621_v25 = vstv %s1983_s7 }
 0x605   :  { %2123 = vrcp.f32 %v3621_v25  ;;  %vm1990_vm7 = vweird.f32 %v3621_v25 }
 0x60b   :  { %v3624_v22 = vpop.eup %2123 }
 0x60c   :  { %v1986_v3 = vmul.f32 %v3624_v22, %v3621_v25  ;;  %vm1991_vm8 = vweird.f32 %v3624_v22 }
 0x60d   :  { %vm1992_vm9 = vmor %vm1990_vm7, %vm1991_vm8 }
 0x60e   :  { %v1987_v37 = vsub.f32 1.0, %v1986_v3 }
 0x610   :  { %v1988_v20 = vmul.f32 %v3624_v22, %v1987_v37 }
 0x657   :  { %v1721_v14 = vpop.xlane.xlu2 %1720 }
 0x658   :  { %v1722_v15 = vrot.slane %v1721_v14, 4 }
 0x659   :  { %v1749_v7 = vpop.xlane.xlu1 %1748  ;;  %v1777_v31 = vpop.xlane.xlu0 %1776 }
 0x65a   :  { %v1723_v13 = vadd.f32 %v1722_v15, %v1721_v14  ;;  %v1750_v28 = vrot.slane %v1749_v7, 4  ;;  %v1778_v17 = vrot.slane %v1777_v31, 4 }
 0x65c   :  { %v1724_v29 = vrot.slane %v1723_v13, 2  ;;  %v1751_v8 = vadd.f32 %v1750_v28, %v1749_v7  ;;  %v1779_v36 = vadd.f32 %v1778_v17, %v1777_v31  ;;  %v1989_v28 = vadd.f32 %v3624_v22, %v1988_v20 }
 0x65d   :  { %v1994_v17 = vand.u32 2147483647, %v3621_v25 }
 0x65e   :  { %v1752_v51 = vrot.slane %v1751_v8, 2  ;;  %v1780_v55 = vrot.slane %v1779_v36, 2  ;;  %v1725_v34 = vadd.f32 %v1724_v29, %v1723_v13  ;;  %v1996_v13 = vand.u32 2147483648, %v3621_v25 }
 0x65f   :  { %v1805_v60 = vpop.xlane.xlu2 %1804  ;;  %vm1995_vm10 = vcmp.eq.f32.partialorder %v1994_v17, 8.507059e+37 }
 0x660   :  { %v1806_v58 = vrot.slane %v1805_v60, 4  ;;  %v1726_v1 = vrot.slane %v1725_v34, 1  ;;  %v1753_v59 = vadd.f32 %v1752_v51, %v1751_v8  ;;  %v1781_v30 = vadd.f32 %v1780_v55, %v1779_v36 }
 0x661   :  { %v1833_v33 = vpop.xlane.xlu1 %1832  ;;  %v1861_v53 = vpop.xlane.xlu0 %1860  ;;  %v1997_v55 = vor.u32 1.1754944e-38, %v1996_v13 }
 0x662   :  { %v1807_v38 = vadd.f32 %v1806_v58, %v1805_v60  ;;  %v1834_v45 = vrot.slane %v1833_v33, 4  ;;  %v1862_v16 = vrot.slane %v1861_v53, 4  ;;  %v1727_v32 = vadd.f32 %v1726_v1, %v1725_v34 }
 0x663   :  { %v1754_v21 = vrot.slane %v1753_v59, 1  ;;  %v1782_v19 = vrot.slane %v1781_v30, 1  ;;  %v1993_v34 = vsel %vm1992_vm9, %v3624_v22, %v1989_v28 }
 0x664   :  { %v1808_v48 = vrot.slane %v1807_v38, 2  ;;  %v1835_v11 = vadd.f32 %v1834_v45, %v1833_v33  ;;  %v1863_v39 = vadd.f32 %v1862_v16, %v1861_v53  ;;  %2039 = vpush %v1727_v32  ;;  %v1998_v25 = vsel %vm1995_vm10, %v1997_v55, %v1993_v34 }
 0x665   :  { %v1755_v0 = vadd.f32 %v1754_v21, %v1753_v59  ;;  %v1783_v18 = vadd.f32 %v1782_v19, %v1781_v30 }
 0x666   :  { %v1836_v9 = vrot.slane %v1835_v11, 2  ;;  %v1864_v56 = vrot.slane %v1863_v39, 2  ;;  %v1809_v12 = vadd.f32 %v1808_v48, %v1807_v38 }
 0x667   :  { %2041 = vpush %v1755_v0  ;;  %v1889_v4 = vpop.xlane.xlu2 %1888 }
 0x668   :  { %2043 = vpush %v1783_v18  ;;  %v1890_v2 = vrot.slane %v1889_v4, 4  ;;  %v1810_v44 = vrot.slane %v1809_v12, 1  ;;  %v1837_v46 = vadd.f32 %v1836_v9, %v1835_v11  ;;  %v1865_v41 = vadd.f32 %v1864_v56, %v1863_v39 }
 0x669   :  { %v1917_v50 = vpop.xlane.xlu1 %1916 }
 0x66a   :  { %v1891_v6 = vadd.f32 %v1890_v2, %v1889_v4  ;;  %v1918_v49 = vrot.slane %v1917_v50, 4  ;;  %v1811_v40 = vadd.f32 %v1810_v44, %v1809_v12  ;;  %v1838_v10 = vrot.slane %v1837_v46, 1 }
 0x66b   :  { %v1866_v43 = vrot.slane %v1865_v41, 1 }
 0x66c   :  { %v1892_v5 = vrot.slane %v1891_v6, 2  ;;  %v1919_v62 = vadd.f32 %v1918_v49, %v1917_v50  ;;  %2045 = vpush %v1811_v40  ;;  %v1839_v35 = vadd.f32 %v1838_v10, %v1837_v46 }
 0x66d   :  { %v1867_v24 = vadd.f32 %v1866_v43, %v1865_v41 }
 0x66e   :  { %v1920_v63 = vrot.slane %v1919_v62, 2  ;;  %2047 = vpush %v1839_v35  ;;  %v1893_v23 = vadd.f32 %v1892_v5, %v1891_v6 }
 0x66f   :  { %v1942_v26 = vpop.xlane.xlu0 %1941  ;;  %2049 = vpush %v1867_v24 }
 0x670   :  { %v1921_v47 = vadd.f32 %v1920_v63, %v1919_v62  ;;  %v1943_v57 = vrot.slane %v1942_v26, 4  ;;  %v1894_v42 = vrot.slane %v1893_v23, 1 }
 0x671   :  { %v1970_v54 = vpop.xlane.xlu2 %1969 }
 0x672   :  { %v1944_v52 = vadd.f32 %v1943_v57, %v1942_v26  ;;  %v1971_v61 = vrot.slane %v1970_v54, 4  ;;  %v1895_v27 = vadd.f32 %v1894_v42, %v1893_v23  ;;  %v1922_v14 = vrot.slane %v1921_v47, 1 }
 0x674   :  { %v1945_v15 = vrot.slane %v1944_v52, 2  ;;  %v1972_v7 = vadd.f32 %v1971_v61, %v1970_v54  ;;  %2051 = vpush %v1895_v27  ;;  %v1923_v31 = vadd.f32 %v1922_v14, %v1921_v47 }
 0x676   :  { %v1946_v29 = vadd.f32 %v1945_v15, %v1944_v52  ;;  %v1973_v8 = vrot.slane %v1972_v7, 2  ;;  %2053 = vpush %v1923_v31 }
 0x678   :  { %v1974_v36 = vadd.f32 %v1973_v8, %v1972_v7  ;;  %v1947_v51 = vrot.slane %v1946_v29, 1 }
 0x67a   :  { %v1948_v60 = vadd.f32 %v1947_v51, %v1946_v29  ;;  %v1975_v58 = vrot.slane %v1974_v36, 1 }
 0x67c   :  { %2055 = vpush %v1948_v60  ;;  %v1976_v1 = vadd.f32 %v1975_v58, %v1974_v36 }
 0x67e   :  { %2057 = vpush %v1976_v1 }
 0x67f   :  { %2059 = vpush %v1998_v25 }
 0x695   :  { %s2040_s11 = spop %2039 }
 0x696   :  { %s1729_s18 = ssub.f32 0.0, %s2040_s11 }
 0x698   :  { %s1730_s19 = smul.f32 %s1729_s18, %s3766_s5  ;;  %s2042_s22 = spop %2041 }
 0x699   :  { %s1757_s25 = ssub.f32 0.0, %s2042_s22  ;;  %s2044_s28 = spop %2043 }
 0x69a   :  { %s1785_s30 = ssub.f32 0.0, %s2044_s28  ;;  %s3786_s19 = smov (!%p1710_p3, %s1730_s19), 0.0 }
 0x69b   :  { %s1758_s29 = smul.f32 %s1757_s25, %s3768_s20  ;;  %p3762_p3 = scmp.ne.s32.totalorder %s3454_s13, 4294967295 }
 0x69c   :  { %s1786_s2 = smul.f32 %s1785_s30, %s3770_s23 }
 0x69d   :  { %s3788_s29 = smov (!%p1736_p5, %s1758_s29), 0.0  ;;  %s2046_s7 = spop %2045 }
 0x69e   :  { %s1760_s6 = sadd.f32 %s3788_s29, %s3786_s19  ;;  %s3790_s2 = smov (!%p1764_p10, %s1786_s2), 0.0 }
 0x69f   :  { %s2048_s17 = spop %2047  ;;  %s1813_s5 = ssub.f32 0.0, %s2046_s7 }
 0x6a0   :  { %s2050_s11 = spop %2049  ;;  %s1788_s18 = sadd.f32 %s3790_s2, %s1760_s6 }
 0x6a1   :  { %s1814_s20 = smul.f32 %s1813_s5, %s3772_s24  ;;  %s1841_s22 = ssub.f32 0.0, %s2048_s17 }
 0x6a2   :  { %s1869_s4 = ssub.f32 0.0, %s2050_s11 }
 0x6a3   :  { %s3792_s20 = smov (!%p1792_p11, %s1814_s20), 0.0  ;;  %s1842_s8 = smul.f32 %s1841_s22, %s3774_s26 }
 0x6a4   :  { %s1816_s25 = sadd.f32 %s3792_s20, %s1788_s18  ;;  %s1870_s19 = smul.f32 %s1869_s4, %s3776_s0 }
 0x6a5   :  { %s2052_s23 = spop %2051  ;;  %s3794_s8 = smov (!%p1820_p0, %s1842_s8), 0.0 }
 0x6a6   :  { %s1844_s9 = sadd.f32 %s3794_s8, %s1816_s25  ;;  %s3796_s19 = smov (!%p3762_p3, %s1870_s19), 0.0 }
 0x6a7   :  { %s2054_s28 = spop %2053  ;;  %s1897_s29 = ssub.f32 0.0, %s2052_s23 }
 0x6a8   :  { %s1925_s12 = ssub.f32 0.0, %s2054_s28  ;;  %s2010_s4 = sshll.u32 %s3764_s14, 4  ;;  %s2011_s4 = int_to_ptr.hbm [resolvable:$true] %s2010_s4 }
 0x6a9   :  { %s1898_s6 = smul.f32 %s1897_s29, %s3778_s3  ;;  %s1872_s24 = sadd.f32 %s3796_s19, %s1844_s9 }
 0x6aa   :  { %s1926_s26 = smul.f32 %s1925_s12, %s3780_s10 }
 0x6ab   :  { %s3798_s6 = smov (!%p1876_p8, %s1898_s6), 0.0 }
 0x6ac   :  { %s1900_s0 = sadd.f32 %s3798_s6, %s1872_s24  ;;  %s3800_s26 = smov (!%p1904_p13, %s1926_s26), 0.0 }
 0x6ad   :  { %s2056_s30 = spop %2055 }
 0x6ae   :  { %s1950_s2 = ssub.f32 0.0, %s2056_s30 }
 0x6af   :  { %s2058_s1 = spop %2057  ;;  %s1928_s11 = sadd.f32 %s3800_s26, %s1900_s0 }
 0x6b0   :  { %s1951_s7 = smul.f32 %s1950_s2, %s3782_s21  ;;  %s1978_s5 = ssub.f32 0.0, %s2058_s1 }
 0x6b1   :  { %s2060_s3 = spop %2059 }
 0x6b2   :  { %s3802_s7 = smov (!%p1932_p6, %s1951_s7), 0.0  ;;  %s1979_s13 = smul.f32 %s1978_s5, %s3784_s27 }
 0x6b3   :  { %s1953_s18 = sadd.f32 %s3802_s7, %s1928_s11 }
 0x6b4   :  { %s3804_s13 = smov (!%p1957_p2, %s1979_s13), 0.0 }
 0x6b5   :  { %s1981_s10 = sadd.f32 %s3804_s13, %s1953_s18 }
 0x6b7   :  { %s2000_s8 = smul.f32 %s2060_s3, %s1981_s10 }
 0x6b9   :  { %2002 = sst [smem:[#allocation7]] %s2000_s8 }
 0x6ba   :  { %2013 = dma.smem_to_hbm %s2172_s15, 16, %s2011_s4, [#allocation3]  }
 0x6bb   :  { %2165 = dma.done.wait [#allocation3], 16  }
 0x6bc   :  { %2166 = vsyncadd [#allocation3], 4294967280 }
 0x6bd   :  { %2020 = sfence }
 0x6be   :  { %2021 = vsyncpa [#allocation3], 1 }
 0x6bf   :  { %2022 = vsyncpa [#allocation4], 1 }
 0x6c0   :  { %2023 = vsyncpa [#allocation6], 1 }

</bundles_post_ra>
